<compile_context>
chip_gen: v5e
topology: v5e:2x2
jax: 0.10.0
libtpu: 0.0.40
codegen_flags: <defaults>
</compile_context>

<pallas_src>
import numpy as np

import jax
import jax.numpy as jnp
from jax.experimental import pallas as pl
from jax.experimental.pallas import tpu as pltpu


CONCATE_OUT = {3: [2], 4: [2], 6: [2, 4], 8: [2, 6], 9: [3, 6],
               10: [2, 5, 8], 12: [3, 6, 9], 15: [3, 6, 9, 12],
               16: [2, 6, 10, 14]}


# ---------------------------------------------------------------------------
# Static structure ("plan") of the block: HarD wiring + SE/transition shapes.
# ---------------------------------------------------------------------------
def build_plan(in_channels, n_layers, patial_channel, H, W):
    assert n_layers in CONCATE_OUT
    C_blk = in_channels - patial_channel
    divisors = [i for i in range(1, n_layers + 1) if n_layers % i == 0]
    links = [[] for _ in range(n_layers)]
    for div in divisors:
        for k in range(0, n_layers, div):
            links[k].append(div)
    growth = C_blk // len(divisors)
    assert growth >= 1

    ch_counts = [C_blk]              # channels of layers_[i]; layers_[0]=input
    layer_cout = []
    for i in range(n_layers):
        cout = len(links[i + 1]) * growth if i != n_layers - 1 else C_blk
        layer_cout.append(cout)
        ch_counts.append(cout)

    # Statically simulate HarDBlockV2.forward wiring: which channel slices of
    # which earlier tensors are concatenated to form each conv's input.
    tensors = [[] for _ in range(n_layers)]
    conv_pieces = []                 # per layer: list of (src, a, b, concat_off)
    for layer in range(n_layers):
        C = ch_counts[layer]
        n_chunks = -(-C // growth)
        assert n_chunks == len(links[layer]), "unsupported HarDBlockV2 config"
        for i in range(n_chunks):
            a, b = i * growth, min((i + 1) * growth, C)
            tensors[layer + links[layer][i] - 1].append((layer, a, b))
        pieces, p = [], 0
        for (s, a, b) in tensors[layer]:
            pieces.append((s, a, b, p))
            p += b - a
        # PyTorch builds ConvLayer(channel, channel); concat width must match.
        assert p == layer_cout[layer], "conv-input width mismatch"
        conv_pieces.append(pieces)

    out_idx = [i for i in range(n_layers + 1)
               if i == n_layers or i in CONCATE_OUT[n_layers]]
    out_srcs, q = [], 0
    for i in out_idx:
        out_srcs.append((i, ch_counts[i], q))
        q += ch_counts[i]
    ouch = q
    link_count = sum(len(links[o]) for o in CONCATE_OUT[n_layers])
    assert ouch == growth * link_count + C_blk     # == HarDBlockV2.get_out_ch()
    hidden = ouch // 20                            # SELayer(reduction=20)
    assert hidden >= 1, "SELayer reduction=20 needs >=20 block output channels"

    src_list = sorted({s for pieces in conv_pieces for (s, _, _, _) in pieces})
    return dict(H=H, W=W, C_blk=C_blk, n_layers=n_layers, growth=growth,
                links=links, ch_counts=ch_counts, layer_cout=layer_cout,
                conv_pieces=conv_pieces, out_srcs=out_srcs, ouch=ouch,
                hidden=hidden, src_list=src_list,
                patial_channel=patial_channel)


# ---------------------------------------------------------------------------
# Synthetic deterministic parameters (BN folded to scale/bias; scale folded
# into the conv weights; multiplicative weights rounded to the bf16 grid so
# the bf16-MXU kernel and the f32 XLA reference use identical weight values).
# ---------------------------------------------------------------------------
def init_params(key, plan):
    def q16(a):
        return np.asarray(jnp.asarray(a).astype(jnp.bfloat16)
                          .astype(jnp.float32))

    n_layers = plan["n_layers"]
    ouch, hidden = plan["ouch"], plan["hidden"]
    conv_w, conv_b = [], []
    for L in range(n_layers):
        ch = plan["layer_cout"][L]                  # ConvLayer(ch, ch)
        key, k1, k2, k3, k4, k5 = jax.random.split(key, 6)
        w = 0.1 * jax.random.normal(k1, (ch, ch, 3, 3), jnp.float32)
        gamma = 1.0 + 0.1 * jax.random.normal(k2, (ch,), jnp.float32)
        beta = 0.1 * jax.random.normal(k3, (ch,), jnp.float32)
        mean = 0.1 * jax.random.normal(k4, (ch,), jnp.float32)
        var = jnp.abs(1.0 + 0.1 * jax.random.normal(k5, (ch,), jnp.float32))
        scale = gamma / jnp.sqrt(var + 1e-5)
        conv_w.append(q16(w * scale[:, None, None, None]))     # BN scale folded
        conv_b.append(np.asarray(beta - mean * scale, np.float32))

    key, k1, k2, k3, k4, k5, k6, k7 = jax.random.split(key, 8)
    fc1 = q16(0.3 * jax.random.normal(k1, (hidden, ouch), jnp.float32))
    fc2 = q16(0.3 * jax.random.normal(k2, (ouch, hidden), jnp.float32))
    w1 = 0.1 * jax.random.normal(k3, (ouch, ouch), jnp.float32)   # 1x1 conv
    gamma2 = 1.0 + 0.1 * jax.random.normal(k4, (ouch,), jnp.float32)
    beta2 = 0.1 * jax.random.normal(k5, (ouch,), jnp.float32)
    mean2 = 0.1 * jax.random.normal(k6, (ouch,), jnp.float32)
    var2 = jnp.abs(1.0 + 0.1 * jax.random.normal(k7, (ouch,), jnp.float32))
    scale2 = gamma2 / jnp.sqrt(var2 + 1e-5)
    return dict(conv_w=conv_w, conv_b=conv_b, fc1=fc1, fc2=fc2,
                w1x1=q16(w1 * scale2[:, None]),
                bias2=np.asarray(beta2 - mean2 * scale2, np.float32))


# ---------------------------------------------------------------------------
# Pre-lower all parameters into the kernel's lane-dense (h, w*c) layout.
# ---------------------------------------------------------------------------
def build_kernel_operands(plan, prm):
    H, W = plan["H"], plan["W"]
    ouch = plan["ouch"]
    params, pidx = [], {}

    def add(kkey, arr, dtype):
        pidx[kkey] = len(params)
        params.append(jnp.asarray(np.asarray(arr, np.float32), dtype))

    # 3x3 conv of each layer, per source piece: 3 banded (W*C_src, W*Cout)
    # matrices (one per kernel row).  Left/right zero padding and the HarD
    # split/concat wiring are encoded in which entries are populated.
    for L in range(plan["n_layers"]):
        Cout = plan["layer_cout"][L]
        w = prm["conv_w"][L]                          # (Cout, Cin_L, 3, 3)
        for j, (s, a, b, p) in enumerate(plan["conv_pieces"][L]):
            Cs = plan["ch_counts"][s]
            g = b - a
            big = np.zeros((3, W * Cs, W * Cout), np.float32)
            for kh in range(3):
                for w_out in range(W):
                    for dw in (-1, 0, 1):
                        w_in = w_out + dw
                        if 0 <= w_in < W:             # image border -> zeros
                            kw = dw + 1
                            big[kh,
                                w_in * Cs + a:w_in * Cs + b,
                                w_out * Cout:(w_out + 1) * Cout] = \
                                w[:, p:p + g, kh, kw].T
            add(("wbig", L, j), big, jnp.bfloat16)
        add(("bias", L),
            np.tile(prm["conv_b"][L], W).reshape(1, W * Cout), jnp.float32)

    # SE average pool, per-channel gate tiling and the 1x1 transition conv as
    # small constant matrices (per block-output source tensor).
    for (s, Cs, q) in plan["out_srcs"]:
        pool = np.zeros((W * Cs, ouch), np.float32)
        pool[:, q:q + Cs] = np.kron(np.ones((W, 1)), np.eye(Cs)) / float(H * W)
        add(("pool", s), pool, jnp.bfloat16)
        add(("tile", s), np.tile(np.eye(Cs), (1, W)), jnp.bfloat16)
        blk = prm["w1x1"][:, q:q + Cs].T              # (Cs, ouch)
        add(("w1x1", s), np.kron(np.eye(W), blk), jnp.bfloat16)

    add(("fc1",), prm["fc1"], jnp.bfloat16)           # (hidden, ouch)
    add(("fc2",), prm["fc2"].T, jnp.bfloat16)         # (hidden, ouch)
    add(("bias2",), np.tile(prm["bias2"], W).reshape(1, W * ouch), jnp.float32)
    return params, pidx


# ---------------------------------------------------------------------------
# The fused Pallas kernel + wrapper.
# ---------------------------------------------------------------------------
def make_csp_forward(plan, pidx):
    H, W = plan["H"], plan["W"]
    n_layers = plan["n_layers"]
    ouch, hidden = plan["ouch"], plan["hidden"]
    C_blk = plan["C_blk"]
    pc = plan["patial_channel"]
    src_list = plan["src_list"]
    n_p = len(pidx)

    def _dot(a, b):                                   # (M,K)x(K,N), f32 acc
        return jax.lax.dot_general(a, b, (((1,), (0,)), ((), ())),
                                   preferred_element_type=jnp.float32)

    def kernel(*refs):
        x_ref = refs[0]
        p_refs = refs[1:1 + n_p]
        out_ref = refs[1 + n_p]
        s_refs = {s: refs[2 + n_p + i] for i, s in enumerate(src_list)}
        P = lambda k: p_refs[pidx[k]]

        def fill_padded(src_idx, val):                # same-padding in VMEM
            buf = s_refs[src_idx]
            zrow = jnp.zeros((1, buf.shape[1]), jnp.float32)
            buf[0:1, :] = zrow
            buf[H + 1:H + 2, :] = zrow
            buf[1:H + 1, :] = val

        vals = {0: x_ref[0]}                          # f32 (H, W*C) activations
        if 0 in s_refs:
            fill_padded(0, vals[0])

        # ---- HarDBlockV2: n_layers x (3x3 conv + folded BN + ReLU6).  The
        #      channel split/concat wiring lives inside the banded weights. ----
        for L in range(n_layers):
            Cout = plan["layer_cout"][L]
            acc = jnp.zeros((H, W * Cout), jnp.float32)
            for j, (s, _a, _b, _p) in enumerate(plan["conv_pieces"][L]):
                wref = P(("wbig", L, j))              # (3, W*C_s, W*Cout) bf16
                src = s_refs[s]
                for kh in range(3):                   # three kernel-row taps
                    lhs = src[kh:kh + H, :].astype(jnp.bfloat16)
                    acc = acc + _dot(lhs, wref[kh])
            y = jnp.clip(acc + P(("bias", L))[...], 0.0, 6.0)
            vals[L + 1] = y
            if (L + 1) in s_refs:
                fill_padded(L + 1, y)

        # ---- transition / SELayer: global avg-pool -> fc -> sigmoid gate ----
        pooled = jnp.zeros((1, ouch), jnp.float32)
        for (s, _cs, _q) in plan["out_srcs"]:
            colsum = jnp.sum(vals[s], axis=0, keepdims=True)      # (1, W*C_s)
            pooled = pooled + _dot(colsum.astype(jnp.bfloat16),
                                   P(("pool", s))[...])
        fc1_w = P(("fc1",))[...].astype(jnp.float32)              # (hidden, ouch)
        fc2_t = P(("fc2",))[...].astype(jnp.float32)              # (hidden, ouch)
        z = jnp.zeros((1, ouch), jnp.float32)
        for j in range(hidden):                                   # hidden is tiny
            hj = jnp.sum(pooled * fc1_w[j:j + 1, :], axis=1, keepdims=True)
            z = z + jnp.maximum(hj, 0.0) * fc2_t[j:j + 1, :]
        gates = 1.0 / (1.0 + jnp.exp(-z))                         # (1, ouch)

        # ---- transition: channel gate, then 1x1 conv + folded BN + ReLU6 ----
        acc2 = jnp.zeros((H, W * ouch), jnp.float32)
        for (s, Cs, q) in plan["out_srcs"]:
            g = gates[:, q:q + Cs]                                # (1, C_s)
            g_tiled = _dot(g.astype(jnp.bfloat16), P(("tile", s))[...])
            gated = vals[s] * g_tiled                             # (H, W*C_s)
            acc2 = acc2 + _dot(gated.astype(jnp.bfloat16), P(("w1x1", s))[...])
        out = jnp.clip(acc2 + P(("bias2",))[...], 0.0, 6.0)
        out_ref[0] = out.astype(out_ref.dtype)                    # lane-dense

    def full_spec(arr):
        nd = arr.ndim
        return pl.BlockSpec(arr.shape, lambda n, _nd=nd: (0,) * _nd)

    def forward(x_nchw, ops):
        N = x_nchw.shape[0]
        x1 = x_nchw[:, :pc]
        x2 = x_nchw[:, pc:]
        # NCHW -> lane-dense (N, H, W*C) layout used inside the kernel.
        x2_flat = jnp.transpose(x2, (0, 2, 3, 1)).reshape(N, H, W * C_blk)

        grid_spec = pltpu.PrefetchScalarGridSpec(
            num_scalar_prefetch=0,
            grid=(N,),
            in_specs=[pl.BlockSpec((1, H, W * C_blk), lambda n: (n, 0, 0))]
                     + [full_spec(o) for o in ops],
            out_specs=pl.BlockSpec((1, H, W * ouch), lambda n: (n, 0, 0)),
            scratch_shapes=[pltpu.VMEM((H + 2, W * plan["ch_counts"][s]),
                                       jnp.float32) for s in src_list],
        )
        out_flat = pl.pallas_call(
            kernel,
            out_shape=jax.ShapeDtypeStruct((N, H, W * ouch), jnp.float32),
            grid_spec=grid_spec,
            compiler_params=pltpu.CompilerParams(
                dimension_semantics=("parallel",)),   # batch across TCs on v7x
        )(x2_flat, *ops)

        x2_out = jnp.transpose(out_flat.reshape(N, H, W, ouch), (0, 3, 1, 2))
        return jnp.concatenate([x1, x2_out], axis=1)  # CSP passthrough concat

    return forward


# ---------------------------------------------------------------------------
# Pure-XLA reference (f32 activations, identical folded parameters).
# ---------------------------------------------------------------------------
def cspking_reference(x_nchw, plan, prm):
    pc = plan["patial_channel"]
    growth = plan["growth"]
    links = plan["links"]
    n_layers = plan["n_layers"]

    def conv(x, w, pad):
        return jax.lax.conv_general_dilated(
            x, jnp.asarray(w), (1, 1), pad,
            dimension_numbers=("NCHW", "OIHW", "NCHW"))

    x1 = x_nchw[:, :pc]
    x = x_nchw[:, pc:]

    layers_ = [x]
    tensors = [[] for _ in range(n_layers)]
    for layer in range(n_layers):
        C = x.shape[1]
        n_chunks = -(-C // growth)
        tins = [x[:, i * growth:(i + 1) * growth] for i in range(n_chunks)]
        for i in range(len(tins)):
            tensors[layer + links[layer][i] - 1].append(tins[i])
        x = (jnp.concatenate(tensors[layer], axis=1)
             if len(tensors[layer]) > 1 else tensors[layer][0])
        x = conv(x, prm["conv_w"][layer], ((1, 1), (1, 1)))
        x = jnp.clip(x + jnp.asarray(prm["conv_b"][layer]).reshape(1, -1, 1, 1),
                     0.0, 6.0)
        layers_.append(x)
    t = len(layers_)
    out_ = [layers_[i] for i in range(t)
            if i == t - 1 or i in CONCATE_OUT[n_layers]]
    h = jnp.concatenate(out_, axis=1)

    # SELayer
    y = jnp.mean(h, axis=(2, 3))
    y = jnp.maximum(y @ jnp.asarray(prm["fc1"]).T, 0.0)
    y = 1.0 / (1.0 + jnp.exp(-(y @ jnp.asarray(prm["fc2"]).T)))
    h = h * y[:, :, None, None]

    # ConvLayer(kernel=1): 1x1 conv + folded BN + ReLU6
    h = conv(h, prm["w1x1"][:, :, None, None], ((0, 0), (0, 0)))
    h = jnp.clip(h + jnp.asarray(prm["bias2"]).reshape(1, -1, 1, 1), 0.0, 6.0)
    return jnp.concatenate([x1, h], axis=1)


# ---------------------------------------------------------------------------
if __name__ == "__main__":
    in_channels, n_layers, patial_channel = 16, 4, 4
    N, H, W = 2, 16, 16

    plan = build_plan(in_channels, n_layers, patial_channel, H, W)

    key = jax.random.PRNGKey(0)
    kx, kp = jax.random.split(key)
    x = jax.random.normal(kx, (N, in_channels, H, W), jnp.float32)
    prm = init_params(kp, plan)
    ops, pidx = build_kernel_operands(plan, prm)

    forward = jax.jit(make_csp_forward(plan, pidx))
    out = jax.block_until_ready(forward(x, ops))

    expect_c = patial_channel + plan["ouch"]          # 4 + 20 = 24
    assert out.shape == (N, expect_c, H, W), out.shape
    assert out.dtype == jnp.float32

    # Validate the fused kernel (conv wiring, SE, transition) against XLA.
    ref = jax.block_until_ready(cspking_reference(x, plan, prm))
    err = float(jnp.max(jnp.abs(out - ref)))
    assert err < 1e-1, f"kernel/reference mismatch: max abs err {err}"
    print("KERNEL_OK")
</pallas_src>

<mosaic_0001>
module attributes {stable_mosaic.version = 11 : i64} {
  func.func @kernel(%arg0: i32, %arg1: memref<1x16x192xf32, #tpu.memory_space<vmem>>, %arg2: memref<3x192x64xbf16, #tpu.memory_space<vmem>>, %arg3: memref<1x64xf32, #tpu.memory_space<vmem>>, %arg4: memref<3x192x128xbf16, #tpu.memory_space<vmem>>, %arg5: memref<3x64x128xbf16, #tpu.memory_space<vmem>>, %arg6: memref<1x128xf32, #tpu.memory_space<vmem>>, %arg7: memref<3x128x64xbf16, #tpu.memory_space<vmem>>, %arg8: memref<1x64xf32, #tpu.memory_space<vmem>>, %arg9: memref<3x192x192xbf16, #tpu.memory_space<vmem>>, %arg10: memref<3x128x192xbf16, #tpu.memory_space<vmem>>, %arg11: memref<3x64x192xbf16, #tpu.memory_space<vmem>>, %arg12: memref<1x192xf32, #tpu.memory_space<vmem>>, %arg13: memref<128x20xbf16, #tpu.memory_space<vmem>>, %arg14: memref<8x128xbf16, #tpu.memory_space<vmem>>, %arg15: memref<128x320xbf16, #tpu.memory_space<vmem>>, %arg16: memref<192x20xbf16, #tpu.memory_space<vmem>>, %arg17: memref<12x192xbf16, #tpu.memory_space<vmem>>, %arg18: memref<192x320xbf16, #tpu.memory_space<vmem>>, %arg19: memref<1x20xbf16, #tpu.memory_space<vmem>>, %arg20: memref<1x20xbf16, #tpu.memory_space<vmem>>, %arg21: memref<1x320xf32, #tpu.memory_space<vmem>>, %arg22: memref<1x16x320xf32, #tpu.memory_space<vmem>>, %arg23: memref<18x192xf32, #tpu.memory_space<vmem>>, %arg24: memref<18x64xf32, #tpu.memory_space<vmem>>, %arg25: memref<18x128xf32, #tpu.memory_space<vmem>>, %arg26: memref<18x64xf32, #tpu.memory_space<vmem>>) attributes {dimension_semantics = [#tpu.dimension_semantics<parallel>], iteration_bounds = array<i64: 2>, scalar_prefetch = 0 : i64, scratch_operands = 4 : i64, tpu.core_type = #tpu.core_type<tc>, window_params = [{transform_indices = @transform_0, window_bounds = array<i64: 1, 16, 192>}, {pipeline_mode = #tpu.pipeline_mode<synchronous>, transform_indices = @transform_1, window_bounds = array<i64: 3, 192, 64>}, {pipeline_mode = #tpu.pipeline_mode<synchronous>, transform_indices = @transform_2, window_bounds = array<i64: 1, 64>}, {pipeline_mode = #tpu.pipeline_mode<synchronous>, transform_indices = @transform_3, window_bounds = array<i64: 3, 192, 128>}, {pipeline_mode = #tpu.pipeline_mode<synchronous>, transform_indices = @transform_4, window_bounds = array<i64: 3, 64, 128>}, {pipeline_mode = #tpu.pipeline_mode<synchronous>, transform_indices = @transform_5, window_bounds = array<i64: 1, 128>}, {pipeline_mode = #tpu.pipeline_mode<synchronous>, transform_indices = @transform_6, window_bounds = array<i64: 3, 128, 64>}, {pipeline_mode = #tpu.pipeline_mode<synchronous>, transform_indices = @transform_7, window_bounds = array<i64: 1, 64>}, {pipeline_mode = #tpu.pipeline_mode<synchronous>, transform_indices = @transform_8, window_bounds = array<i64: 3, 192, 192>}, {pipeline_mode = #tpu.pipeline_mode<synchronous>, transform_indices = @transform_9, window_bounds = array<i64: 3, 128, 192>}, {pipeline_mode = #tpu.pipeline_mode<synchronous>, transform_indices = @transform_10, window_bounds = array<i64: 3, 64, 192>}, {pipeline_mode = #tpu.pipeline_mode<synchronous>, transform_indices = @transform_11, window_bounds = array<i64: 1, 192>}, {pipeline_mode = #tpu.pipeline_mode<synchronous>, transform_indices = @transform_12, window_bounds = array<i64: 128, 20>}, {pipeline_mode = #tpu.pipeline_mode<synchronous>, transform_indices = @transform_13, window_bounds = array<i64: 8, 128>}, {pipeline_mode = #tpu.pipeline_mode<synchronous>, transform_indices = @transform_14, window_bounds = array<i64: 128, 320>}, {pipeline_mode = #tpu.pipeline_mode<synchronous>, transform_indices = @transform_15, window_bounds = array<i64: 192, 20>}, {pipeline_mode = #tpu.pipeline_mode<synchronous>, transform_indices = @transform_16, window_bounds = array<i64: 12, 192>}, {pipeline_mode = #tpu.pipeline_mode<synchronous>, transform_indices = @transform_17, window_bounds = array<i64: 192, 320>}, {pipeline_mode = #tpu.pipeline_mode<synchronous>, transform_indices = @transform_18, window_bounds = array<i64: 1, 20>}, {pipeline_mode = #tpu.pipeline_mode<synchronous>, transform_indices = @transform_19, window_bounds = array<i64: 1, 20>}, {pipeline_mode = #tpu.pipeline_mode<synchronous>, transform_indices = @transform_20, window_bounds = array<i64: 1, 320>}, {transform_indices = @transform_21, window_bounds = array<i64: 1, 16, 320>}]} {
    %c0 = arith.constant 0 : index
    %c0_0 = arith.constant 0 : index
    %c0_1 = arith.constant 0 : index
    %0 = vector.load %arg1[%c0, %c0_0, %c0_1] : memref<1x16x192xf32, #tpu.memory_space<vmem>>, vector<1x16x192xf32>
    %1 = vector.shape_cast %0 : vector<1x16x192xf32> to vector<16x192xf32>
    %cst = arith.constant 0.000000e+00 : f32
    %2 = vector.broadcast %cst : f32 to vector<1x192xf32>
    %c0_2 = arith.constant 0 : index
    %c0_3 = arith.constant 0 : index
    %3 = vector.load %arg23[%c0_2, %c0_3] : memref<18x192xf32, #tpu.memory_space<vmem>>, vector<1x192xf32>
    tpu.vector_store %arg23[%c0_2, %c0_3], %2 {strides = array<i32>} : memref<18x192xf32, #tpu.memory_space<vmem>>, vector<1x192xf32>,
    %c17 = arith.constant 17 : index
    %c0_4 = arith.constant 0 : index
    %4 = vector.load %arg23[%c17, %c0_4] : memref<18x192xf32, #tpu.memory_space<vmem>>, vector<1x192xf32>
    tpu.vector_store %arg23[%c17, %c0_4], %2 {strides = array<i32>} : memref<18x192xf32, #tpu.memory_space<vmem>>, vector<1x192xf32>,
    %c1 = arith.constant 1 : index
    %c0_5 = arith.constant 0 : index
    %5 = vector.load %arg23[%c1, %c0_5] : memref<18x192xf32, #tpu.memory_space<vmem>>, vector<16x192xf32>
    tpu.vector_store %arg23[%c1, %c0_5], %1 {strides = array<i32>} : memref<18x192xf32, #tpu.memory_space<vmem>>, vector<16x192xf32>,
    %cst_6 = arith.constant 0.000000e+00 : f32
    %6 = vector.broadcast %cst_6 : f32 to vector<16x64xf32>
    %c0_7 = arith.constant 0 : index
    %c0_8 = arith.constant 0 : index
    %7 = vector.load %arg23[%c0_7, %c0_8] : memref<18x192xf32, #tpu.memory_space<vmem>>, vector<16x192xf32>
    %8 = arith.truncf %7 : vector<16x192xf32> to vector<16x192xbf16>
    %c0_9 = arith.constant 0 : index
    %c0_10 = arith.constant 0 : index
    %c0_11 = arith.constant 0 : index
    %9 = vector.load %arg2[%c0_9, %c0_10, %c0_11] : memref<3x192x64xbf16, #tpu.memory_space<vmem>>, vector<1x192x64xbf16>
    %10 = vector.shape_cast %9 : vector<1x192x64xbf16> to vector<192x64xbf16>
    %cst_12 = arith.constant dense<0.000000e+00> : vector<16x64xf32>
    %11 = tpu.matmul %8, %10, %cst_12 {dimension_numbers = #tpu.dot_dimension_numbers<[1], [0], [0], [1], [0, 0, 1, 1], [], []>} : vector<16x192xbf16>, vector<192x64xbf16>, vector<16x64xf32> -> vector<16x64xf32>
    %12 = arith.addf %6, %11 : vector<16x64xf32>
    %c1_13 = arith.constant 1 : index
    %c0_14 = arith.constant 0 : index
    %13 = vector.load %arg23[%c1_13, %c0_14] : memref<18x192xf32, #tpu.memory_space<vmem>>, vector<16x192xf32>
    %14 = arith.truncf %13 : vector<16x192xf32> to vector<16x192xbf16>
    %c1_15 = arith.constant 1 : index
    %c0_16 = arith.constant 0 : index
    %c0_17 = arith.constant 0 : index
    %15 = vector.load %arg2[%c1_15, %c0_16, %c0_17] : memref<3x192x64xbf16, #tpu.memory_space<vmem>>, vector<1x192x64xbf16>
    %16 = vector.shape_cast %15 : vector<1x192x64xbf16> to vector<192x64xbf16>
    %cst_18 = arith.constant dense<0.000000e+00> : vector<16x64xf32>
    %17 = tpu.matmul %14, %16, %cst_18 {dimension_numbers = #tpu.dot_dimension_numbers<[1], [0], [0], [1], [0, 0, 1, 1], [], []>} : vector<16x192xbf16>, vector<192x64xbf16>, vector<16x64xf32> -> vector<16x64xf32>
    %18 = arith.addf %12, %17 : vector<16x64xf32>
    %c2 = arith.constant 2 : index
    %c0_19 = arith.constant 0 : index
    %19 = vector.load %arg23[%c2, %c0_19] : memref<18x192xf32, #tpu.memory_space<vmem>>, vector<16x192xf32>
    %20 = arith.truncf %19 : vector<16x192xf32> to vector<16x192xbf16>
    %c2_20 = arith.constant 2 : index
    %c0_21 = arith.constant 0 : index
    %c0_22 = arith.constant 0 : index
    %21 = vector.load %arg2[%c2_20, %c0_21, %c0_22] : memref<3x192x64xbf16, #tpu.memory_space<vmem>>, vector<1x192x64xbf16>
    %22 = vector.shape_cast %21 : vector<1x192x64xbf16> to vector<192x64xbf16>
    %cst_23 = arith.constant dense<0.000000e+00> : vector<16x64xf32>
    %23 = tpu.matmul %20, %22, %cst_23 {dimension_numbers = #tpu.dot_dimension_numbers<[1], [0], [0], [1], [0, 0, 1, 1], [], []>} : vector<16x192xbf16>, vector<192x64xbf16>, vector<16x64xf32> -> vector<16x64xf32>
    %24 = arith.addf %18, %23 : vector<16x64xf32>
    %c0_24 = arith.constant 0 : index
    %c0_25 = arith.constant 0 : index
    %25 = vector.load %arg3[%c0_24, %c0_25] : memref<1x64xf32, #tpu.memory_space<vmem>>, vector<1x64xf32>
    %26 = vector.broadcast %25 : vector<1x64xf32> to vector<16x64xf32>
    %27 = arith.addf %24, %26 : vector<16x64xf32>
    %cst_26 = arith.constant 0.000000e+00 : f32
    %cst_27 = arith.constant 6.000000e+00 : f32
    %28 = vector.broadcast %cst_26 : f32 to vector<16x64xf32>
    %29 = arith.maximumf %28, %27 : vector<16x64xf32>
    %30 = vector.broadcast %cst_27 : f32 to vector<16x64xf32>
    %31 = arith.minimumf %30, %29 : vector<16x64xf32>
    %cst_28 = arith.constant 0.000000e+00 : f32
    %32 = vector.broadcast %cst_28 : f32 to vector<1x64xf32>
    %c0_29 = arith.constant 0 : index
    %c0_30 = arith.constant 0 : index
    %33 = vector.load %arg24[%c0_29, %c0_30] : memref<18x64xf32, #tpu.memory_space<vmem>>, vector<1x64xf32>
    tpu.vector_store %arg24[%c0_29, %c0_30], %32 {strides = array<i32>} : memref<18x64xf32, #tpu.memory_space<vmem>>, vector<1x64xf32>,
    %c17_31 = arith.constant 17 : index
    %c0_32 = arith.constant 0 : index
    %34 = vector.load %arg24[%c17_31, %c0_32] : memref<18x64xf32, #tpu.memory_space<vmem>>, vector<1x64xf32>
    tpu.vector_store %arg24[%c17_31, %c0_32], %32 {strides = array<i32>} : memref<18x64xf32, #tpu.memory_space<vmem>>, vector<1x64xf32>,
    %c1_33 = arith.constant 1 : index
    %c0_34 = arith.constant 0 : index
    %35 = vector.load %arg24[%c1_33, %c0_34] : memref<18x64xf32, #tpu.memory_space<vmem>>, vector<16x64xf32>
    tpu.vector_store %arg24[%c1_33, %c0_34], %31 {strides = array<i32>} : memref<18x64xf32, #tpu.memory_space<vmem>>, vector<16x64xf32>,
    %cst_35 = arith.constant 0.000000e+00 : f32
    %36 = vector.broadcast %cst_35 : f32 to vector<16x128xf32>
    %c0_36 = arith.constant 0 : index
    %c0_37 = arith.constant 0 : index
    %37 = vector.load %arg23[%c0_36, %c0_37] : memref<18x192xf32, #tpu.memory_space<vmem>>, vector<16x192xf32>
    %38 = arith.truncf %37 : vector<16x192xf32> to vector<16x192xbf16>
    %c0_38 = arith.constant 0 : index
    %c0_39 = arith.constant 0 : index
    %c0_40 = arith.constant 0 : index
    %39 = vector.load %arg4[%c0_38, %c0_39, %c0_40] : memref<3x192x128xbf16, #tpu.memory_space<vmem>>, vector<1x192x128xbf16>
    %40 = vector.shape_cast %39 : vector<1x192x128xbf16> to vector<192x128xbf16>
    %cst_41 = arith.constant dense<0.000000e+00> : vector<16x128xf32>
    %41 = tpu.matmul %38, %40, %cst_41 {dimension_numbers = #tpu.dot_dimension_numbers<[1], [0], [0], [1], [0, 0, 1, 1], [], []>} : vector<16x192xbf16>, vector<192x128xbf16>, vector<16x128xf32> -> vector<16x128xf32>
    %42 = arith.addf %36, %41 : vector<16x128xf32>
    %c1_42 = arith.constant 1 : index
    %c0_43 = arith.constant 0 : index
    %43 = vector.load %arg23[%c1_42, %c0_43] : memref<18x192xf32, #tpu.memory_space<vmem>>, vector<16x192xf32>
    %44 = arith.truncf %43 : vector<16x192xf32> to vector<16x192xbf16>
    %c1_44 = arith.constant 1 : index
    %c0_45 = arith.constant 0 : index
    %c0_46 = arith.constant 0 : index
    %45 = vector.load %arg4[%c1_44, %c0_45, %c0_46] : memref<3x192x128xbf16, #tpu.memory_space<vmem>>, vector<1x192x128xbf16>
    %46 = vector.shape_cast %45 : vector<1x192x128xbf16> to vector<192x128xbf16>
    %cst_47 = arith.constant dense<0.000000e+00> : vector<16x128xf32>
    %47 = tpu.matmul %44, %46, %cst_47 {dimension_numbers = #tpu.dot_dimension_numbers<[1], [0], [0], [1], [0, 0, 1, 1], [], []>} : vector<16x192xbf16>, vector<192x128xbf16>, vector<16x128xf32> -> vector<16x128xf32>
    %48 = arith.addf %42, %47 : vector<16x128xf32>
    %c2_48 = arith.constant 2 : index
    %c0_49 = arith.constant 0 : index
    %49 = vector.load %arg23[%c2_48, %c0_49] : memref<18x192xf32, #tpu.memory_space<vmem>>, vector<16x192xf32>
    %50 = arith.truncf %49 : vector<16x192xf32> to vector<16x192xbf16>
    %c2_50 = arith.constant 2 : index
    %c0_51 = arith.constant 0 : index
    %c0_52 = arith.constant 0 : index
    %51 = vector.load %arg4[%c2_50, %c0_51, %c0_52] : memref<3x192x128xbf16, #tpu.memory_space<vmem>>, vector<1x192x128xbf16>
    %52 = vector.shape_cast %51 : vector<1x192x128xbf16> to vector<192x128xbf16>
    %cst_53 = arith.constant dense<0.000000e+00> : vector<16x128xf32>
    %53 = tpu.matmul %50, %52, %cst_53 {dimension_numbers = #tpu.dot_dimension_numbers<[1], [0], [0], [1], [0, 0, 1, 1], [], []>} : vector<16x192xbf16>, vector<192x128xbf16>, vector<16x128xf32> -> vector<16x128xf32>
    %54 = arith.addf %48, %53 : vector<16x128xf32>
    %c0_54 = arith.constant 0 : index
    %c0_55 = arith.constant 0 : index
    %55 = vector.load %arg24[%c0_54, %c0_55] : memref<18x64xf32, #tpu.memory_space<vmem>>, vector<16x64xf32>
    %56 = arith.truncf %55 : vector<16x64xf32> to vector<16x64xbf16>
    %c0_56 = arith.constant 0 : index
    %c0_57 = arith.constant 0 : index
    %c0_58 = arith.constant 0 : index
    %57 = vector.load %arg5[%c0_56, %c0_57, %c0_58] : memref<3x64x128xbf16, #tpu.memory_space<vmem>>, vector<1x64x128xbf16>
    %58 = vector.shape_cast %57 : vector<1x64x128xbf16> to vector<64x128xbf16>
    %cst_59 = arith.constant dense<0.000000e+00> : vector<16x128xf32>
    %59 = tpu.matmul %56, %58, %cst_59 {dimension_numbers = #tpu.dot_dimension_numbers<[1], [0], [0], [1], [0, 0, 1, 1], [], []>} : vector<16x64xbf16>, vector<64x128xbf16>, vector<16x128xf32> -> vector<16x128xf32>
    %60 = arith.addf %54, %59 : vector<16x128xf32>
    %c1_60 = arith.constant 1 : index
    %c0_61 = arith.constant 0 : index
    %61 = vector.load %arg24[%c1_60, %c0_61] : memref<18x64xf32, #tpu.memory_space<vmem>>, vector<16x64xf32>
    %62 = arith.truncf %61 : vector<16x64xf32> to vector<16x64xbf16>
    %c1_62 = arith.constant 1 : index
    %c0_63 = arith.constant 0 : index
    %c0_64 = arith.constant 0 : index
    %63 = vector.load %arg5[%c1_62, %c0_63, %c0_64] : memref<3x64x128xbf16, #tpu.memory_space<vmem>>, vector<1x64x128xbf16>
    %64 = vector.shape_cast %63 : vector<1x64x128xbf16> to vector<64x128xbf16>
    %cst_65 = arith.constant dense<0.000000e+00> : vector<16x128xf32>
    %65 = tpu.matmul %62, %64, %cst_65 {dimension_numbers = #tpu.dot_dimension_numbers<[1], [0], [0], [1], [0, 0, 1, 1], [], []>} : vector<16x64xbf16>, vector<64x128xbf16>, vector<16x128xf32> -> vector<16x128xf32>
    %66 = arith.addf %60, %65 : vector<16x128xf32>
    %c2_66 = arith.constant 2 : index
    %c0_67 = arith.constant 0 : index
    %67 = vector.load %arg24[%c2_66, %c0_67] : memref<18x64xf32, #tpu.memory_space<vmem>>, vector<16x64xf32>
    %68 = arith.truncf %67 : vector<16x64xf32> to vector<16x64xbf16>
    %c2_68 = arith.constant 2 : index
    %c0_69 = arith.constant 0 : index
    %c0_70 = arith.constant 0 : index
    %69 = vector.load %arg5[%c2_68, %c0_69, %c0_70] : memref<3x64x128xbf16, #tpu.memory_space<vmem>>, vector<1x64x128xbf16>
    %70 = vector.shape_cast %69 : vector<1x64x128xbf16> to vector<64x128xbf16>
    %cst_71 = arith.constant dense<0.000000e+00> : vector<16x128xf32>
    %71 = tpu.matmul %68, %70, %cst_71 {dimension_numbers = #tpu.dot_dimension_numbers<[1], [0], [0], [1], [0, 0, 1, 1], [], []>} : vector<16x64xbf16>, vector<64x128xbf16>, vector<16x128xf32> -> vector<16x128xf32>
    %72 = arith.addf %66, %71 : vector<16x128xf32>
    %c0_72 = arith.constant 0 : index
    %c0_73 = arith.constant 0 : index
    %73 = vector.load %arg6[%c0_72, %c0_73] : memref<1x128xf32, #tpu.memory_space<vmem>>, vector<1x128xf32>
    %74 = vector.broadcast %73 : vector<1x128xf32> to vector<16x128xf32>
    %75 = arith.addf %72, %74 : vector<16x128xf32>
    %cst_74 = arith.constant 0.000000e+00 : f32
    %cst_75 = arith.constant 6.000000e+00 : f32
    %76 = vector.broadcast %cst_74 : f32 to vector<16x128xf32>
    %77 = arith.maximumf %76, %75 : vector<16x128xf32>
    %78 = vector.broadcast %cst_75 : f32 to vector<16x128xf32>
    %79 = arith.minimumf %78, %77 : vector<16x128xf32>
    %cst_76 = arith.constant 0.000000e+00 : f32
    %80 = vector.broadcast %cst_76 : f32 to vector<1x128xf32>
    %c0_77 = arith.constant 0 : index
    %c0_78 = arith.constant 0 : index
    %81 = vector.load %arg25[%c0_77, %c0_78] : memref<18x128xf32, #tpu.memory_space<vmem>>, vector<1x128xf32>
    tpu.vector_store %arg25[%c0_77, %c0_78], %80 {strides = array<i32>} : memref<18x128xf32, #tpu.memory_space<vmem>>, vector<1x128xf32>,
    %c17_79 = arith.constant 17 : index
    %c0_80 = arith.constant 0 : index
    %82 = vector.load %arg25[%c17_79, %c0_80] : memref<18x128xf32, #tpu.memory_space<vmem>>, vector<1x128xf32>
    tpu.vector_store %arg25[%c17_79, %c0_80], %80 {strides = array<i32>} : memref<18x128xf32, #tpu.memory_space<vmem>>, vector<1x128xf32>,
    %c1_81 = arith.constant 1 : index
    %c0_82 = arith.constant 0 : index
    %83 = vector.load %arg25[%c1_81, %c0_82] : memref<18x128xf32, #tpu.memory_space<vmem>>, vector<16x128xf32>
    tpu.vector_store %arg25[%c1_81, %c0_82], %79 {strides = array<i32>} : memref<18x128xf32, #tpu.memory_space<vmem>>, vector<16x128xf32>,
    %cst_83 = arith.constant 0.000000e+00 : f32
    %84 = vector.broadcast %cst_83 : f32 to vector<16x64xf32>
    %c0_84 = arith.constant 0 : index
    %c0_85 = arith.constant 0 : index
    %85 = vector.load %arg25[%c0_84, %c0_85] : memref<18x128xf32, #tpu.memory_space<vmem>>, vector<16x128xf32>
    %86 = arith.truncf %85 : vector<16x128xf32> to vector<16x128xbf16>
    %c0_86 = arith.constant 0 : index
    %c0_87 = arith.constant 0 : index
    %c0_88 = arith.constant 0 : index
    %87 = vector.load %arg7[%c0_86, %c0_87, %c0_88] : memref<3x128x64xbf16, #tpu.memory_space<vmem>>, vector<1x128x64xbf16>
    %88 = vector.shape_cast %87 : vector<1x128x64xbf16> to vector<128x64xbf16>
    %cst_89 = arith.constant dense<0.000000e+00> : vector<16x64xf32>
    %89 = tpu.matmul %86, %88, %cst_89 {dimension_numbers = #tpu.dot_dimension_numbers<[1], [0], [0], [1], [0, 0, 1, 1], [], []>} : vector<16x128xbf16>, vector<128x64xbf16>, vector<16x64xf32> -> vector<16x64xf32>
    %90 = arith.addf %84, %89 : vector<16x64xf32>
    %c1_90 = arith.constant 1 : index
    %c0_91 = arith.constant 0 : index
    %91 = vector.load %arg25[%c1_90, %c0_91] : memref<18x128xf32, #tpu.memory_space<vmem>>, vector<16x128xf32>
    %92 = arith.truncf %91 : vector<16x128xf32> to vector<16x128xbf16>
    %c1_92 = arith.constant 1 : index
    %c0_93 = arith.constant 0 : index
    %c0_94 = arith.constant 0 : index
    %93 = vector.load %arg7[%c1_92, %c0_93, %c0_94] : memref<3x128x64xbf16, #tpu.memory_space<vmem>>, vector<1x128x64xbf16>
    %94 = vector.shape_cast %93 : vector<1x128x64xbf16> to vector<128x64xbf16>
    %cst_95 = arith.constant dense<0.000000e+00> : vector<16x64xf32>
    %95 = tpu.matmul %92, %94, %cst_95 {dimension_numbers = #tpu.dot_dimension_numbers<[1], [0], [0], [1], [0, 0, 1, 1], [], []>} : vector<16x128xbf16>, vector<128x64xbf16>, vector<16x64xf32> -> vector<16x64xf32>
    %96 = arith.addf %90, %95 : vector<16x64xf32>
    %c2_96 = arith.constant 2 : index
    %c0_97 = arith.constant 0 : index
    %97 = vector.load %arg25[%c2_96, %c0_97] : memref<18x128xf32, #tpu.memory_space<vmem>>, vector<16x128xf32>
    %98 = arith.truncf %97 : vector<16x128xf32> to vector<16x128xbf16>
    %c2_98 = arith.constant 2 : index
    %c0_99 = arith.constant 0 : index
    %c0_100 = arith.constant 0 : index
    %99 = vector.load %arg7[%c2_98, %c0_99, %c0_100] : memref<3x128x64xbf16, #tpu.memory_space<vmem>>, vector<1x128x64xbf16>
    %100 = vector.shape_cast %99 : vector<1x128x64xbf16> to vector<128x64xbf16>
    %cst_101 = arith.constant dense<0.000000e+00> : vector<16x64xf32>
    %101 = tpu.matmul %98, %100, %cst_101 {dimension_numbers = #tpu.dot_dimension_numbers<[1], [0], [0], [1], [0, 0, 1, 1], [], []>} : vector<16x128xbf16>, vector<128x64xbf16>, vector<16x64xf32> -> vector<16x64xf32>
    %102 = arith.addf %96, %101 : vector<16x64xf32>
    %c0_102 = arith.constant 0 : index
    %c0_103 = arith.constant 0 : index
    %103 = vector.load %arg8[%c0_102, %c0_103] : memref<1x64xf32, #tpu.memory_space<vmem>>, vector<1x64xf32>
    %104 = vector.broadcast %103 : vector<1x64xf32> to vector<16x64xf32>
    %105 = arith.addf %102, %104 : vector<16x64xf32>
    %cst_104 = arith.constant 0.000000e+00 : f32
    %cst_105 = arith.constant 6.000000e+00 : f32
    %106 = vector.broadcast %cst_104 : f32 to vector<16x64xf32>
    %107 = arith.maximumf %106, %105 : vector<16x64xf32>
    %108 = vector.broadcast %cst_105 : f32 to vector<16x64xf32>
    %109 = arith.minimumf %108, %107 : vector<16x64xf32>
    %cst_106 = arith.constant 0.000000e+00 : f32
    %110 = vector.broadcast %cst_106 : f32 to vector<1x64xf32>
    %c0_107 = arith.constant 0 : index
    %c0_108 = arith.constant 0 : index
    %111 = vector.load %arg26[%c0_107, %c0_108] : memref<18x64xf32, #tpu.memory_space<vmem>>, vector<1x64xf32>
    tpu.vector_store %arg26[%c0_107, %c0_108], %110 {strides = array<i32>} : memref<18x64xf32, #tpu.memory_space<vmem>>, vector<1x64xf32>,
    %c17_109 = arith.constant 17 : index
    %c0_110 = arith.constant 0 : index
    %112 = vector.load %arg26[%c17_109, %c0_110] : memref<18x64xf32, #tpu.memory_space<vmem>>, vector<1x64xf32>
    tpu.vector_store %arg26[%c17_109, %c0_110], %110 {strides = array<i32>} : memref<18x64xf32, #tpu.memory_space<vmem>>, vector<1x64xf32>,
    %c1_111 = arith.constant 1 : index
    %c0_112 = arith.constant 0 : index
    %113 = vector.load %arg26[%c1_111, %c0_112] : memref<18x64xf32, #tpu.memory_space<vmem>>, vector<16x64xf32>
    tpu.vector_store %arg26[%c1_111, %c0_112], %109 {strides = array<i32>} : memref<18x64xf32, #tpu.memory_space<vmem>>, vector<16x64xf32>,
    %cst_113 = arith.constant 0.000000e+00 : f32
    %114 = vector.broadcast %cst_113 : f32 to vector<16x192xf32>
    %c0_114 = arith.constant 0 : index
    %c0_115 = arith.constant 0 : index
    %115 = vector.load %arg23[%c0_114, %c0_115] : memref<18x192xf32, #tpu.memory_space<vmem>>, vector<16x192xf32>
    %116 = arith.truncf %115 : vector<16x192xf32> to vector<16x192xbf16>
    %c0_116 = arith.constant 0 : index
    %c0_117 = arith.constant 0 : index
    %c0_118 = arith.constant 0 : index
    %117 = vector.load %arg9[%c0_116, %c0_117, %c0_118] : memref<3x192x192xbf16, #tpu.memory_space<vmem>>, vector<1x192x192xbf16>
    %118 = vector.shape_cast %117 : vector<1x192x192xbf16> to vector<192x192xbf16>
    %cst_119 = arith.constant dense<0.000000e+00> : vector<16x192xf32>
    %119 = tpu.matmul %116, %118, %cst_119 {dimension_numbers = #tpu.dot_dimension_numbers<[1], [0], [0], [1], [0, 0, 1, 1], [], []>} : vector<16x192xbf16>, vector<192x192xbf16>, vector<16x192xf32> -> vector<16x192xf32>
    %120 = arith.addf %114, %119 : vector<16x192xf32>
    %c1_120 = arith.constant 1 : index
    %c0_121 = arith.constant 0 : index
    %121 = vector.load %arg23[%c1_120, %c0_121] : memref<18x192xf32, #tpu.memory_space<vmem>>, vector<16x192xf32>
    %122 = arith.truncf %121 : vector<16x192xf32> to vector<16x192xbf16>
    %c1_122 = arith.constant 1 : index
    %c0_123 = arith.constant 0 : index
    %c0_124 = arith.constant 0 : index
    %123 = vector.load %arg9[%c1_122, %c0_123, %c0_124] : memref<3x192x192xbf16, #tpu.memory_space<vmem>>, vector<1x192x192xbf16>
    %124 = vector.shape_cast %123 : vector<1x192x192xbf16> to vector<192x192xbf16>
    %cst_125 = arith.constant dense<0.000000e+00> : vector<16x192xf32>
    %125 = tpu.matmul %122, %124, %cst_125 {dimension_numbers = #tpu.dot_dimension_numbers<[1], [0], [0], [1], [0, 0, 1, 1], [], []>} : vector<16x192xbf16>, vector<192x192xbf16>, vector<16x192xf32> -> vector<16x192xf32>
    %126 = arith.addf %120, %125 : vector<16x192xf32>
    %c2_126 = arith.constant 2 : index
    %c0_127 = arith.constant 0 : index
    %127 = vector.load %arg23[%c2_126, %c0_127] : memref<18x192xf32, #tpu.memory_space<vmem>>, vector<16x192xf32>
    %128 = arith.truncf %127 : vector<16x192xf32> to vector<16x192xbf16>
    %c2_128 = arith.constant 2 : index
    %c0_129 = arith.constant 0 : index
    %c0_130 = arith.constant 0 : index
    %129 = vector.load %arg9[%c2_128, %c0_129, %c0_130] : memref<3x192x192xbf16, #tpu.memory_space<vmem>>, vector<1x192x192xbf16>
    %130 = vector.shape_cast %129 : vector<1x192x192xbf16> to vector<192x192xbf16>
    %cst_131 = arith.constant dense<0.000000e+00> : vector<16x192xf32>
    %131 = tpu.matmul %128, %130, %cst_131 {dimension_numbers = #tpu.dot_dimension_numbers<[1], [0], [0], [1], [0, 0, 1, 1], [], []>} : vector<16x192xbf16>, vector<192x192xbf16>, vector<16x192xf32> -> vector<16x192xf32>
    %132 = arith.addf %126, %131 : vector<16x192xf32>
    %c0_132 = arith.constant 0 : index
    %c0_133 = arith.constant 0 : index
    %133 = vector.load %arg25[%c0_132, %c0_133] : memref<18x128xf32, #tpu.memory_space<vmem>>, vector<16x128xf32>
    %134 = arith.truncf %133 : vector<16x128xf32> to vector<16x128xbf16>
    %c0_134 = arith.constant 0 : index
    %c0_135 = arith.constant 0 : index
    %c0_136 = arith.constant 0 : index
    %135 = vector.load %arg10[%c0_134, %c0_135, %c0_136] : memref<3x128x192xbf16, #tpu.memory_space<vmem>>, vector<1x128x192xbf16>
    %136 = vector.shape_cast %135 : vector<1x128x192xbf16> to vector<128x192xbf16>
    %cst_137 = arith.constant dense<0.000000e+00> : vector<16x192xf32>
    %137 = tpu.matmul %134, %136, %cst_137 {dimension_numbers = #tpu.dot_dimension_numbers<[1], [0], [0], [1], [0, 0, 1, 1], [], []>} : vector<16x128xbf16>, vector<128x192xbf16>, vector<16x192xf32> -> vector<16x192xf32>
    %138 = arith.addf %132, %137 : vector<16x192xf32>
    %c1_138 = arith.constant 1 : index
    %c0_139 = arith.constant 0 : index
    %139 = vector.load %arg25[%c1_138, %c0_139] : memref<18x128xf32, #tpu.memory_space<vmem>>, vector<16x128xf32>
    %140 = arith.truncf %139 : vector<16x128xf32> to vector<16x128xbf16>
    %c1_140 = arith.constant 1 : index
    %c0_141 = arith.constant 0 : index
    %c0_142 = arith.constant 0 : index
    %141 = vector.load %arg10[%c1_140, %c0_141, %c0_142] : memref<3x128x192xbf16, #tpu.memory_space<vmem>>, vector<1x128x192xbf16>
    %142 = vector.shape_cast %141 : vector<1x128x192xbf16> to vector<128x192xbf16>
    %cst_143 = arith.constant dense<0.000000e+00> : vector<16x192xf32>
    %143 = tpu.matmul %140, %142, %cst_143 {dimension_numbers = #tpu.dot_dimension_numbers<[1], [0], [0], [1], [0, 0, 1, 1], [], []>} : vector<16x128xbf16>, vector<128x192xbf16>, vector<16x192xf32> -> vector<16x192xf32>
    %144 = arith.addf %138, %143 : vector<16x192xf32>
    %c2_144 = arith.constant 2 : index
    %c0_145 = arith.constant 0 : index
    %145 = vector.load %arg25[%c2_144, %c0_145] : memref<18x128xf32, #tpu.memory_space<vmem>>, vector<16x128xf32>
    %146 = arith.truncf %145 : vector<16x128xf32> to vector<16x128xbf16>
    %c2_146 = arith.constant 2 : index
    %c0_147 = arith.constant 0 : index
    %c0_148 = arith.constant 0 : index
    %147 = vector.load %arg10[%c2_146, %c0_147, %c0_148] : memref<3x128x192xbf16, #tpu.memory_space<vmem>>, vector<1x128x192xbf16>
    %148 = vector.shape_cast %147 : vector<1x128x192xbf16> to vector<128x192xbf16>
    %cst_149 = arith.constant dense<0.000000e+00> : vector<16x192xf32>
    %149 = tpu.matmul %146, %148, %cst_149 {dimension_numbers = #tpu.dot_dimension_numbers<[1], [0], [0], [1], [0, 0, 1, 1], [], []>} : vector<16x128xbf16>, vector<128x192xbf16>, vector<16x192xf32> -> vector<16x192xf32>
    %150 = arith.addf %144, %149 : vector<16x192xf32>
    %c0_150 = arith.constant 0 : index
    %c0_151 = arith.constant 0 : index
    %151 = vector.load %arg26[%c0_150, %c0_151] : memref<18x64xf32, #tpu.memory_space<vmem>>, vector<16x64xf32>
    %152 = arith.truncf %151 : vector<16x64xf32> to vector<16x64xbf16>
    %c0_152 = arith.constant 0 : index
    %c0_153 = arith.constant 0 : index
    %c0_154 = arith.constant 0 : index
    %153 = vector.load %arg11[%c0_152, %c0_153, %c0_154] : memref<3x64x192xbf16, #tpu.memory_space<vmem>>, vector<1x64x192xbf16>
    %154 = vector.shape_cast %153 : vector<1x64x192xbf16> to vector<64x192xbf16>
    %cst_155 = arith.constant dense<0.000000e+00> : vector<16x192xf32>
    %155 = tpu.matmul %152, %154, %cst_155 {dimension_numbers = #tpu.dot_dimension_numbers<[1], [0], [0], [1], [0, 0, 1, 1], [], []>} : vector<16x64xbf16>, vector<64x192xbf16>, vector<16x192xf32> -> vector<16x192xf32>
    %156 = arith.addf %150, %155 : vector<16x192xf32>
    %c1_156 = arith.constant 1 : index
    %c0_157 = arith.constant 0 : index
    %157 = vector.load %arg26[%c1_156, %c0_157] : memref<18x64xf32, #tpu.memory_space<vmem>>, vector<16x64xf32>
    %158 = arith.truncf %157 : vector<16x64xf32> to vector<16x64xbf16>
    %c1_158 = arith.constant 1 : index
    %c0_159 = arith.constant 0 : index
    %c0_160 = arith.constant 0 : index
    %159 = vector.load %arg11[%c1_158, %c0_159, %c0_160] : memref<3x64x192xbf16, #tpu.memory_space<vmem>>, vector<1x64x192xbf16>
    %160 = vector.shape_cast %159 : vector<1x64x192xbf16> to vector<64x192xbf16>
    %cst_161 = arith.constant dense<0.000000e+00> : vector<16x192xf32>
    %161 = tpu.matmul %158, %160, %cst_161 {dimension_numbers = #tpu.dot_dimension_numbers<[1], [0], [0], [1], [0, 0, 1, 1], [], []>} : vector<16x64xbf16>, vector<64x192xbf16>, vector<16x192xf32> -> vector<16x192xf32>
    %162 = arith.addf %156, %161 : vector<16x192xf32>
    %c2_162 = arith.constant 2 : index
    %c0_163 = arith.constant 0 : index
    %163 = vector.load %arg26[%c2_162, %c0_163] : memref<18x64xf32, #tpu.memory_space<vmem>>, vector<16x64xf32>
    %164 = arith.truncf %163 : vector<16x64xf32> to vector<16x64xbf16>
    %c2_164 = arith.constant 2 : index
    %c0_165 = arith.constant 0 : index
    %c0_166 = arith.constant 0 : index
    %165 = vector.load %arg11[%c2_164, %c0_165, %c0_166] : memref<3x64x192xbf16, #tpu.memory_space<vmem>>, vector<1x64x192xbf16>
    %166 = vector.shape_cast %165 : vector<1x64x192xbf16> to vector<64x192xbf16>
    %cst_167 = arith.constant dense<0.000000e+00> : vector<16x192xf32>
    %167 = tpu.matmul %164, %166, %cst_167 {dimension_numbers = #tpu.dot_dimension_numbers<[1], [0], [0], [1], [0, 0, 1, 1], [], []>} : vector<16x64xbf16>, vector<64x192xbf16>, vector<16x192xf32> -> vector<16x192xf32>
    %168 = arith.addf %162, %167 : vector<16x192xf32>
    %c0_168 = arith.constant 0 : index
    %c0_169 = arith.constant 0 : index
    %169 = vector.load %arg12[%c0_168, %c0_169] : memref<1x192xf32, #tpu.memory_space<vmem>>, vector<1x192xf32>
    %170 = vector.broadcast %169 : vector<1x192xf32> to vector<16x192xf32>
    %171 = arith.addf %168, %170 : vector<16x192xf32>
    %cst_170 = arith.constant 0.000000e+00 : f32
    %cst_171 = arith.constant 6.000000e+00 : f32
    %172 = vector.broadcast %cst_170 : f32 to vector<16x192xf32>
    %173 = arith.maximumf %172, %171 : vector<16x192xf32>
    %174 = vector.broadcast %cst_171 : f32 to vector<16x192xf32>
    %175 = arith.minimumf %174, %173 : vector<16x192xf32>
    %cst_172 = arith.constant 0.000000e+00 : f32
    %176 = vector.broadcast %cst_172 : f32 to vector<1x20xf32>
    %cst_173 = arith.constant dense<0.000000e+00> : vector<128xf32>
    %177 = vector.multi_reduction <add>, %79, %cst_173 [0] : vector<16x128xf32> to vector<128xf32>
    %178 = vector.shape_cast %177 : vector<128xf32> to vector<1x128xf32>
    %179 = arith.truncf %178 : vector<1x128xf32> to vector<1x128xbf16>
    %c0_174 = arith.constant 0 : index
    %c0_175 = arith.constant 0 : index
    %180 = vector.load %arg13[%c0_174, %c0_175] : memref<128x20xbf16, #tpu.memory_space<vmem>>, vector<128x20xbf16>
    %cst_176 = arith.constant dense<0.000000e+00> : vector<1x20xf32>
    %181 = tpu.matmul %179, %180, %cst_176 {dimension_numbers = #tpu.dot_dimension_numbers<[1], [0], [0], [1], [0, 0, 1, 1], [], []>} : vector<1x128xbf16>, vector<128x20xbf16>, vector<1x20xf32> -> vector<1x20xf32>
    %182 = arith.addf %176, %181 : vector<1x20xf32>
    %cst_177 = arith.constant dense<0.000000e+00> : vector<192xf32>
    %183 = vector.multi_reduction <add>, %175, %cst_177 [0] : vector<16x192xf32> to vector<192xf32>
    %184 = vector.shape_cast %183 : vector<192xf32> to vector<1x192xf32>
    %185 = arith.truncf %184 : vector<1x192xf32> to vector<1x192xbf16>
    %c0_178 = arith.constant 0 : index
    %c0_179 = arith.constant 0 : index
    %186 = vector.load %arg16[%c0_178, %c0_179] : memref<192x20xbf16, #tpu.memory_space<vmem>>, vector<192x20xbf16>
    %cst_180 = arith.constant dense<0.000000e+00> : vector<1x20xf32>
    %187 = tpu.matmul %185, %186, %cst_180 {dimension_numbers = #tpu.dot_dimension_numbers<[1], [0], [0], [1], [0, 0, 1, 1], [], []>} : vector<1x192xbf16>, vector<192x20xbf16>, vector<1x20xf32> -> vector<1x20xf32>
    %188 = arith.addf %182, %187 : vector<1x20xf32>
    %c0_181 = arith.constant 0 : index
    %c0_182 = arith.constant 0 : index
    %189 = vector.load %arg19[%c0_181, %c0_182] : memref<1x20xbf16, #tpu.memory_space<vmem>>, vector<1x20xbf16>
    %190 = arith.extf %189 : vector<1x20xbf16> to vector<1x20xf32>
    %c0_183 = arith.constant 0 : index
    %c0_184 = arith.constant 0 : index
    %191 = vector.load %arg20[%c0_183, %c0_184] : memref<1x20xbf16, #tpu.memory_space<vmem>>, vector<1x20xbf16>
    %192 = arith.extf %191 : vector<1x20xbf16> to vector<1x20xf32>
    %cst_185 = arith.constant 0.000000e+00 : f32
    %193 = vector.broadcast %cst_185 : f32 to vector<1x20xf32>
    %194 = arith.mulf %188, %190 : vector<1x20xf32>
    %cst_186 = arith.constant dense<0.000000e+00> : vector<1xf32>
    %195 = vector.multi_reduction <add>, %194, %cst_186 [1] : vector<1x20xf32> to vector<1xf32>
    %196 = vector.shape_cast %195 : vector<1xf32> to vector<1x1xf32>
    %cst_187 = arith.constant 0.000000e+00 : f32
    %197 = vector.broadcast %cst_187 : f32 to vector<1x1xf32>
    %198 = arith.maximumf %196, %197 : vector<1x1xf32>
    %199 = vector.broadcast %198 : vector<1x1xf32> to vector<1x20xf32>
    %200 = arith.mulf %199, %192 : vector<1x20xf32>
    %201 = arith.addf %193, %200 : vector<1x20xf32>
    %cst_188 = arith.constant 0.000000e+00 : f32
    %202 = vector.broadcast %cst_188 : f32 to vector<1x20xf32>
    %203 = arith.subf %202, %201 : vector<1x20xf32>
    %204 = math.exp %203 : vector<1x20xf32>
    %cst_189 = arith.constant 1.000000e+00 : f32
    %205 = vector.broadcast %cst_189 : f32 to vector<1x20xf32>
    %206 = arith.addf %205, %204 : vector<1x20xf32>
    %cst_190 = arith.constant 1.000000e+00 : f32
    %207 = vector.broadcast %cst_190 : f32 to vector<1x20xf32>
    %208 = arith.divf %207, %206 : vector<1x20xf32>
    %cst_191 = arith.constant 0.000000e+00 : f32
    %209 = vector.broadcast %cst_191 : f32 to vector<16x320xf32>
    %210 = vector.extract_strided_slice %208 {offsets = [0, 0], sizes = [1, 8], strides = [1, 1]} : vector<1x20xf32> to vector<1x8xf32>
    %211 = arith.truncf %210 : vector<1x8xf32> to vector<1x8xbf16>
    %c0_192 = arith.constant 0 : index
    %c0_193 = arith.constant 0 : index
    %212 = vector.load %arg14[%c0_192, %c0_193] : memref<8x128xbf16, #tpu.memory_space<vmem>>, vector<8x128xbf16>
    %cst_194 = arith.constant dense<0.000000e+00> : vector<1x128xf32>
    %213 = tpu.matmul %211, %212, %cst_194 {dimension_numbers = #tpu.dot_dimension_numbers<[1], [0], [0], [1], [0, 0, 1, 1], [], []>} : vector<1x8xbf16>, vector<8x128xbf16>, vector<1x128xf32> -> vector<1x128xf32>
    %214 = vector.broadcast %213 : vector<1x128xf32> to vector<16x128xf32>
    %215 = arith.mulf %79, %214 : vector<16x128xf32>
    %216 = arith.truncf %215 : vector<16x128xf32> to vector<16x128xbf16>
    %c0_195 = arith.constant 0 : index
    %c0_196 = arith.constant 0 : index
    %217 = vector.load %arg15[%c0_195, %c0_196] : memref<128x320xbf16, #tpu.memory_space<vmem>>, vector<128x320xbf16>
    %cst_197 = arith.constant dense<0.000000e+00> : vector<16x320xf32>
    %218 = tpu.matmul %216, %217, %cst_197 {dimension_numbers = #tpu.dot_dimension_numbers<[1], [0], [0], [1], [0, 0, 1, 1], [], []>} : vector<16x128xbf16>, vector<128x320xbf16>, vector<16x320xf32> -> vector<16x320xf32>
    %219 = arith.addf %209, %218 : vector<16x320xf32>
    %220 = vector.extract_strided_slice %208 {offsets = [0, 8], sizes = [1, 12], strides = [1, 1]} : vector<1x20xf32> to vector<1x12xf32>
    %221 = arith.truncf %220 : vector<1x12xf32> to vector<1x12xbf16>
    %c0_198 = arith.constant 0 : index
    %c0_199 = arith.constant 0 : index
    %222 = vector.load %arg17[%c0_198, %c0_199] : memref<12x192xbf16, #tpu.memory_space<vmem>>, vector<12x192xbf16>
    %cst_200 = arith.constant dense<0.000000e+00> : vector<1x192xf32>
    %223 = tpu.matmul %221, %222, %cst_200 {dimension_numbers = #tpu.dot_dimension_numbers<[1], [0], [0], [1], [0, 0, 1, 1], [], []>} : vector<1x12xbf16>, vector<12x192xbf16>, vector<1x192xf32> -> vector<1x192xf32>
    %224 = vector.broadcast %223 : vector<1x192xf32> to vector<16x192xf32>
    %225 = arith.mulf %175, %224 : vector<16x192xf32>
    %226 = arith.truncf %225 : vector<16x192xf32> to vector<16x192xbf16>
    %c0_201 = arith.constant 0 : index
    %c0_202 = arith.constant 0 : index
    %227 = vector.load %arg18[%c0_201, %c0_202] : memref<192x320xbf16, #tpu.memory_space<vmem>>, vector<192x320xbf16>
    %cst_203 = arith.constant dense<0.000000e+00> : vector<16x320xf32>
    %228 = tpu.matmul %226, %227, %cst_203 {dimension_numbers = #tpu.dot_dimension_numbers<[1], [0], [0], [1], [0, 0, 1, 1], [], []>} : vector<16x192xbf16>, vector<192x320xbf16>, vector<16x320xf32> -> vector<16x320xf32>
    %229 = arith.addf %219, %228 : vector<16x320xf32>
    %c0_204 = arith.constant 0 : index
    %c0_205 = arith.constant 0 : index
    %230 = vector.load %arg21[%c0_204, %c0_205] : memref<1x320xf32, #tpu.memory_space<vmem>>, vector<1x320xf32>
    %231 = vector.broadcast %230 : vector<1x320xf32> to vector<16x320xf32>
    %232 = arith.addf %229, %231 : vector<16x320xf32>
    %cst_206 = arith.constant 0.000000e+00 : f32
    %cst_207 = arith.constant 6.000000e+00 : f32
    %233 = vector.broadcast %cst_206 : f32 to vector<16x320xf32>
    %234 = arith.maximumf %233, %232 : vector<16x320xf32>
    %235 = vector.broadcast %cst_207 : f32 to vector<16x320xf32>
    %236 = arith.minimumf %235, %234 : vector<16x320xf32>
    %c0_208 = arith.constant 0 : index
    %c0_209 = arith.constant 0 : index
    %c0_210 = arith.constant 0 : index
    %237 = vector.load %arg22[%c0_208, %c0_209, %c0_210] : memref<1x16x320xf32, #tpu.memory_space<vmem>>, vector<1x16x320xf32>
    %238 = vector.shape_cast %237 : vector<1x16x320xf32> to vector<16x320xf32>
    %239 = vector.shape_cast %236 : vector<16x320xf32> to vector<1x16x320xf32>
    tpu.vector_store %arg22[%c0_208, %c0_209, %c0_210], %239 {strides = array<i32>} : memref<1x16x320xf32, #tpu.memory_space<vmem>>, vector<1x16x320xf32>,
    return
  }
  func.func @transform_0(%arg0: i32) -> (i32, i32, i32) {
    %c0_i32 = arith.constant 0 : i32
    %c0_i32_0 = arith.constant 0 : i32
    %c0_i32_1 = arith.constant 0 : i32
    return %arg0, %c0_i32, %c0_i32_0 : i32, i32, i32
  }
  func.func @transform_1(%arg0: i32) -> (i32, i32, i32) {
    %c0_i32 = arith.constant 0 : i32
    %c0_i32_0 = arith.constant 0 : i32
    %c0_i32_1 = arith.constant 0 : i32
    %c0_i32_2 = arith.constant 0 : i32
    return %c0_i32, %c0_i32_0, %c0_i32_1 : i32, i32, i32
  }
  func.func @transform_2(%arg0: i32) -> (i32, i32) {
    %c0_i32 = arith.constant 0 : i32
    %c0_i32_0 = arith.constant 0 : i32
    %c0_i32_1 = arith.constant 0 : i32
    return %c0_i32, %c0_i32_0 : i32, i32
  }
  func.func @transform_3(%arg0: i32) -> (i32, i32, i32) {
    %c0_i32 = arith.constant 0 : i32
    %c0_i32_0 = arith.constant 0 : i32
    %c0_i32_1 = arith.constant 0 : i32
    %c0_i32_2 = arith.constant 0 : i32
    return %c0_i32, %c0_i32_0, %c0_i32_1 : i32, i32, i32
  }
  func.func @transform_4(%arg0: i32) -> (i32, i32, i32) {
    %c0_i32 = arith.constant 0 : i32
    %c0_i32_0 = arith.constant 0 : i32
    %c0_i32_1 = arith.constant 0 : i32
    %c0_i32_2 = arith.constant 0 : i32
    return %c0_i32, %c0_i32_0, %c0_i32_1 : i32, i32, i32
  }
  func.func @transform_5(%arg0: i32) -> (i32, i32) {
    %c0_i32 = arith.constant 0 : i32
    %c0_i32_0 = arith.constant 0 : i32
    %c0_i32_1 = arith.constant 0 : i32
    return %c0_i32, %c0_i32_0 : i32, i32
  }
  func.func @transform_6(%arg0: i32) -> (i32, i32, i32) {
    %c0_i32 = arith.constant 0 : i32
    %c0_i32_0 = arith.constant 0 : i32
    %c0_i32_1 = arith.constant 0 : i32
    %c0_i32_2 = arith.constant 0 : i32
    return %c0_i32, %c0_i32_0, %c0_i32_1 : i32, i32, i32
  }
  func.func @transform_7(%arg0: i32) -> (i32, i32) {
    %c0_i32 = arith.constant 0 : i32
    %c0_i32_0 = arith.constant 0 : i32
    %c0_i32_1 = arith.constant 0 : i32
    return %c0_i32, %c0_i32_0 : i32, i32
  }
  func.func @transform_8(%arg0: i32) -> (i32, i32, i32) {
    %c0_i32 = arith.constant 0 : i32
    %c0_i32_0 = arith.constant 0 : i32
    %c0_i32_1 = arith.constant 0 : i32
    %c0_i32_2 = arith.constant 0 : i32
    return %c0_i32, %c0_i32_0, %c0_i32_1 : i32, i32, i32
  }
  func.func @transform_9(%arg0: i32) -> (i32, i32, i32) {
    %c0_i32 = arith.constant 0 : i32
    %c0_i32_0 = arith.constant 0 : i32
    %c0_i32_1 = arith.constant 0 : i32
    %c0_i32_2 = arith.constant 0 : i32
    return %c0_i32, %c0_i32_0, %c0_i32_1 : i32, i32, i32
  }
  func.func @transform_10(%arg0: i32) -> (i32, i32, i32) {
    %c0_i32 = arith.constant 0 : i32
    %c0_i32_0 = arith.constant 0 : i32
    %c0_i32_1 = arith.constant 0 : i32
    %c0_i32_2 = arith.constant 0 : i32
    return %c0_i32, %c0_i32_0, %c0_i32_1 : i32, i32, i32
  }
  func.func @transform_11(%arg0: i32) -> (i32, i32) {
    %c0_i32 = arith.constant 0 : i32
    %c0_i32_0 = arith.constant 0 : i32
    %c0_i32_1 = arith.constant 0 : i32
    return %c0_i32, %c0_i32_0 : i32, i32
  }
  func.func @transform_12(%arg0: i32) -> (i32, i32) {
    %c0_i32 = arith.constant 0 : i32
    %c0_i32_0 = arith.constant 0 : i32
    %c0_i32_1 = arith.constant 0 : i32
    return %c0_i32, %c0_i32_0 : i32, i32
  }
  func.func @transform_13(%arg0: i32) -> (i32, i32) {
    %c0_i32 = arith.constant 0 : i32
    %c0_i32_0 = arith.constant 0 : i32
    %c0_i32_1 = arith.constant 0 : i32
    return %c0_i32, %c0_i32_0 : i32, i32
  }
  func.func @transform_14(%arg0: i32) -> (i32, i32) {
    %c0_i32 = arith.constant 0 : i32
    %c0_i32_0 = arith.constant 0 : i32
    %c0_i32_1 = arith.constant 0 : i32
    return %c0_i32, %c0_i32_0 : i32, i32
  }
  func.func @transform_15(%arg0: i32) -> (i32, i32) {
    %c0_i32 = arith.constant 0 : i32
    %c0_i32_0 = arith.constant 0 : i32
    %c0_i32_1 = arith.constant 0 : i32
    return %c0_i32, %c0_i32_0 : i32, i32
  }
  func.func @transform_16(%arg0: i32) -> (i32, i32) {
    %c0_i32 = arith.constant 0 : i32
    %c0_i32_0 = arith.constant 0 : i32
    %c0_i32_1 = arith.constant 0 : i32
    return %c0_i32, %c0_i32_0 : i32, i32
  }
  func.func @transform_17(%arg0: i32) -> (i32, i32) {
    %c0_i32 = arith.constant 0 : i32
    %c0_i32_0 = arith.constant 0 : i32
    %c0_i32_1 = arith.constant 0 : i32
    return %c0_i32, %c0_i32_0 : i32, i32
  }
  func.func @transform_18(%arg0: i32) -> (i32, i32) {
    %c0_i32 = arith.constant 0 : i32
    %c0_i32_0 = arith.constant 0 : i32
    %c0_i32_1 = arith.constant 0 : i32
    return %c0_i32, %c0_i32_0 : i32, i32
  }
  func.func @transform_19(%arg0: i32) -> (i32, i32) {
    %c0_i32 = arith.constant 0 : i32
    %c0_i32_0 = arith.constant 0 : i32
    %c0_i32_1 = arith.constant 0 : i32
    return %c0_i32, %c0_i32_0 : i32, i32
  }
  func.func @transform_20(%arg0: i32) -> (i32, i32) {
    %c0_i32 = arith.constant 0 : i32
    %c0_i32_0 = arith.constant 0 : i32
    %c0_i32_1 = arith.constant 0 : i32
    return %c0_i32, %c0_i32_0 : i32, i32
  }
  func.func @transform_21(%arg0: i32) -> (i32, i32, i32) {
    %c0_i32 = arith.constant 0 : i32
    %c0_i32_0 = arith.constant 0 : i32
    %c0_i32_1 = arith.constant 0 : i32
    return %arg0, %c0_i32, %c0_i32_0 : i32, i32, i32
  }
}

</mosaic_0001>

<bundles_post_ra>
// kernel: forward.1
= control target key start
LH: loop header
LB: loop body
LE: loop exit
PB: predicated region body
PF: predicated region fallthrough
CT: control target
= control target key end

     0   :  { %s8306_s0 = inlined_call_operand.vmem [shape: f32[2,16,192], index: 0, kind: input, shape index: {}]   ;;  %s8307_s1 = inlined_call_operand.vmem [shape: bf16[3,192,64], index: 1, kind: input, shape index: {}]   ;;  %s8308_s2 = inlined_call_operand.vmem [shape: f32[1,64], index: 2, kind: input, shape index: {}]   ;;  %s8309_s3 = inlined_call_operand.vmem [shape: bf16[3,192,128], index: 3, kind: input, shape index: {}]   ;;  %s8310_s4 = inlined_call_operand.vmem [shape: bf16[3,64,128], index: 4, kind: input, shape index: {}]   ;;  %s8311_s5 = inlined_call_operand.vmem [shape: f32[1,128], index: 5, kind: input, shape index: {}]   ;;  %s8312_s6 = inlined_call_operand.vmem [shape: bf16[3,128,64], index: 6, kind: input, shape index: {}]   ;;  %s8313_s7 = inlined_call_operand.vmem [shape: f32[1,64], index: 7, kind: input, shape index: {}]   ;;  %s8314_s8 = inlined_call_operand.vmem [shape: bf16[3,192,192], index: 8, kind: input, shape index: {}]   ;;  %s8315_s9 = inlined_call_operand.vmem [shape: bf16[3,128,192], index: 9, kind: input, shape index: {}]   ;;  %s8316_s10 = inlined_call_operand.vmem [shape: bf16[3,64,192], index: 10, kind: input, shape index: {}]   ;;  %s8317_s11 = inlined_call_operand.vmem [shape: f32[1,192], index: 11, kind: input, shape index: {}]   ;;  %s8318_s12 = inlined_call_operand.vmem [shape: bf16[128,20], index: 12, kind: input, shape index: {}]   ;;  %s8319_s13 = inlined_call_operand.vmem [shape: bf16[8,128], index: 13, kind: input, shape index: {}]   ;;  %s8320_s14 = inlined_call_operand.vmem [shape: bf16[128,320], index: 14, kind: input, shape index: {}]   ;;  %s8321_s15 = inlined_call_operand.vmem [shape: bf16[192,20], index: 15, kind: input, shape index: {}]   ;;  %s8322_s16 = inlined_call_operand.vmem [shape: bf16[12,192], index: 16, kind: input, shape index: {}]   ;;  %s8323_s17 = inlined_call_operand.vmem [shape: bf16[192,320], index: 17, kind: input, shape index: {}]   ;;  %s8324_s18 = inlined_call_operand.vmem [shape: bf16[1,20], index: 18, kind: input, shape index: {}]   ;;  %s8325_s19 = inlined_call_operand.vmem [shape: bf16[1,20], index: 19, kind: input, shape index: {}]   ;;  %s8326_s20 = inlined_call_operand.vmem [shape: f32[1,320], index: 20, kind: input, shape index: {}]   ;;  %s8327_s21 = inlined_call_operand.vmem [shape: f32[2,16,320], index: 21, kind: output, shape index: {}]  }
   0x1   :  { %8333 = sst [smem:[#allocation6_spill]] %s8306_s0 }
   0x2   :  { %8334 = sst [smem:[#allocation7_spill]] %s8307_s1 }
   0x3   :  { %8335 = sst [smem:[#allocation8_spill]] %s8308_s2  ;;  %s6434_s2 = smov 0  }
   0x4   :  { %8336 = sst [smem:[#allocation9_spill]] %s8309_s3 }
   0x5   :  { %8337 = sst [smem:[#allocation10_spill]] %s8310_s4 }
   0x6   :  { %8338 = sst [smem:[#allocation11_spill]] %s8311_s5 }
   0x7 LB: > { %s4344_s25 = sadd.s32 4294967295, %s6320_s2   ;;  %p4348_p0 = scmp.ge.s32.totalorder %s6320_s2, 1  ;;  %s6320_s2 = sphi %s6434_s2, %s31_s2  }
   0x8   : > { %p587_p1 = scmp.lt.s32.totalorder %s6320_s2, 3 }
   0xa   : > { %p588_p2 = pnand %p4348_p0, %p587_p1 }
   0xb   : > { %s8339_s3 = sld [smem:[#allocation7_spill]] (!%p588_p2)  ;;  %p647_p3 = scmp.lt.s32.totalorder (!%p588_p2), %s4344_s25, 1 }
   0xc   : > { %591 = sbr.rel (%p588_p2) target bundleno = 1448 (0x5a8), region = 104  ;;  %s8340_s23 = sld [smem:[#allocation6_spill]] (!%p588_p2) }
   0xd   : > { %s8341_s24 = sld [smem:[#allocation9_spill]] (!%p588_p2) }
   0xe   : > { %s8343_s5 = sld [smem:[#allocation8_spill]] (!%p588_p2) }
   0xf   : > { %s8344_s30 = sld [smem:[#allocation11_spill]] (!%p588_p2) }
  0x11   : > { %v5978_v0 = vld [vmem:[%s8339_s3 + $0x98] sm:$0xff]  ;;  %v662_v3 = vlaneseq  ;;  %v5977_v5 = vld [vmem:[%s8339_s3 + $0x90] sm:$0xff]  ;;  %s8346_s25 = smov (!%p647_p3, %s4344_s25), 1  ;;  %v6322_v9 = vmov 0.0   ;;  %v5976_v10 = vld [vmem:[%s8339_s3 + $0x88] sm:$0xff]  ;;  %vm675_vm1 = vcmask 1040384  }
  0x12   : > { %v5982_v1 = vld [vmem:[%s8339_s3 + $0xb8] sm:$0xff]  ;;  %861 = vmatpush.bf16.msra.mxu0 %v5978_v0  ;;  %v5981_v6 = vld [vmem:[%s8339_s3 + $0xb0] sm:$0xff]  ;;  %s5958_s0 = sshll.u32 %s8346_s25, 5  ;;  %1773 = vst [vmem:[#allocation4] sm:$0x1] %v6322_v9  ;;  %v5980_v11 = vld [vmem:[%s8339_s3 + $0xa8] sm:$0xff] }
  0x13   : > { %v5966_v2 = vld [vmem:[%s8339_s3 + $0x38] sm:$0xff]  ;;  %879 = vmatpush.bf16.msra.mxu1 %v5982_v1  ;;  %vm664_vm0 = vcmp.lt.s32.totalorder %v662_v3, 192  ;;  %v5965_v7 = vld [vmem:[%s8339_s3 + $0x30] sm:$0xff]  ;;  %s6475_s1 = scalar_lea.vmem %s8340_s23, %s5958_s0  ;;  %vm689_vm2 = vcmask 523265   ;;  %1774 = vst [vmem:[#allocation4 + $0x11] sm:$0x1] %v6322_v9 }
  0x14   : > { %v5970_v4 = vld [vmem:[%s8339_s3 + $0x58] sm:$0xff]  ;;  %964 = vmatpush.bf16.msra.mxu2 %v5966_v2  ;;  %v5969_v8 = vld [vmem:[%s8339_s3 + $0x50] sm:$0xff]  ;;  %666 = vst.msk [vmem:[#allocation2] ss:$8 sm:$0x3] %vm664_vm0, %v6322_v9  ;;  %v659_v12 = vld [vmem:[%s6475_s1 + $0x8] sm:$0xff] }
  0x15   : > { %982 = vmatpush.bf16.msra.mxu3 %v5970_v4  ;;  %669 = vst.msk [vmem:[#allocation2 + $0x21] ss:$8 sm:$0x3] %vm664_vm0, %v6322_v9  ;;  %v661_v13 = vld [vmem:[%s6475_s1 + $0x18] sm:$0xff]  ;;  %v5964_v14 = vld [vmem:[%s8339_s3 + $0x28] sm:$0xff]  ;;  %v677_v16 = vrot.slane %v659_v12, 7 }
  0x16   : > { %862 = vmatpush.bf16.msra.mxu0 %v5977_v5  ;;  %v5968_v15 = vld [vmem:[%s8339_s3 + $0x48] sm:$0xff]  ;;  %v680_v17 = vrot.slane %v661_v13, 7  ;;  %vm692_vm3 = vcmask 523264   ;;  %vm695_vm4 = vcmask 516096   ;;  %v5975_v19 = vld [vmem:[%s8339_s3 + $0x80] sm:$0xff]  ;;  %v5990_v22 = vld [vmem:[%s8339_s3 + $0xf8] sm:$0xff] }
  0x17   : > { %880 = vmatpush.bf16.msra.mxu1 %v5981_v6  ;;  %690 = vst.msk [vmem:[#allocation2 + $0x8] sm:$0xfe] %vm689_vm2, %v677_v16  ;;  %v5979_v20 = vld [vmem:[%s8339_s3 + $0xa0] sm:$0xff]  ;;  %v5974_v25 = vld [vmem:[%s8339_s3 + $0x78] sm:$0xff]  ;;  %v660_v26 = vld [vmem:[%s6475_s1 + $0x10] sm:$0xff]  ;;  %vm1029_vm6 = vcmask 1046528  }
  0x18   : > { %965 = vmatpush.bf16.msra.mxu2 %v5965_v7  ;;  %v681_v18 = vsel %vm675_vm1, %v677_v16, %v680_v17  ;;  %v5963_v21 = vld [vmem:[%s8339_s3 + $0x20] sm:$0xff]  ;;  %696 = vst.msk [vmem:[#allocation2 + $0x28] sm:$0x1] %vm695_vm4, %v680_v17  ;;  %v5994_v28 = vld [vmem:[%s8339_s3 + $0x118] sm:$0xff]  ;;  %v678_v29 = vrot.slane %v660_v26, 7  ;;  %v5989_v31 = vld [vmem:[%s8339_s3 + $0xf0] sm:$0xff] }
  0x19   : > { %983 = vmatpush.bf16.msra.mxu3 %v5969_v8  ;;  %693 = vst.msk [vmem:[#allocation2 + $0x18] sm:$0xff] %vm692_vm3, %v681_v18  ;;  %v658_v23 = vld [vmem:[%s6475_s1] sm:$0xff]  ;;  %v5962_v30 = vld [vmem:[%s8339_s3 + $0x18] sm:$0xff]  ;;  %v5993_v36 = vld [vmem:[%s8339_s3 + $0x110] sm:$0xff]  ;;  %vm760_vm5 = vsmask.f32 7424 }
  0x1a   : > { %863 = vmatpush.bf16.msra.mxu0 %v5976_v10  ;;  %v5967_v24 = vld [vmem:[%s8339_s3 + $0x40] sm:$0xff]  ;;  %1152 = vst.msk [vmem:[#allocation3] sm:$0x1] %vm695_vm4, %v6322_v9  ;;  %v676_v27 = vrot.slane %v658_v23, 7  ;;  %v5973_v39 = vld [vmem:[%s8339_s3 + $0x70] sm:$0xff]  ;;  %v5988_v42 = vld [vmem:[%s8339_s3 + $0xe8] sm:$0xff] }
  0x1b   : > { %881 = vmatpush.bf16.msra.mxu1 %v5980_v11  ;;  %1153 = vst.msk [vmem:[#allocation3 + $0x11] sm:$0x1] %vm695_vm4, %v6322_v9  ;;  %v5961_v41 = vld [vmem:[%s8339_s3 + $0x10] sm:$0xff]  ;;  %v5992_v47 = vld [vmem:[%s8339_s3 + $0x108] sm:$0xff]  ;;  %v5987_v56 = vld [vmem:[%s8339_s3 + $0xe0] sm:$0xff]  ;;  %s8342_s0 = sld [smem:[#allocation10_spill]] }
  0x1c   : > { %966 = vmatpush.bf16.msra.mxu2 %v5964_v14  ;;  %2034 = vst.msk [vmem:[#allocation5] sm:$0x1] %vm695_vm4, %v6322_v9  ;;  %v6525_v34 = vsel %vm675_vm1, %v676_v27, %v678_v29  ;;  %v5972_v48 = vld [vmem:[%s8339_s3 + $0x68] sm:$0xff]  ;;  %v5991_v58 = vld [vmem:[%s8339_s3 + $0x100] sm:$0xff]  ;;  %v6002_v3 = vld [vmem:[%s8341_s24 + $0x38] sm:$0xff]  ;;  %vm3617_vm7 = vcmask 155648  }
  0x1d   : > { %984 = vmatpush.bf16.msra.mxu3 %v5968_v15  ;;  %2035 = vst.msk [vmem:[#allocation5 + $0x11] sm:$0x1] %vm695_vm4, %v6322_v9  ;;  %v5960_v53 = vld [vmem:[%s8339_s3 + $0x8] sm:$0xff]  ;;  %v5971_v63 = vld [vmem:[%s8339_s3 + $0x60] sm:$0xff]  ;;  %v6014_v6 = vld [vmem:[%s8341_s24 + $0x98] sm:$0xff]  ;;  %vm3649_vm8 = vcmask 1043456  }
  0x1e   : > { %864 = vmatpush.bf16.msra.mxu0 %v5975_v19  ;;  %v698_v32 = vld [vmem:[#allocation2 + $0x8] sm:$0xff]  ;;  %688 = vst [vmem:[#allocation2] sm:$0xfe] %v676_v27  ;;  %v5959_v4 = vld [vmem:[%s8339_s3] sm:$0xff]  ;;  %v5986_v7 = vld [vmem:[%s8339_s3 + $0xd8] sm:$0xff]  ;;  %vm3719_vm9 = vcmask 1045504  }
  0x1f   : > { %882 = vmatpush.bf16.msra.mxu1 %v5979_v20  ;;  %v728_v33 = vld [vmem:[#allocation2 + $0x8] sm:$0xfe]  ;;  %691 = vst [vmem:[#allocation2 + $0x10] sm:$0xff] %v6525_v34  ;;  %v730_v40 = vld [vmem:[#allocation2 + $0x28] sm:$0x1]  ;;  %v6018_v10 = vld [vmem:[%s8341_s24 + $0xb8] sm:$0xff] }
  0x20   : > { %967 = vmatpush.bf16.msra.mxu2 %v5963_v21  ;;  %v6527_v35 = vld [vmem:[#allocation2 + $0x18] sm:$0xff]  ;;  %694 = vst [vmem:[#allocation2 + $0x20] sm:$0x1] %v678_v29  ;;  %v734_v43 = vpack.c.bf16 %v730_v40, %v730_v40  ;;  %v993_v50 = vld [vmem:[#allocation2 + $0x8] sm:$0xfc]  ;;  %v6001_v16 = vld [vmem:[%s8341_s24 + $0x30] sm:$0xff] }
  0x21   : > { %985 = vmatpush.bf16.msra.mxu3 %v5967_v24  ;;  %v6534_v37 = vpack.c.bf16 %v6527_v35, %v698_v32  ;;  %v732_v38 = vpack.c.bf16 %v6527_v35, %v728_v33  ;;  %v995_v51 = vld [vmem:[#allocation2 + $0x28] sm:$0x3]  ;;  %v997_v60 = vpack.c.bf16 %v6527_v35, %v993_v50  ;;  %v6013_v17 = vld [vmem:[%s8341_s24 + $0x90] sm:$0xff]  ;;  %v5983_v32 = vld [vmem:[%s8339_s3 + $0xc0] sm:$0xff]  ;;  %vm3645_vm14 = vcmask 64512   ;;  %s6293_s29 = smul.u32 48, %s8346_s25 }
  0x22   : > { %865 = vmatpush.bf16.msra.mxu0 %v5974_v25  ;;  %v781_v46 = vshll.u32 %v734_v43, 16  ;;  %v999_v61 = vpack.c.bf16 %v995_v51, %v995_v51  ;;  %v5985_v19 = vld [vmem:[%s8339_s3 + $0xd0] sm:$0xff]  ;;  %v6000_v24 = vld [vmem:[%s8341_s24 + $0x28] sm:$0xff]  ;;  %v5998_v40 = vld [vmem:[%s8341_s24 + $0x18] sm:$0xff]  ;;  %vm3715_vm15 = vcmask 97280  }
  0x23   : > { %1112 = vmatpush.bf16.msrb.mxu1 %v5990_v22  ;;  %v774_v44 = vshrl.u32 %v732_v38, 16  ;;  %v776_v45 = vshll.u32 %v732_v38, 16  ;;  %v1033_v11 = vrot.slane %v997_v60, 1  ;;  %v6017_v23 = vld [vmem:[%s8341_s24 + $0xb0] sm:$0xff]  ;;  %v6012_v25 = vld [vmem:[%s8341_s24 + $0x88] sm:$0xff]  ;;  %v6015_v38 = vld [vmem:[%s8341_s24 + $0xa0] sm:$0xff] }
  0x24   : > { %968 = vmatpush.bf16.msra.mxu2 %v5962_v30  ;;  %4473 = vmatmul.msk.bf16.vlgmr.msra.gmra.mxu3 %vm692_vm3, %v6534_v37  ;;  %v783_v52 = vrot.slane %v781_v46, 1  ;;  %v1034_v12 = vrot.slane %v999_v61, 1  ;;  %v5984_v26 = vld [vmem:[%s8339_s3 + $0xc8] sm:$0xff]  ;;  %v5999_v30 = vld [vmem:[%s8341_s24 + $0x20] sm:$0xff]  ;;  %v6025_v43 = vld [vmem:[%s8341_s24 + $0xf0] sm:$0xff] }
  0x25   : > { %1130 = vmatpush.bf16.msrb.mxu3 %v5994_v28  ;;  %v778_v49 = vrot.slane %v776_v45, 1  ;;  %v727_v54 = vld [vmem:[#allocation2] sm:$0xfe]  ;;  %v6016_v29 = vld [vmem:[%s8341_s24 + $0xa8] sm:$0xff] }
  0x26   : > { %866 = vmatpush.bf16.msra.mxu0 %v5973_v39  ;;  %v731_v57 = vpack.c.bf16 %v6525_v34, %v727_v54  ;;  %v697_v5 = vld [vmem:[#allocation2] sm:$0xff]  ;;  %v1035_v20 = vsel %vm1029_vm6, %v1033_v11, %v1034_v12  ;;  %v6026_v39 = vld [vmem:[%s8341_s24 + $0xf8] sm:$0xff]  ;;  %v6024_v45 = vld [vmem:[%s8341_s24 + $0xe8] sm:$0xff] }
  0x27   : > { %1113 = vmatpush.bf16.msrb.mxu1 %v5989_v31  ;;  %v779_v55 = vor.u32 %v778_v49, %v774_v44  ;;  %v729_v59 = vld [vmem:[#allocation2 + $0x20] sm:$0x1]  ;;  %v6586_v15 = vpack.c.bf16 %v6525_v34, %v697_v5  ;;  %v992_v21 = vld [vmem:[#allocation2] sm:$0xfc]  ;;  %v6009_v44 = vld [vmem:[%s8341_s24 + $0x70] sm:$0xff] }
  0x28   : > { %969 = vmatpush.bf16.msra.mxu2 %v5961_v41  ;;  %v733_v0 = vpack.c.bf16 %v729_v59, %v729_v59  ;;  %v762_v1 = vshrl.u32 %v731_v57, 16  ;;  %v764_v2 = vshll.u32 %v731_v57, 16  ;;  %v994_v22 = vld [vmem:[#allocation2 + $0x20] sm:$0x3]  ;;  %v996_v27 = vpack.c.bf16 %v6525_v34, %v992_v21  ;;  %v6010_v41 = vld [vmem:[%s8341_s24 + $0x78] sm:$0xff]  ;;  %v6008_v46 = vld [vmem:[%s8341_s24 + $0x68] sm:$0xff] }
  0x29   : > { %1131 = vmatpush.bf16.msrb.mxu3 %v5993_v36  ;;  %v784_v62 = vsel %vm760_vm5, %v779_v55, %v783_v52  ;;  %v998_v28 = vpack.c.bf16 %v994_v22, %v994_v22  ;;  %v6011_v31 = vld [vmem:[%s8341_s24 + $0x80] sm:$0xff]  ;;  %v1189_v50 = vld [vmem:[#allocation2 + $0x28] sm:$0x1] }
  0x2a   : > { %867 = vmatpush.bf16.msra.mxu0 %v5972_v48  ;;  %4424 = vmatmul.msk.bf16.vlgmr.msra.gmra.mxu1 %vm692_vm3, %v784_v62  ;;  %v766_v8 = vrot.slane %v764_v2, 1  ;;  %v769_v9 = vshll.u32 %v733_v0, 16  ;;  %v1030_v33 = vrot.slane %v996_v27, 1  ;;  %v1187_v48 = vld [vmem:[#allocation2 + $0x8] sm:$0xfe]  ;;  %v1193_v51 = vpack.c.bf16 %v1189_v50, %v1189_v50  ;;  %v6022_v62 = vld [vmem:[%s8341_s24 + $0xd8] sm:$0xff] }
  0x2b   : > { %1114 = vmatpush.bf16.msrb.mxu1 %v5988_v42  ;;  %v1031_v36 = vrot.slane %v998_v28, 1  ;;  %v1191_v49 = vpack.c.bf16 %v6527_v35, %v1187_v48  ;;  %v1188_v60 = vld [vmem:[#allocation2 + $0x20] sm:$0x1]  ;;  %v5997_v2 = vld [vmem:[%s8341_s24 + $0x10] sm:$0xff]  ;;  %v5996_v11 = vld [vmem:[%s8341_s24 + $0x8] sm:$0xff] }
  0x2c   : > { %970 = vmatpush.bf16.msra.mxu2 %v5960_v53  ;;  %v767_v13 = vor.u32 %v766_v8, %v762_v1  ;;  %v771_v14 = vrot.slane %v769_v9, 1  ;;  %v1239_v55 = vshll.u32 %v1193_v51, 16  ;;  %v6007_v1 = vld [vmem:[%s8341_s24 + $0x60] sm:$0xff]  ;;  %v6030_v8 = vld [vmem:[%s8341_s24 + $0x118] sm:$0xff]  ;;  %v1451_v28 = vld [vmem:[#allocation2 + $0x8] sm:$0xfc] }
  0x2d   : > { %1132 = vmatpush.bf16.msrb.mxu3 %v5992_v47  ;;  %v1032_v42 = vsel %vm1029_vm6, %v1030_v33, %v1031_v36  ;;  %v6023_v47 = vld [vmem:[%s8341_s24 + $0xe0] sm:$0xff]  ;;  %v1234_v52 = vshll.u32 %v1191_v49, 16  ;;  %v1232_v53 = vshrl.u32 %v1191_v49, 16  ;;  %v6040_v48 = vld [vmem:[%s8342_s0 + $0x48] sm:$0xff] }
  0x2e   : > { %868 = vmatpush.bf16.msra.mxu0 %v5971_v63  ;;  %v772_v18 = vsel %vm760_vm5, %v767_v13, %v771_v14  ;;  %v1192_v63 = vpack.c.bf16 %v1188_v60, %v1188_v60  ;;  %v6020_v13 = vld [vmem:[%s8341_s24 + $0xc8] sm:$0xff]  ;;  %v5995_v14 = vld [vmem:[%s8341_s24] sm:$0xff]  ;;  %v6106_v60 = vld [vmem:[%s8314_s8 + $0x134] sm:$0xf0] }
  0x2f   : > { %1115 = vmatpush.bf16.msrb.mxu1 %v5987_v56  ;;  %v1236_v54 = vrot.slane %v1234_v52, 1  ;;  %v1186_v56 = vld [vmem:[#allocation2] sm:$0xfe] }
  0x30   : > { %971 = vmatpush.bf16.msra.mxu2 %v5959_v4  ;;  %v1190_v59 = vpack.c.bf16 %v6525_v34, %v1186_v56  ;;  %v6035_v51 = vld [vmem:[%s8342_s0 + $0x20] sm:$0xff] }
  0x31   : > { %1133 = vmatpush.bf16.msrb.mxu3 %v5991_v58  ;;  %869 = vmatmul.bf16.vlgmr.msra.gmra.mxu0 %v772_v18  ;;  %v1237_v57 = vor.u32 %v1236_v54, %v1232_v53  ;;  %v1241_v58 = vrot.slane %v1239_v55, 1  ;;  %v6019_v18 = vld [vmem:[%s8341_s24 + $0xc0] sm:$0xff] }
  0x32   : > { %1319 = vmatpush.bf16.msrb.mxu0 %v6014_v6  ;;  %v1222_v0 = vshll.u32 %v1190_v59, 16  ;;  %v1220_v4 = vshrl.u32 %v1190_v59, 16  ;;  %v1227_v6 = vshll.u32 %v1192_v63, 16  ;;  %v6031_v52 = vld [vmem:[%s8342_s0] sm:$0xff]  ;;  %v5019_v59 = vld [vmem:[%s8314_s8 + $0x130] sm:$0xf] }
  0x33   : > { %1116 = vmatpush.bf16.msrb.mxu1 %v5986_v7  ;;  %972 = vmatmul.bf16.vlgmr.msra.gmra.mxu2 %v6586_v15  ;;  %v1242_v61 = vsel %vm760_vm5, %v1237_v57, %v1241_v58  ;;  %v6006_v7 = vld [vmem:[%s8341_s24 + $0x58] sm:$0xff]  ;;  %v6039_v53 = vld [vmem:[%s8342_s0 + $0x40] sm:$0xff]  ;;  %v6104_v63 = vld [vmem:[%s8314_s8 + $0x124] sm:$0xf0] }
  0x34   : > { %1337 = vmatpush.bf16.msrb.mxu2 %v6018_v10  ;;  %4546 = vmatmul.msk.bf16.vlgmr.msrb.gmra.mxu3 %vm692_vm3, %v1035_v20  ;;  %v1224_v5 = vrot.slane %v1222_v0, 1  ;;  %v1229_v10 = vrot.slane %v1227_v6, 1  ;;  %v1452_v20 = vld [vmem:[#allocation2 + $0x20] sm:$0x3] }
  0x35   : > { %1422 = vmatpush.bf16.msra.mxu3 %v6002_v3  ;;  %v6021_v3 = vld [vmem:[%s8341_s24 + $0xd0] sm:$0xff]  ;;  %v1456_v22 = vpack.c.bf16 %v1452_v20, %v1452_v20 }
  0x36   : > { %1320 = vmatpush.bf16.msrb.mxu0 %v6013_v17  ;;  %v1225_v9 = vor.u32 %v1224_v5, %v1220_v4  ;;  %v6029_v17 = vld [vmem:[%s8341_s24 + $0x110] sm:$0xff]  ;;  %v6304_v4 = vld [vmem:[%s8343_s5] ss:$0 sm:$0xff] }
  0x37   : > { %1117 = vmatpush.bf16.msrb.mxu1 %v5985_v19  ;;  %v1450_v19 = vld [vmem:[#allocation2] sm:$0xfc] }
  0x38   : > { %1338 = vmatpush.bf16.msrb.mxu2 %v6017_v23  ;;  %v1230_v12 = vsel %vm760_vm5, %v1225_v9, %v1229_v10  ;;  %v1454_v21 = vpack.c.bf16 %v6525_v34, %v1450_v19  ;;  %v6004_v23 = vld [vmem:[%s8341_s24 + $0x48] sm:$0xff] }
  0x39   : > { %1423 = vmatpush.bf16.msra.mxu3 %v6001_v16  ;;  %v6005_v16 = vld [vmem:[%s8341_s24 + $0x50] sm:$0xff] }
  0x3a   : > { %1321 = vmatpush.bf16.msrb.mxu0 %v6012_v25  ;;  %v1487_v25 = vrot.slane %v1454_v21, 1 }
  0x3b   : > { %1118 = vmatpush.bf16.msrb.mxu1 %v5984_v26  ;;  %v1488_v26 = vrot.slane %v1456_v22, 1 }
  0x3c   : > { %1339 = vmatpush.bf16.msrb.mxu2 %v6016_v29  ;;  %v1453_v29 = vld [vmem:[#allocation2 + $0x28] sm:$0x3] }
  0x3d   : > { %1424 = vmatpush.bf16.msra.mxu3 %v6000_v24  ;;  %v6028_v24 = vld [vmem:[%s8341_s24 + $0x108] sm:$0xff]  ;;  %v1489_v27 = vsel %vm1029_vm6, %v1487_v25, %v1488_v26  ;;  %v1457_v33 = vpack.c.bf16 %v1453_v29, %v1453_v29  ;;  %v6098_v25 = vld [vmem:[%s8314_s8 + $0xf4] sm:$0xf0]  ;;  %v4979_v29 = vld [vmem:[%s8314_s8 + $0xe0] sm:$0xf] }
  0x3e   : > { %1322 = vmatpush.bf16.msrb.mxu0 %v6011_v31  ;;  %v6027_v31 = vld [vmem:[%s8341_s24 + $0x100] sm:$0xff] }
  0x3f   : > { %1119 = vmatpush.bf16.msrb.mxu1 %v5983_v32  ;;  %v1455_v32 = vpack.c.bf16 %v6527_v35, %v1451_v28  ;;  %v6034_v35 = vld [vmem:[%s8342_s0 + $0x18] sm:$0xff] }
  0x40   : > { %1340 = vmatpush.bf16.msrb.mxu2 %v6015_v38  ;;  %v1491_v38 = vrot.slane %v1457_v33, 1 }
  0x41   : > { %1425 = vmatpush.bf16.msra.mxu3 %v5999_v30  ;;  %v6003_v30 = vld [vmem:[%s8341_s24 + $0x40] sm:$0xff]  ;;  %v1490_v36 = vrot.slane %v1455_v32, 1 }
  0x42   : > { %1120 = vmatmul.bf16.vlgmr.msrb.gmra.mxu1 %v1032_v42  ;;  %1323 = vmatpush.bf16.msrb.mxu0 %v6010_v41  ;;  %v6038_v41 = vld [vmem:[%s8342_s0 + $0x38] sm:$0xff] }
  0x43   : > { %4619 = vmatmul.msk.bf16.vlgmr.msrb.gmra.mxu2 %vm692_vm3, %v1242_v61  ;;  %1440 = vmatpush.bf16.msra.mxu1 %v6006_v7  ;;  %v6042_v42 = vld [vmem:[%s8342_s0 + $0x58] sm:$0xff]  ;;  %v5011_v61 = vld [vmem:[%s8314_s8 + $0x120] sm:$0xf]  ;;  %v5003_v7 = vld [vmem:[%s8314_s8 + $0x110] sm:$0xf] }
  0x44   : > { %1569 = vmatpush.bf16.msra.mxu2 %v6026_v39  ;;  %v1492_v39 = vsel %vm1029_vm6, %v1490_v36, %v1491_v38  ;;  %v5012_v5 = vor.u32 %v6104_v63, %v5011_v61  ;;  %v4971_v36 = vld [vmem:[%s8314_s8 + $0xd0] sm:$0xf]  ;;  %v6094_v38 = vld [vmem:[%s8314_s8 + $0xd4] sm:$0xf0] }
  0x45   : > { %1426 = vmatpush.bf16.msra.mxu3 %v5998_v40  ;;  %v6074_v63 = vld [vmem:[%s8314_s8 + $0x34] sm:$0xf0] }
  0x46   : > { %1324 = vmatpush.bf16.msrb.mxu0 %v6009_v44  ;;  %v6033_v44 = vld [vmem:[%s8342_s0 + $0x10] sm:$0xff] }
  0x47   : > { %1441 = vmatpush.bf16.msra.mxu1 %v6005_v16  ;;  %v6100_v16 = vld [vmem:[%s8314_s8 + $0x104] sm:$0xf0] }
  0x48   : > { %1570 = vmatpush.bf16.msra.mxu2 %v6025_v43 }
  0x49   : > { %1427 = vmatpush.bf16.msra.mxu3 %v5997_v2 }
  0x4a   : > { %1325 = vmatpush.bf16.msrb.mxu0 %v6008_v46  ;;  %v6036_v46 = vld [vmem:[%s8342_s0 + $0x28] sm:$0xff] }
  0x4b   : > { %1442 = vmatpush.bf16.msra.mxu1 %v6004_v23 }
  0x4c   : > { %1571 = vmatpush.bf16.msra.mxu2 %v6024_v45  ;;  %v6041_v45 = vld [vmem:[%s8342_s0 + $0x50] sm:$0xff] }
  0x4d   : > { %1428 = vmatpush.bf16.msra.mxu3 %v5996_v11 }
  0x4e   : > { %1326 = vmatpush.bf16.msrb.mxu0 %v6007_v1 }
  0x4f   : > { %1443 = vmatpush.bf16.msra.mxu1 %v6003_v30  ;;  %v6096_v30 = vld [vmem:[%s8314_s8 + $0xe4] sm:$0xf0] }
  0x50   : > { %1572 = vmatpush.bf16.msra.mxu2 %v6023_v47  ;;  %v6032_v47 = vld [vmem:[%s8342_s0 + $0x8] sm:$0xff]  ;;  %v4980_v33 = vor.u32 %v6096_v30, %v4979_v29  ;;  %v5255_v30 = vld [vmem:[%s8314_s8 + $0x210] sm:$0xf] }
  0x51   : > { %1327 = vmatmul.bf16.vlgmr.msrb.gmra.mxu0 %v1230_v12  ;;  %1429 = vmatpush.bf16.msra.mxu3 %v5995_v14  ;;  %v4995_v14 = vld [vmem:[%s8314_s8 + $0x100] sm:$0xf] }
  0x52   : > { %1587 = vmatpush.bf16.msra.mxu0 %v6030_v8  ;;  %4668 = vmatmul.msk.bf16.vlgmr.msra.gmra.mxu1 %vm692_vm3, %v6534_v37  ;;  %v6037_v37 = vld [vmem:[%s8342_s0 + $0x30] sm:$0xff]  ;;  %v6102_v8 = vld [vmem:[%s8314_s8 + $0x114] sm:$0xf0]  ;;  %v4996_v23 = vor.u32 %v6100_v16, %v4995_v14  ;;  %s8293_s0 = scalar_lea.vmem %s8327_s21, %s6293_s29 }
  0x53   : > { %1641 = vmatpush.bf16.msrb.mxu1 %v6034_v35  ;;  %v5117_v35 = vld [vmem:[%s8314_s8 + $0x70] sm:$0xf] }
  0x54   : > { %1573 = vmatpush.bf16.msra.mxu2 %v6022_v62  ;;  %1430 = vmatmul.bf16.vlgmr.msra.gmra.mxu3 %v6586_v15  ;;  %v5020_v62 = vor.u32 %v6106_v60, %v5019_v59  ;;  %v6076_v60 = vld [vmem:[%s8314_s8 + $0x44] sm:$0xf0] }
  0x55   : > { %1696 = vmatpush.bf16.msrb.mxu3 %v6038_v41  ;;  %v6092_v41 = vld [vmem:[%s8314_s8 + $0xc4] sm:$0xf0] }
  0x56   : > { %1588 = vmatpush.bf16.msra.mxu0 %v6029_v17 }
  0x57   : > { %1642 = vmatpush.bf16.msrb.mxu1 %v6033_v44 }
  0x58   : > { %1574 = vmatpush.bf16.msra.mxu2 %v6021_v3 }
  0x59   : > { %1697 = vmatpush.bf16.msrb.mxu3 %v6037_v37  ;;  %v6082_v37 = vld [vmem:[%s8314_s8 + $0x74] sm:$0xf0] }
  0x5a   : > { %1589 = vmatpush.bf16.msra.mxu0 %v6028_v24  ;;  %v4987_v24 = vld [vmem:[%s8314_s8 + $0xf0] sm:$0xf] }
  0x5b   : > { %1643 = vmatpush.bf16.msrb.mxu1 %v6032_v47  ;;  %v4988_v28 = vor.u32 %v6098_v25, %v4987_v24  ;;  %v6049_v24 = vld [vmem:[%s8312_s6 + $0x30] sm:$0xff]  ;;  %v5263_v25 = vld [vmem:[%s8314_s8 + $0x220] sm:$0xf] }
  0x5c   : > { %1575 = vmatpush.bf16.msra.mxu2 %v6020_v13  ;;  %v5004_v13 = vor.u32 %v6102_v8, %v5003_v7  ;;  %v2070_v8 = vld [vmem:[#allocation2 + $0x20] sm:$0x1] }
  0x5d   : > { %1698 = vmatpush.bf16.msrb.mxu3 %v6036_v46 }
  0x5e   : > { %1590 = vmatpush.bf16.msra.mxu0 %v6027_v31 }
  0x5f   : > { %1644 = vmatpush.bf16.msrb.mxu1 %v6031_v52  ;;  %v5118_v52 = vor.u32 %v6082_v37, %v5117_v35  ;;  %v6046_v35 = vld [vmem:[%s8312_s6 + $0x18] sm:$0xff] }
  0x60   : > { %1576 = vmatpush.bf16.msra.mxu2 %v6019_v18  ;;  %v6154_v37 = vld [vmem:[%s8315_s9 + $0x74] sm:$0xf0] }
  0x61   : > { %4741 = vmatmul.msk.bf16.vlgmr.msra.gmra.mxu0 %vm692_vm3, %v1492_v39  ;;  %1699 = vmatpush.bf16.msrb.mxu3 %v6035_v51  ;;  %v4972_v39 = vor.u32 %v6094_v38, %v4971_v36  ;;  %v6047_v36 = vld [vmem:[%s8312_s6 + $0x20] sm:$0xff]  ;;  %v6065_v38 = vld [vmem:[%s8312_s6 + $0xb0] sm:$0xff] }
  0x62   : > { %1751 = vmatpush.bf16.msrb.mxu0 %v6042_v42 }
  0x63   : > { %1577 = vmatmul.bf16.vlgmr.msra.gmra.mxu2 %v1489_v27 }
  0x66   : > { %1752 = vmatpush.bf16.msrb.mxu0 %v6041_v45 }
  0x6a   : > { %1753 = vmatpush.bf16.msrb.mxu0 %v6040_v48 }
  0x6e   : > { %1754 = vmatpush.bf16.msrb.mxu0 %v6039_v53  ;;  %v5109_v53 = vld [vmem:[%s8314_s8 + $0x60] sm:$0xf] }
  0x72   : > { %2249 = vmatpush.bf16.msra.mxu0 %v5020_v62  ;;  %v5085_v62 = vld [vmem:[%s8314_s8 + $0x30] sm:$0xf] }
  0x76   : > { %2250 = vmatpush.bf16.msra.mxu0 %v5012_v5  ;;  %v6070_v5 = vld [vmem:[%s8314_s8 + $0x14] sm:$0xf0] }
  0x7a   : > { %2251 = vmatpush.bf16.msra.mxu0 %v5004_v13  ;;  %v6068_v13 = vld [vmem:[%s8314_s8 + $0x4] sm:$0xf0] }
  0x7e   : > { %2252 = vmatpush.bf16.msra.mxu0 %v4996_v23 }
  0x82   : > { %2253 = vmatpush.bf16.msra.mxu0 %v4988_v28  ;;  %v6048_v28 = vld [vmem:[%s8312_s6 + $0x28] sm:$0xff] }
  0x86   : > { %2254 = vmatpush.bf16.msra.mxu0 %v4980_v33  ;;  %v6058_v33 = vld [vmem:[%s8312_s6 + $0x78] sm:$0xff] }
  0x87   : > { %1864 = vmatpush.bf16.msra.mxu1 %v6058_v33  ;;  %v6099_v33 = vld [vmem:[%s8314_s8 + $0x104] sm:$0xf] }
  0x8a   : > { %2255 = vmatpush.bf16.msra.mxu0 %v4972_v39 }
  0xa7   : > { %v987_v40 = vpop.f32.mrf.mxu3  ;;  %v884_v43 = vpop.f32.mrf.mxu1 }
  0xae   : > { %v870_v50 = vpop.f32.mrf.mxu0 }
  0xaf   : > { %v989_v49 = vpop.f32.mrf.mxu3  ;;  %v886_v54 = vpop.f32.mrf.mxu1  ;;  %v885_v56 = vadd.f32 %v884_v43, %v870_v50 }
  0xb6   : > { %v973_v55 = vpop.f32.mrf.mxu2  ;;  %v872_v0 = vpop.f32.mrf.mxu0 }
  0xb7   : > { %v974_v57 = vadd.f32 %v973_v55, %v885_v56  ;;  %v1135_v58 = vpop.f32.mrf.mxu3  ;;  %v887_v9 = vadd.f32 %v886_v54, %v872_v0  ;;  %v6080_v54 = vld [vmem:[%s8314_s8 + $0x64] sm:$0xf0]  ;;  %v5101_v56 = vld [vmem:[%s8314_s8 + $0x50] sm:$0xf]  ;;  %v5077_v0 = vld [vmem:[%s8314_s8 + $0x20] sm:$0xf] }
  0xb8   : > { %v5110_v55 = vor.u32 %v6080_v54, %v5109_v53  ;;  %v6056_v53 = vld [vmem:[%s8312_s6 + $0x68] sm:$0xff] }
  0xb9   : > { %v988_v2 = vadd.f32 %v987_v40, %v974_v57  ;;  %v4963_v40 = vld [vmem:[%s8314_s8 + $0xc0] sm:$0xf]  ;;  %v6078_v57 = vld [vmem:[%s8314_s8 + $0x54] sm:$0xf0] }
  0xba   : > { %v4964_v50 = vor.u32 %v6092_v41, %v4963_v40  ;;  %v5102_v59 = vor.u32 %v6078_v57, %v5101_v56  ;;  %v5247_v40 = vld [vmem:[%s8314_s8 + $0x200] sm:$0xf]  ;;  %v6132_v41 = vld [vmem:[%s8314_s8 + $0x204] sm:$0xf0] }
  0xbb   : > { %v6064_v56 = vld [vmem:[%s8312_s6 + $0xa8] sm:$0xff]  ;;  %v5313_v57 = vld [vmem:[%s8315_s9 + $0x40] sm:$0xf] }
  0xbc   : > { %2256 = vmatpush.bf16.msra.mxu0 %v4964_v50  ;;  %v6150_v50 = vld [vmem:[%s8315_s9 + $0x54] sm:$0xf0] }
  0xbe   : > { %v975_v6 = vpop.f32.mrf.mxu2 }
  0xbf   : > { %v1121_v1 = vpop.f32.mrf.mxu1  ;;  %v976_v12 = vadd.f32 %v975_v6, %v887_v9  ;;  %v1137_v18 = vpop.f32.mrf.mxu3  ;;  %v2068_v6 = vld [vmem:[#allocation2] sm:$0xfe] }
  0xc0   : > { %v1136_v3 = vadd.f32 %v1135_v58, %v1121_v1  ;;  %v5093_v58 = vld [vmem:[%s8314_s8 + $0x40] sm:$0xf]  ;;  %v5086_v1 = vor.u32 %v6074_v63, %v5085_v62  ;;  %v2072_v9 = vpack.c.bf16 %v6525_v34, %v2068_v6  ;;  %v6105_v63 = vld [vmem:[%s8314_s8 + $0x134] sm:$0xf]  ;;  %v6054_v6 = vld [vmem:[%s8312_s6 + $0x58] sm:$0xff] }
  0xc1   : > { %v990_v21 = vadd.f32 %v989_v49, %v976_v12  ;;  %v5094_v61 = vor.u32 %v6076_v60, %v5093_v58  ;;  %v2074_v12 = vpack.c.bf16 %v2070_v8, %v2070_v8  ;;  %v6148_v58 = vld [vmem:[%s8315_s9 + $0x44] sm:$0xf0]  ;;  %v6043_v60 = vld [vmem:[%s8312_s6] sm:$0xff] }
  0xc2   : > { %v1140_v10 = vadd.f32 %v1136_v3, %v988_v2  ;;  %v6072_v2 = vld [vmem:[%s8314_s8 + $0x24] sm:$0xf0]  ;;  %v2102_v14 = vshrl.u32 %v2072_v9, 16  ;;  %v2104_v16 = vshll.u32 %v2072_v9, 16  ;;  %v6055_v62 = vld [vmem:[%s8312_s6 + $0x60] sm:$0xff] }
  0xc3   : > { %v5078_v3 = vor.u32 %v6072_v2, %v5077_v0  ;;  %v5021_v0 = vld [vmem:[%s8314_s8 + $0x138] sm:$0xf0]  ;;  %v5305_v2 = vld [vmem:[%s8315_s9 + $0x30] sm:$0xf]  ;;  %v6103_v8 = vld [vmem:[%s8314_s8 + $0x124] sm:$0xf] }
  0xc4   : > { %v1146_v11 = vadd.f32 %v6304_v4, %v1140_v10  ;;  %v6050_v10 = vld [vmem:[%s8312_s6 + $0x38] sm:$0xff]  ;;  %v2106_v34 = vrot.slane %v2104_v16, 1  ;;  %v5013_v9 = vld [vmem:[%s8314_s8 + $0x128] sm:$0xf0]  ;;  %v6053_v16 = vld [vmem:[%s8312_s6 + $0x50] sm:$0xff] }
  0xc5   : > { %1926 = vmatpush.bf16.msrb.mxu2 %v6050_v10  ;;  %v5016_v10 = vor.u32 %v6103_v8, %v5013_v9 }
  0xc6   : > { %v1148_v17 = vmax.f32 %v1146_v11, 0.0  ;;  %v5061_v11 = vld [vmem:[%s8314_s8] sm:$0xf] }
  0xc7   : > { %v1123_v19 = vpop.f32.mrf.mxu1 }
  0xc8   : > { %v1150_v20 = vmin.f32 %v1148_v17, 6.0  ;;  %v1138_v22 = vadd.f32 %v1137_v18, %v1123_v19  ;;  %v5062_v17 = vor.u32 %v6068_v13, %v5061_v11  ;;  %v2109_v18 = vshll.u32 %v2074_v12, 16  ;;  %v5271_v19 = vld [vmem:[%s8314_s8 + $0x230] sm:$0xf]  ;;  %v5297_v11 = vld [vmem:[%s8315_s9 + $0x20] sm:$0xf] }
  0xc9   : > { %1927 = vmatpush.bf16.msrb.mxu2 %v6049_v24  ;;  %v6144_v12 = vld [vmem:[%s8315_s9 + $0x24] sm:$0xf0]  ;;  %v7013_v24 = vld [vmem:[#allocation2 + $0x18] sm:$0xff] }
  0xca   : > { %1154 = vst.msk [vmem:[#allocation3 + $0x1] sm:$0xff] %vm692_vm3, %v1150_v20  ;;  %v1141_v26 = vadd.f32 %v1138_v22, %v990_v21  ;;  %v6138_v20 = vld [vmem:[%s8314_s8 + $0x234] sm:$0xf0]  ;;  %v2111_v21 = vrot.slane %v2109_v18, 1  ;;  %v2107_v22 = vor.u32 %v2106_v34, %v2102_v14  ;;  %v5298_v14 = vor.u32 %v6144_v12, %v5297_v11  ;;  %v6101_v18 = vld [vmem:[%s8314_s8 + $0x114] sm:$0xf] }
  0xcb   : > { %v5272_v23 = vor.u32 %v6138_v20, %v5271_v19  ;;  %v5005_v34 = vld [vmem:[%s8314_s8 + $0x118] sm:$0xf0]  ;;  %v5289_v20 = vld [vmem:[%s8315_s9 + $0x10] sm:$0xf]  ;;  %v6182_v11 = vld [vmem:[%s8315_s9 + $0x154] sm:$0xf0] }
  0xcc   : > { %v1147_v27 = vadd.f32 %v6304_v4, %v1141_v26  ;;  %v5069_v4 = vld [vmem:[%s8314_s8 + $0x10] sm:$0xf]  ;;  %v6136_v26 = vld [vmem:[%s8314_s8 + $0x224] sm:$0xf0]  ;;  %v5008_v19 = vor.u32 %v6101_v18, %v5005_v34  ;;  %v6093_v18 = vld [vmem:[%s8314_s8 + $0xd4] sm:$0xf] }
  0xcd   : > { %v5070_v7 = vor.u32 %v6070_v5, %v5069_v4  ;;  %v5264_v29 = vor.u32 %v6136_v26, %v5263_v25  ;;  %1928 = vmatpush.bf16.msrb.mxu2 %v6048_v28  ;;  %v6971_v4 = vpop.f32.mrf.mxu2  ;;  %v2485_v25 = vld [vmem:[#allocation2 + $0x8] sm:$0xfc]  ;;  %v2487_v26 = vld [vmem:[#allocation2 + $0x28] sm:$0x3]  ;;  %v4973_v34 = vld [vmem:[%s8314_s8 + $0xd8] sm:$0xf0] }
  0xce   : > { %v1149_v31 = vmax.f32 %v1147_v27, 0.0  ;;  %v6875_v27 = vsel %vm760_vm5, %v2107_v22, %v2111_v21  ;;  %v6936_v54 = vpop.f32.mrf.mxu0  ;;  %v6142_v21 = vld [vmem:[%s8315_s9 + $0x14] sm:$0xf0]  ;;  %v2489_v28 = vpack.c.bf16 %v7013_v24, %v2485_v25 }
  0xcf   : > { %v7011_v22 = vpop.f32.mrf.mxu1 }
  0xd0   : > { %v1151_v32 = vmin.f32 %v1149_v31, 6.0  ;;  %v6134_v31 = vld [vmem:[%s8314_s8 + $0x214] sm:$0xf0] }
  0xd1   : > { %v1599_v42 = vld [vmem:[#allocation3] sm:$0xff]  ;;  %v5256_v39 = vor.u32 %v6134_v31, %v5255_v30  ;;  %1929 = vmatpush.bf16.msrb.mxu2 %v6047_v36  ;;  %v6052_v30 = vld [vmem:[%s8312_s6 + $0x48] sm:$0xff] }
  0xd2   : > { %1155 = vst.msk [vmem:[#allocation3 + $0x9] sm:$0xff] %vm692_vm3, %v1151_v32  ;;  %v1653_v43 = vld [vmem:[#allocation3 + $0x1] sm:$0xff]  ;;  %v4997_v36 = vld [vmem:[%s8314_s8 + $0x108] sm:$0xf0] }
  0xd3   : > { %v6066_v32 = vld [vmem:[%s8312_s6 + $0xb8] sm:$0xff] }
  0xd4   : > { %2008 = vmatpush.bf16.msra.mxu3 %v6066_v32  ;;  %v6060_v32 = vld [vmem:[%s8312_s6 + $0x88] sm:$0xff] }
  0xd5   : > { %1930 = vmatpush.bf16.msrb.mxu2 %v6046_v35  ;;  %v7019_v31 = vpop.f32.mrf.mxu2  ;;  %v6140_v35 = vld [vmem:[%s8315_s9 + $0x4] sm:$0xf0] }
  0xd6   : > { %v6991_v13 = vpop.f32.mrf.mxu0 }
  0xd7   : > { %v1345_v25 = vadd.f32 %v7019_v31, %v6991_v13  ;;  %v5027_v13 = vld [vmem:[%s8314_s8 + $0x140] sm:$0xf]  ;;  %v6108_v31 = vld [vmem:[%s8314_s8 + $0x144] sm:$0xf0] }
  0xd8   : > { %2009 = vmatpush.bf16.msra.mxu3 %v6065_v38  ;;  %v5000_v38 = vor.u32 %v6099_v33, %v4997_v36 }
  0xd9   : > { %v1600_v44 = vld [vmem:[#allocation3 + $0x8] sm:$0xff] }
  0xda   : > { %v1654_v45 = vld [vmem:[#allocation3 + $0x9] sm:$0xff]  ;;  %v1601_v47 = vpack.c.bf16 %v1600_v44, %v1599_v42  ;;  %v5248_v42 = vor.u32 %v6132_v41, %v5247_v40  ;;  %v6045_v44 = vld [vmem:[%s8312_s6 + $0x10] sm:$0xff] }
  0xdb   : > { %v1708_v46 = vld [vmem:[#allocation3 + $0x2] sm:$0xff]  ;;  %v1655_v48 = vpack.c.bf16 %v1654_v45, %v1653_v43  ;;  %v1709_v49 = vld [vmem:[#allocation3 + $0xa] sm:$0xff]  ;;  %1931 = vmatpush.bf16.msrb.mxu2 %v6045_v44 }
  0xdc   : > { %v1710_v51 = vpack.c.bf16 %v1709_v49, %v1708_v46  ;;  %4758 = vmatmul.msk.bf16.vlgmr.msrb.gmra.mxu1 %vm692_vm3, %v1601_v47  ;;  %v5337_v43 = vld [vmem:[%s8315_s9 + $0x70] sm:$0xf]  ;;  %v5329_v46 = vld [vmem:[%s8315_s9 + $0x60] sm:$0xf]  ;;  %v6152_v47 = vld [vmem:[%s8315_s9 + $0x64] sm:$0xf0]  ;;  %2010 = vmatpush.bf16.msra.mxu3 %v6064_v56 }
  0xdd   : > { %4783 = vmatmul.msk.bf16.vlgmr.msrb.gmra.mxu3 %vm692_vm3, %v1655_v48  ;;  %v5338_v45 = vor.u32 %v6154_v37, %v5337_v43  ;;  %v5330_v48 = vor.u32 %v6152_v47, %v5329_v46  ;;  %v5321_v49 = vld [vmem:[%s8315_s9 + $0x50] sm:$0xf]  ;;  %v5281_v41 = vld [vmem:[%s8315_s9] sm:$0xf]  ;;  %v6186_v37 = vld [vmem:[%s8315_s9 + $0x174] sm:$0xf0] }
  0xde   : > { %4808 = vmatmul.msk.bf16.vlgmr.msrb.gmra.mxu0 %vm692_vm3, %v1710_v51  ;;  %v5322_v51 = vor.u32 %v6150_v50, %v5321_v49  ;;  %v5497_v43 = vld [vmem:[%s8315_s9 + $0x170] sm:$0xf]  ;;  %v6051_v44 = vld [vmem:[%s8312_s6 + $0x40] sm:$0xff]  ;;  %v1431_v49 = vpop.f32.mrf.mxu3  ;;  %v1592_v50 = vpop.f32.mrf.mxu0 }
  0xdf   : > { %2428 = vmatpush.bf16.msrb.mxu0 %v5118_v52  ;;  %v6057_v52 = vld [vmem:[%s8312_s6 + $0x70] sm:$0xff]  ;;  %v5498_v46 = vor.u32 %v6186_v37, %v5497_v43  ;;  %v5029_v43 = vld [vmem:[%s8314_s8 + $0x148] sm:$0xf0] }
  0xe0   : > { %1865 = vmatpush.bf16.msra.mxu1 %v6057_v52  ;;  %v5051_v47 = vld [vmem:[%s8314_s8 + $0x170] sm:$0xf]  ;;  %v6097_v52 = vld [vmem:[%s8314_s8 + $0xf4] sm:$0xf] }
  0xe3   : > { %2429 = vmatpush.bf16.msrb.mxu0 %v5110_v55  ;;  %v6044_v55 = vld [vmem:[%s8312_s6 + $0x8] sm:$0xff] }
  0xe4   : > { %1866 = vmatpush.bf16.msra.mxu1 %v6056_v53  ;;  %1932 = vmatpush.bf16.msrb.mxu2 %v6044_v55  ;;  %v4989_v53 = vld [vmem:[%s8314_s8 + $0xf8] sm:$0xf0] }
  0xe5   : > { %v4992_v56 = vor.u32 %v6097_v52, %v4989_v53 }
  0xe6   : > { %v1578_v8 = vpop.f32.mrf.mxu2 }
  0xe7   : > { %2430 = vmatpush.bf16.msrb.mxu0 %v5102_v59  ;;  %v5314_v59 = vor.u32 %v6148_v58, %v5313_v57  ;;  %v6113_v57 = vld [vmem:[%s8314_s8 + $0x174] sm:$0xf]  ;;  %v5053_v58 = vld [vmem:[%s8314_s8 + $0x178] sm:$0xf0]  ;;  %v1593_v36 = vadd.f32 %v1592_v50, %v1578_v8 }
  0xe8   : > { %1867 = vmatpush.bf16.msra.mxu1 %v6055_v62  ;;  %1933 = vmatpush.bf16.msrb.mxu2 %v6043_v60  ;;  %v5489_v60 = vld [vmem:[%s8315_s9 + $0x160] sm:$0xf] }
  0xe9   : > { %v5043_v62 = vld [vmem:[%s8314_s8 + $0x160] sm:$0xf] }
  0xeb   : > { %2431 = vmatpush.bf16.msrb.mxu0 %v5094_v61  ;;  %v6063_v61 = vld [vmem:[%s8312_s6 + $0xa0] sm:$0xff] }
  0xec   : > { %2011 = vmatpush.bf16.msra.mxu3 %v6063_v61  ;;  %1868 = vmatpush.bf16.msra.mxu1 %v6054_v6  ;;  %v6184_v61 = vld [vmem:[%s8315_s9 + $0x164] sm:$0xf0] }
  0xee   : > { %2257 = vmatmul.bf16.vlgmr.msra.gmra.mxu0 %v6875_v27 }
  0xef   : > { %2432 = vmatpush.bf16.msrb.mxu0 %v5086_v1  ;;  %v5024_v1 = vor.u32 %v6105_v63, %v5021_v0  ;;  %v1343_v63 = vadd.f32 %v6971_v4, %v6936_v54  ;;  %v5490_v0 = vor.u32 %v6184_v61, %v5489_v60  ;;  %v6111_v54 = vld [vmem:[%s8314_s8 + $0x164] sm:$0xf]  ;;  %v6176_v60 = vld [vmem:[%s8315_s9 + $0x124] sm:$0xf0] }
  0xf0   : > { %1869 = vmatpush.bf16.msra.mxu1 %v6053_v16  ;;  %v5035_v16 = vld [vmem:[%s8314_s8 + $0x150] sm:$0xf] }
  0xf1   : > { %2277 = vmatpush.bf16.msra.mxu2 %v5024_v1  ;;  %v6112_v1 = vld [vmem:[%s8314_s8 + $0x164] sm:$0xf0]  ;;  %v1432_v12 = vadd.f32 %v1431_v49, %v1343_v63  ;;  %v1580_v49 = vpop.f32.mrf.mxu2 }
  0xf2   : > { %v5044_v4 = vor.u32 %v6112_v1, %v5043_v62 }
  0xf3   : > { %2433 = vmatpush.bf16.msrb.mxu0 %v5078_v3  ;;  %v6146_v3 = vld [vmem:[%s8315_s9 + $0x34] sm:$0xf0]  ;;  %v1446_v33 = vadd.f32 %v7011_v22, %v1432_v12  ;;  %v4965_v22 = vld [vmem:[%s8314_s8 + $0xc8] sm:$0xf0] }
  0xf4   : > { %v5306_v5 = vor.u32 %v6146_v3, %v5305_v2  ;;  %1870 = vmatpush.bf16.msra.mxu1 %v6052_v30  ;;  %v7085_v2 = vpop.f32.mrf.mxu1  ;;  %v6095_v3 = vld [vmem:[%s8314_s8 + $0xe4] sm:$0xf]  ;;  %v5473_v30 = vld [vmem:[%s8315_s9 + $0x140] sm:$0xf] }
  0xf5   : > { %2278 = vmatpush.bf16.msra.mxu2 %v5016_v10  ;;  %v5481_v10 = vld [vmem:[%s8315_s9 + $0x150] sm:$0xf] }
  0xf7   : > { %2434 = vmatpush.bf16.msrb.mxu0 %v5070_v7  ;;  %v6062_v7 = vld [vmem:[%s8312_s6 + $0x98] sm:$0xff] }
  0xf8   : > { %2012 = vmatpush.bf16.msra.mxu3 %v6062_v7  ;;  %1871 = vmatpush.bf16.msra.mxu1 %v6051_v44  ;;  %v5045_v7 = vld [vmem:[%s8314_s8 + $0x168] sm:$0xf0] }
  0xf9   : > { %2279 = vmatpush.bf16.msra.mxu2 %v5008_v19  ;;  %v5048_v9 = vor.u32 %v6111_v54, %v5045_v7  ;;  %v6109_v19 = vld [vmem:[%s8314_s8 + $0x154] sm:$0xf] }
  0xfb   : > { %2435 = vmatpush.bf16.msrb.mxu0 %v5062_v17  ;;  %v6061_v17 = vld [vmem:[%s8312_s6 + $0x90] sm:$0xff] }
  0xfc   : > { %2013 = vmatpush.bf16.msra.mxu3 %v6061_v17  ;;  %v6110_v17 = vld [vmem:[%s8314_s8 + $0x154] sm:$0xf0] }
  0xfd   : > { %2280 = vmatpush.bf16.msra.mxu2 %v5000_v38 }
  0xfe   : > { %2436 = vmatmul.bf16.vlgmr.msrb.gmra.mxu0 %v6586_v15 }
  0xff   : > { %2669 = vmatpush.bf16.msra.mxu0 %v5272_v23  ;;  %v5290_v23 = vor.u32 %v6142_v21, %v5289_v20  ;;  %v5036_v20 = vor.u32 %v6110_v17, %v5035_v16  ;;  %v4976_v21 = vor.u32 %v6093_v18, %v4973_v34  ;;  %v5149_v17 = vld [vmem:[%s8314_s8 + $0xb0] sm:$0xf]  ;;  %v6090_v34 = vld [vmem:[%s8314_s8 + $0xb4] sm:$0xf0] }
 0x100   : > { %2014 = vmatpush.bf16.msra.mxu3 %v6060_v32  ;;  %v6180_v32 = vld [vmem:[%s8315_s9 + $0x144] sm:$0xf0] }
 0x101   : > { %2281 = vmatpush.bf16.msra.mxu2 %v4992_v56  ;;  %v5474_v38 = vor.u32 %v6180_v32, %v5473_v30  ;;  %v6081_v30 = vld [vmem:[%s8314_s8 + $0x74] sm:$0xf]  ;;  %v5119_v32 = vld [vmem:[%s8314_s8 + $0x78] sm:$0xf0] }
 0x103   : > { %2670 = vmatpush.bf16.msra.mxu0 %v5264_v29  ;;  %v2491_v29 = vpack.c.bf16 %v2487_v26, %v2487_v26  ;;  %v1433_v26 = vpop.f32.mrf.mxu3 }
 0x104   : > { %v1434_v44 = vadd.f32 %v1433_v26, %v1345_v25 }
 0x105   : > { %v2525_v40 = vrot.slane %v2491_v29, 1 }
 0x107   : > { %2671 = vmatpush.bf16.msra.mxu0 %v5256_v39  ;;  %v2524_v39 = vrot.slane %v2489_v28, 1  ;;  %v1594_v28 = vpop.f32.mrf.mxu0 }
 0x108   : > { %v1595_v56 = vadd.f32 %v1594_v28, %v1580_v49  ;;  %v6088_v28 = vld [vmem:[%s8314_s8 + $0xa4] sm:$0xf0] }
 0x10b   : > { %2672 = vmatpush.bf16.msra.mxu0 %v5248_v42  ;;  %v5282_v42 = vor.u32 %v6140_v35, %v5281_v41  ;;  %v6107_v41 = vld [vmem:[%s8314_s8 + $0x144] sm:$0xf]  ;;  %v5028_v35 = vor.u32 %v6108_v31, %v5027_v13  ;;  %v5239_v13 = vld [vmem:[%s8314_s8 + $0x1f0] sm:$0xf]  ;;  %v6130_v31 = vld [vmem:[%s8314_s8 + $0x1f4] sm:$0xf0] }
 0x10c   : > { %v5032_v37 = vor.u32 %v6107_v41, %v5029_v43  ;;  %v5122_v41 = vor.u32 %v6081_v30, %v5119_v32 }
 0x10f   : > { %2810 = vmatpush.bf16.msrb.mxu0 %v5338_v45  ;;  %v7046_v45 = vsel %vm1029_vm6, %v2524_v39, %v2525_v40  ;;  %v6091_v40 = vld [vmem:[%s8314_s8 + $0xc4] sm:$0xf] }
 0x110   : > { %5277 = vmatmul.msk.bf16.vlgmr.msra.gmra.mxu0 %vm692_vm3, %v7046_v45 }
 0x113   : > { %2811 = vmatpush.bf16.msrb.mxu0 %v5330_v48  ;;  %v6114_v48 = vld [vmem:[%s8314_s8 + $0x174] sm:$0xf0] }
 0x114   : > { %v5052_v55 = vor.u32 %v6114_v48, %v5051_v47  ;;  %v5465_v47 = vld [vmem:[%s8315_s9 + $0x130] sm:$0xf]  ;;  %v6178_v48 = vld [vmem:[%s8315_s9 + $0x134] sm:$0xf0] }
 0x115   : > { %v5466_v50 = vor.u32 %v6178_v48, %v5465_v47 }
 0x116   : > { %2267 = vmatpush.bf16.msrb.mxu1 %v5052_v55  ;;  %v1448_v55 = vadd.f32 %v7085_v2, %v1434_v44  ;;  %v5449_v2 = vld [vmem:[%s8315_s9 + $0x110] sm:$0xf]  ;;  %v5240_v44 = vor.u32 %v6130_v31, %v5239_v13  ;;  %v6120_v13 = vld [vmem:[%s8314_s8 + $0x1a4] sm:$0xf0] }
 0x117   : > { %2812 = vmatpush.bf16.msrb.mxu0 %v5322_v51  ;;  %v6059_v51 = vld [vmem:[%s8312_s6 + $0x80] sm:$0xff] }
 0x118   : > { %2015 = vmatpush.bf16.msra.mxu3 %v6059_v51  ;;  %v1598_v1 = vadd.f32 %v1595_v56, %v1448_v55  ;;  %v5125_v56 = vld [vmem:[%s8314_s8 + $0x80] sm:$0xf] }
 0x11a   : > { %2268 = vmatpush.bf16.msrb.mxu1 %v5044_v4 }
 0x11b   : > { %2813 = vmatpush.bf16.msrb.mxu0 %v5314_v59  ;;  %v5056_v59 = vor.u32 %v6113_v57, %v5053_v58  ;;  %v6305_v58 = vld [vmem:[%s8344_s30] ss:$0 sm:$0xff]  ;;  %s6323_s30 = smov 120  }
 0x11d   : > { %2295 = vmatpush.bf16.msrb.mxu3 %v5056_v59  ;;  %v5457_v59 = vld [vmem:[%s8315_s9 + $0x120] sm:$0xf] }
 0x11e   : > { %2269 = vmatpush.bf16.msrb.mxu1 %v5036_v20  ;;  %v5458_v61 = vor.u32 %v6176_v60, %v5457_v59  ;;  %v6077_v60 = vld [vmem:[%s8314_s8 + $0x54] sm:$0xf] }
 0x11f   : > { %2814 = vmatpush.bf16.msrb.mxu0 %v5306_v5  ;;  %v4981_v5 = vld [vmem:[%s8314_s8 + $0xe8] sm:$0xf0] }
 0x120   : > { %v4984_v6 = vor.u32 %v6095_v3, %v4981_v5  ;;  %v6174_v3 = vld [vmem:[%s8315_s9 + $0x114] sm:$0xf0] }
 0x121   : > { %2296 = vmatpush.bf16.msrb.mxu3 %v5048_v9  ;;  %v5450_v5 = vor.u32 %v6174_v3, %v5449_v2  ;;  %v5441_v9 = vld [vmem:[%s8315_s9 + $0x100] sm:$0xf]  ;;  %v6089_v3 = vld [vmem:[%s8314_s8 + $0xb4] sm:$0xf] }
 0x122   : > { %2282 = vmatpush.bf16.msra.mxu2 %v4984_v6  ;;  %2270 = vmatpush.bf16.msrb.mxu1 %v5028_v35  ;;  %v6079_v35 = vld [vmem:[%s8314_s8 + $0x64] sm:$0xf] }
 0x123   : > { %2815 = vmatpush.bf16.msrb.mxu0 %v5298_v14  ;;  %v5482_v14 = vor.u32 %v6182_v11, %v5481_v10  ;;  %v6172_v10 = vld [vmem:[%s8315_s9 + $0x104] sm:$0xf0] }
 0x124   : > { %v5442_v12 = vor.u32 %v6172_v10, %v5441_v9  ;;  %v5095_v9 = vld [vmem:[%s8314_s8 + $0x48] sm:$0xf0]  ;;  %v5215_v10 = vld [vmem:[%s8314_s8 + $0x1c0] sm:$0xf] }
 0x126   : > { %2283 = vmatpush.bf16.msra.mxu2 %v4976_v21  ;;  %v5150_v21 = vor.u32 %v6090_v34, %v5149_v17  ;;  %v6073_v34 = vld [vmem:[%s8314_s8 + $0x34] sm:$0xf] }
 0x127   : > { %2816 = vmatpush.bf16.msrb.mxu0 %v5290_v23  ;;  %v5037_v23 = vld [vmem:[%s8314_s8 + $0x158] sm:$0xf0] }
 0x128   : > { %v5040_v29 = vor.u32 %v6109_v19, %v5037_v23  ;;  %v2069_v19 = vld [vmem:[#allocation2 + $0x8] sm:$0xfe]  ;;  %v5141_v23 = vld [vmem:[%s8314_s8 + $0xa0] sm:$0xf] }
 0x129   : > { %v2073_v25 = vpack.c.bf16 %v7013_v24, %v2069_v19  ;;  %v5087_v19 = vld [vmem:[%s8314_s8 + $0x38] sm:$0xf0] }
 0x12a   : > { %2297 = vmatpush.bf16.msrb.mxu3 %v5040_v29  ;;  %v2071_v29 = vld [vmem:[#allocation2 + $0x28] sm:$0x1]  ;;  %v5090_v30 = vor.u32 %v6073_v34, %v5087_v19  ;;  %v5225_v34 = vld [vmem:[%s8314_s8 + $0x1d8] sm:$0xf0] }
 0x12b   : > { %2817 = vmatpush.bf16.msrb.mxu0 %v5282_v42  ;;  %v4968_v42 = vor.u32 %v6091_v40, %v4965_v22  ;;  %v6086_v40 = vld [vmem:[%s8314_s8 + $0x94] sm:$0xf0] }
 0x12d   : > { %2284 = vmatpush.bf16.msra.mxu2 %v4968_v42 }
 0x12e   : > { %2298 = vmatpush.bf16.msrb.mxu3 %v5032_v37 }
 0x12f   : > { %3074 = vmatpush.bf16.msra.mxu0 %v5498_v46  ;;  %v1597_v46 = vadd.f32 %v1593_v36, %v1446_v33  ;;  %v5142_v33 = vor.u32 %v6088_v28, %v5141_v23  ;;  %v2075_v36 = vpack.c.bf16 %v2071_v29, %v2071_v29  ;;  %v6122_v23 = vld [vmem:[%s8314_s8 + $0x1b4] sm:$0xf0]  ;;  %v6085_v28 = vld [vmem:[%s8314_s8 + $0x94] sm:$0xf]  ;;  %v5135_v29 = vld [vmem:[%s8314_s8 + $0x98] sm:$0xf0] }
 0x130   : > { %v5138_v31 = vor.u32 %v6085_v28, %v5135_v29  ;;  %v5257_v28 = vld [vmem:[%s8314_s8 + $0x218] sm:$0xf0]  ;;  %v6149_v29 = vld [vmem:[%s8315_s9 + $0x54] sm:$0xf] }
 0x131   : > { %v2121_v48 = vshll.u32 %v2075_v36, 16  ;;  %v5079_v36 = vld [vmem:[%s8314_s8 + $0x28] sm:$0xf0] }
 0x133   : > { %3075 = vmatpush.bf16.msra.mxu0 %v5490_v0 }
 0x137   : > { %3076 = vmatpush.bf16.msra.mxu0 %v5482_v14 }
 0x13b   : > { %3077 = vmatpush.bf16.msra.mxu0 %v5474_v38  ;;  %v2116_v38 = vshll.u32 %v2073_v25, 16 }
 0x13d   : > { %v2118_v47 = vrot.slane %v2116_v38, 1  ;;  %v5199_v38 = vld [vmem:[%s8314_s8 + $0x1a0] sm:$0xf] }
 0x13f   : > { %3078 = vmatpush.bf16.msra.mxu0 %v5466_v50 }
 0x143   : > { %3079 = vmatpush.bf16.msra.mxu0 %v5458_v61 }
 0x147   : > { %3080 = vmatpush.bf16.msra.mxu0 %v5450_v5  ;;  %v5151_v5 = vld [vmem:[%s8314_s8 + $0xb8] sm:$0xf0] }
 0x14b   : > { %3081 = vmatpush.bf16.msra.mxu0 %v5442_v12  ;;  %v5154_v12 = vor.u32 %v6089_v3, %v5151_v5  ;;  %v6127_v3 = vld [vmem:[%s8314_s8 + $0x1e4] sm:$0xf]  ;;  %v5233_v5 = vld [vmem:[%s8314_s8 + $0x1e8] sm:$0xf0] }
 0x159   : > { %v1646_v39 = vpop.f32.mrf.mxu1 }
 0x15a   : > { %v1651_v51 = vadd.f32 %v1646_v39, %v1597_v46  ;;  %v5133_v39 = vld [vmem:[%s8314_s8 + $0x90] sm:$0xf]  ;;  %v2114_v46 = vshrl.u32 %v2073_v25, 16 }
 0x15b   : > { %v1756_v52 = vpop.f32.mrf.mxu0  ;;  %v5134_v55 = vor.u32 %v6086_v40, %v5133_v39  ;;  %v6083_v39 = vld [vmem:[%s8314_s8 + $0x84] sm:$0xf]  ;;  %v5127_v40 = vld [vmem:[%s8314_s8 + $0x88] sm:$0xf0] }
 0x15c   : > { %v2119_v61 = vor.u32 %v2118_v47, %v2114_v46  ;;  %v2484_v46 = vld [vmem:[#allocation2] sm:$0xfc]  ;;  %v2486_v47 = vld [vmem:[#allocation2 + $0x20] sm:$0x3] }
 0x160   : > { %v1701_v53 = vpop.f32.mrf.mxu3 }
 0x161   : > { %v1706_v57 = vadd.f32 %v1701_v53, %v1651_v51  ;;  %v1648_v63 = vpop.f32.mrf.mxu1  ;;  %v5111_v51 = vld [vmem:[%s8314_s8 + $0x68] sm:$0xf0]  ;;  %v6128_v53 = vld [vmem:[%s8314_s8 + $0x1e4] sm:$0xf0] }
 0x162   : > { %v1652_v4 = vadd.f32 %v1648_v63, %v1598_v1  ;;  %v5103_v63 = vld [vmem:[%s8314_s8 + $0x58] sm:$0xf0]  ;;  %v6126_v1 = vld [vmem:[%s8314_s8 + $0x1d4] sm:$0xf0] }
 0x163   : > { %v1761_v62 = vadd.f32 %v1756_v52, %v1706_v57  ;;  %v1758_v11 = vpop.f32.mrf.mxu0  ;;  %v5231_v52 = vld [vmem:[%s8314_s8 + $0x1e0] sm:$0xf]  ;;  %v6084_v57 = vld [vmem:[%s8314_s8 + $0x84] sm:$0xf0] }
 0x164   : > { %v5232_v59 = vor.u32 %v6128_v53, %v5231_v52  ;;  %v5126_v2 = vor.u32 %v6084_v57, %v5125_v56  ;;  %v6067_v56 = vld [vmem:[%s8314_s8 + $0x4] sm:$0xf]  ;;  %v5063_v57 = vld [vmem:[%s8314_s8 + $0x8] sm:$0xf0] }
 0x165   : > { %v1767_v0 = vadd.f32 %v6305_v58, %v1761_v62  ;;  %v2123_v62 = vrot.slane %v2121_v48, 1  ;;  %v6129_v48 = vld [vmem:[%s8314_s8 + $0x1f4] sm:$0xf] }
 0x167   : > { %v1769_v54 = vmax.f32 %v1767_v0, 0.0  ;;  %v5223_v0 = vld [vmem:[%s8314_s8 + $0x1d0] sm:$0xf] }
 0x168   : > { %v1703_v6 = vpop.f32.mrf.mxu3 }
 0x169   : > { %v7172_v7 = vmin.f32 %v1769_v54, 6.0  ;;  %v1707_v8 = vadd.f32 %v1703_v6, %v1652_v4  ;;  %v5106_v54 = vor.u32 %v6077_v60, %v5103_v63  ;;  %v5224_v4 = vor.u32 %v6126_v1, %v5223_v0  ;;  %v6075_v6 = vld [vmem:[%s8314_s8 + $0x44] sm:$0xf]  ;;  %v5273_v0 = vld [vmem:[%s8314_s8 + $0x238] sm:$0xf0] }
 0x16a   : > { %v5098_v17 = vor.u32 %v6075_v6, %v5095_v9  ;;  %v2490_v60 = vpack.c.bf16 %v2486_v47, %v2486_v47  ;;  %v6153_v1 = vld [vmem:[%s8315_s9 + $0x74] sm:$0xf]  ;;  %v5307_v47 = vld [vmem:[%s8315_s9 + $0x38] sm:$0xf0] }
 0x16b   : > { %1775 = vst [vmem:[#allocation4 + $0x1] sm:$0xff] %v7172_v7  ;;  %v1762_v14 = vadd.f32 %v1758_v11, %v1707_v8  ;;  %v2124_v8 = vsel %vm760_vm5, %v2119_v61, %v2123_v62  ;;  %v6124_v11 = vld [vmem:[%s8314_s8 + $0x1c4] sm:$0xf0]  ;;  %v5183_v61 = vld [vmem:[%s8314_s8 + $0x180] sm:$0xf] }
 0x16c   : > { %v6137_v62 = vld [vmem:[%s8314_s8 + $0x234] sm:$0xf] }
 0x16d   : > { %v1768_v16 = vadd.f32 %v6305_v58, %v1762_v14  ;;  %v5114_v58 = vor.u32 %v6079_v35, %v5111_v51  ;;  %v6087_v14 = vld [vmem:[%s8314_s8 + $0xa4] sm:$0xf]  ;;  %v5200_v35 = vor.u32 %v6120_v13, %v5199_v38  ;;  %v5241_v51 = vld [vmem:[%s8314_s8 + $0x1f8] sm:$0xf0]  ;;  %v5276_v9 = vor.u32 %v6137_v62, %v5273_v0  ;;  %v6166_v62 = vld [vmem:[%s8315_s9 + $0xd4] sm:$0xf0] }
 0x16e   : > { %v5244_v63 = vor.u32 %v6129_v48, %v5241_v51  ;;  %v6119_v51 = vld [vmem:[%s8314_s8 + $0x1a4] sm:$0xf] }
 0x16f   : > { %v1770_v18 = vmax.f32 %v1768_v16, 0.0  ;;  %v5143_v16 = vld [vmem:[%s8314_s8 + $0xa8] sm:$0xf0] }
 0x170   : > { %v5146_v25 = vor.u32 %v6087_v14, %v5143_v16  ;;  %v6151_v14 = vld [vmem:[%s8315_s9 + $0x64] sm:$0xf]  ;;  %v5331_v16 = vld [vmem:[%s8315_s9 + $0x68] sm:$0xf0] }
 0x171   : > { %v7187_v20 = vmin.f32 %v1770_v18, 6.0  ;;  %v5216_v18 = vor.u32 %v6124_v11, %v5215_v10  ;;  %v6135_v11 = vld [vmem:[%s8314_s8 + $0x224] sm:$0xf] }
 0x172   : > { %v1777_v22 = vld [vmem:[#allocation4] sm:$0xff] }
 0x173   : > { %1776 = vst [vmem:[#allocation4 + $0x9] sm:$0xff] %v7187_v20  ;;  %v7196_v26 = vpack.c.bf16 %v7187_v20, %v7172_v7 }
 0x175   : > { %1872 = vmatmul.bf16.vlgmr.msra.gmra.mxu1 %v7196_v26 }
 0x176   : > { %2446 = vmatpush.bf16.msra.mxu1 %v5150_v21  ;;  %v5207_v21 = vld [vmem:[%s8314_s8 + $0x1b0] sm:$0xf] }
 0x177   : > { %v5208_v32 = vor.u32 %v6122_v23, %v5207_v21  ;;  %v5334_v23 = vor.u32 %v6151_v14, %v5331_v16  ;;  %v5283_v14 = vld [vmem:[%s8315_s9 + $0x8] sm:$0xf0]  ;;  %v5385_v16 = vld [vmem:[%s8315_s9 + $0xb0] sm:$0xf] }
 0x17a   : > { %v1778_v42 = vld [vmem:[#allocation4 + $0x8] sm:$0xff]  ;;  %2447 = vmatpush.bf16.msra.mxu1 %v5142_v33  ;;  %v6071_v33 = vld [vmem:[%s8314_s8 + $0x24] sm:$0xf] }
 0x17b   : > { %v1940_v43 = vld [vmem:[#allocation4 + $0x2] sm:$0xff]  ;;  %v1941_v37 = vld [vmem:[#allocation4 + $0xa] sm:$0xff]  ;;  %v7223_v49 = vpack.c.bf16 %v1778_v42, %v1777_v22  ;;  %v5071_v42 = vld [vmem:[%s8314_s8 + $0x18] sm:$0xf0] }
 0x17c   : > { %v7225_v50 = vpack.c.bf16 %v1941_v37, %v1940_v43  ;;  %v6069_v22 = vld [vmem:[%s8314_s8 + $0x14] sm:$0xf]  ;;  %v5191_v43 = vld [vmem:[%s8314_s8 + $0x190] sm:$0xf]  ;;  %v2039_v37 = vld [vmem:[#allocation2 + $0x8] sm:$0xff] }
 0x17d   : > { %1934 = vmatmul.bf16.vlgmr.msrb.gmra.mxu2 %v7223_v49  ;;  %2818 = vmatmul.bf16.vlgmr.msrb.gmra.mxu0 %v7223_v49  ;;  %v5074_v52 = vor.u32 %v6069_v22, %v5071_v42  ;;  %v7341_v53 = vpack.c.bf16 %v7013_v24, %v2039_v37  ;;  %v6116_v24 = vld [vmem:[%s8314_s8 + $0x184] sm:$0xf0]  ;;  %v6170_v42 = vld [vmem:[%s8315_s9 + $0xf4] sm:$0xf0] }
 0x17e   : > { %2016 = vmatmul.bf16.vlgmr.msra.gmra.mxu3 %v7225_v50  ;;  %2651 = vmatpush.bf16.msrb.mxu2 %v5240_v44  ;;  %v5130_v44 = vor.u32 %v6083_v39, %v5127_v40  ;;  %v6147_v39 = vld [vmem:[%s8315_s9 + $0x44] sm:$0xf]  ;;  %v5315_v40 = vld [vmem:[%s8315_s9 + $0x48] sm:$0xf0] }
 0x17f   : > { %2456 = vmatpush.bf16.msra.mxu3 %v5122_v41  ;;  %2448 = vmatpush.bf16.msra.mxu1 %v5134_v55  ;;  %v5082_v41 = vor.u32 %v6071_v33, %v5079_v36  ;;  %v6123_v33 = vld [vmem:[%s8314_s8 + $0x1c4] sm:$0xf]  ;;  %v5217_v36 = vld [vmem:[%s8314_s8 + $0x1c8] sm:$0xf0] }
 0x180   : > { %v5220_v22 = vor.u32 %v6123_v33, %v5217_v36  ;;  %v5377_v33 = vld [vmem:[%s8315_s9 + $0xa0] sm:$0xf]  ;;  %v6160_v36 = vld [vmem:[%s8315_s9 + $0xa4] sm:$0xf0] }
 0x182   : > { %2652 = vmatpush.bf16.msrb.mxu2 %v5232_v59 }
 0x183   : > { %2457 = vmatpush.bf16.msra.mxu3 %v5114_v58  ;;  %2449 = vmatpush.bf16.msra.mxu1 %v5126_v2  ;;  %v6311_v58 = vld [vmem:[#allocation2 + $0x10] sm:$0xff]  ;;  %v5339_v2 = vld [vmem:[%s8315_s9 + $0x78] sm:$0xf0] }
 0x184   : > { %v2488_v59 = vpack.c.bf16 %v6311_v58, %v2484_v46  ;;  %v5342_v10 = vor.u32 %v6153_v1, %v5339_v2  ;;  %v6145_v46 = vld [vmem:[%s8315_s9 + $0x34] sm:$0xf] }
 0x185   : > { %5057 = vmatmul.msk.bf16.vlgmr.msrb.gmra.mxu1 %vm692_vm3, %v2124_v8  ;;  %v6141_v2 = vld [vmem:[%s8315_s9 + $0x14] sm:$0xf] }
 0x186   : > { %2653 = vmatpush.bf16.msrb.mxu2 %v5224_v4  ;;  %v5184_v4 = vor.u32 %v6116_v24, %v5183_v61  ;;  %v2521_v6 = vrot.slane %v2488_v59, 1  ;;  %v6143_v59 = vld [vmem:[%s8315_s9 + $0x24] sm:$0xf]  ;;  %v5401_v24 = vld [vmem:[%s8315_s9 + $0xd0] sm:$0xf] }
 0x187   : > { %2458 = vmatpush.bf16.msra.mxu3 %v5106_v54  ;;  %2474 = vmatpush.bf16.msrb.mxu1 %v5154_v12  ;;  %v5066_v54 = vor.u32 %v6067_v56, %v5063_v57  ;;  %v5265_v12 = vld [vmem:[%s8314_s8 + $0x228] sm:$0xf0]  ;;  %v5310_v57 = vor.u32 %v6145_v46, %v5307_v47  ;;  %v5402_v1 = vor.u32 %v6166_v62, %v5401_v24  ;;  %v5361_v47 = vld [vmem:[%s8315_s9 + $0x80] sm:$0xf] }
 0x188   : > { %v5268_v21 = vor.u32 %v6135_v11, %v5265_v12  ;;  %v5201_v56 = vld [vmem:[%s8314_s8 + $0x1a8] sm:$0xf0] }
 0x189   : > { %v5204_v61 = vor.u32 %v6119_v51, %v5201_v56  ;;  %v5475_v51 = vld [vmem:[%s8315_s9 + $0x148] sm:$0xf0]  ;;  %v5387_v56 = vld [vmem:[%s8315_s9 + $0xb8] sm:$0xf0] }
 0x18a   : > { %2654 = vmatpush.bf16.msrb.mxu2 %v5216_v18  ;;  %v6125_v18 = vld [vmem:[%s8314_s8 + $0x1d4] sm:$0xf]  ;;  %v5379_v24 = vld [vmem:[%s8315_s9 + $0xa8] sm:$0xf0] }
 0x18b   : > { %2459 = vmatpush.bf16.msra.mxu3 %v5098_v17  ;;  %2475 = vmatpush.bf16.msrb.mxu1 %v5146_v25  ;;  %v5236_v17 = vor.u32 %v6127_v3, %v5233_v5  ;;  %v6133_v25 = vld [vmem:[%s8314_s8 + $0x214] sm:$0xf]  ;;  %v5291_v3 = vld [vmem:[%s8315_s9 + $0x18] sm:$0xf0] }
 0x18c   : > { %v5260_v38 = vor.u32 %v6133_v25, %v5257_v28  ;;  %v5294_v11 = vor.u32 %v6141_v2, %v5291_v3  ;;  %v6167_v25 = vld [vmem:[%s8315_s9 + $0xe4] sm:$0xf]  ;;  %v5411_v28 = vld [vmem:[%s8315_s9 + $0xe8] sm:$0xf0]  ;;  %v6157_v2 = vld [vmem:[%s8315_s9 + $0x94] sm:$0xf] }
 0x18d   : > { %2285 = vmatmul.bf16.vlgmr.msra.gmra.mxu2 %v6875_v27  ;;  %3082 = vmatmul.bf16.vlgmr.msra.gmra.mxu0 %v7225_v50  ;;  %v6118_v27 = vld [vmem:[%s8314_s8 + $0x194] sm:$0xf0]  ;;  %v5371_v3 = vld [vmem:[%s8315_s9 + $0x98] sm:$0xf0] }
 0x18e   : > { %5058 = vmatmul.msk.bf16.vlgmr.msrb.gmra.mxu3 %vm692_vm3, %v2124_v8  ;;  %2655 = vmatpush.bf16.msrb.mxu2 %v5208_v32  ;;  %v5192_v55 = vor.u32 %v6118_v27, %v5191_v43  ;;  %v2522_v8 = vrot.slane %v2490_v60, 1  ;;  %v5228_v32 = vor.u32 %v6125_v18, %v5225_v34  ;;  %v5209_v43 = vld [vmem:[%s8314_s8 + $0x1b8] sm:$0xf0]  ;;  %v5318_v27 = vor.u32 %v6147_v39, %v5315_v40  ;;  %v5299_v60 = vld [vmem:[%s8315_s9 + $0x28] sm:$0xf0] }
 0x18f   : > { %2460 = vmatpush.bf16.msra.mxu3 %v5090_v30  ;;  %2476 = vmatpush.bf16.msrb.mxu1 %v5138_v31  ;;  %v5323_v30 = vld [vmem:[%s8315_s9 + $0x58] sm:$0xf0]  ;;  %v6131_v31 = vld [vmem:[%s8314_s8 + $0x204] sm:$0xf]  ;;  %v5302_v0 = vor.u32 %v6143_v59, %v5299_v60  ;;  %v6162_v18 = vld [vmem:[%s8315_s9 + $0xb4] sm:$0xf0]  ;;  %v5378_v40 = vor.u32 %v6160_v36, %v5377_v33 }
 0x190   : > { %v7394_v19 = vsel %vm1029_vm6, %v2521_v6, %v2522_v8  ;;  %v5326_v13 = vor.u32 %v6149_v29, %v5323_v30  ;;  %v6164_v6 = vld [vmem:[%s8315_s9 + $0xc4] sm:$0xf0]  ;;  %v5185_v8 = vld [vmem:[%s8314_s8 + $0x188] sm:$0xf0]  ;;  %v6185_v34 = vld [vmem:[%s8315_s9 + $0x174] sm:$0xf]  ;;  %v5386_v30 = vor.u32 %v6162_v18, %v5385_v16 }
 0x191   : > { %v5403_v39 = vld [vmem:[%s8315_s9 + $0xd8] sm:$0xf0]  ;;  %v6177_v59 = vld [vmem:[%s8315_s9 + $0x134] sm:$0xf] }
 0x192   : > { %2656 = vmatpush.bf16.msrb.mxu2 %v5200_v35  ;;  %v5417_v35 = vld [vmem:[%s8315_s9 + $0xf0] sm:$0xf]  ;;  %v5467_v60 = vld [vmem:[%s8315_s9 + $0x138] sm:$0xf0]  ;;  %v6193_v16 = vld [vmem:[%s8316_s10 + $0x34] sm:$0xf] }
 0x193   : > { %2461 = vmatpush.bf16.msra.mxu3 %v5082_v41  ;;  %2477 = vmatpush.bf16.msrb.mxu1 %v5130_v44  ;;  %v6121_v41 = vld [vmem:[%s8314_s8 + $0x1b4] sm:$0xf]  ;;  %v5418_v44 = vor.u32 %v6170_v42, %v5417_v35  ;;  %v6158_v35 = vld [vmem:[%s8315_s9 + $0x94] sm:$0xf0]  ;;  %v5470_v62 = vor.u32 %v6177_v59, %v5467_v60  ;;  %v5573_v36 = vld [vmem:[%s8316_s10 + $0x78] sm:$0xf0] }
 0x194   : > { %v5212_v48 = vor.u32 %v6121_v41, %v5209_v43  ;;  %v5369_v41 = vld [vmem:[%s8315_s9 + $0x90] sm:$0xf]  ;;  %v6181_v42 = vld [vmem:[%s8315_s9 + $0x154] sm:$0xf]  ;;  %v5557_v60 = vld [vmem:[%s8316_s10 + $0x58] sm:$0xf0] }
 0x195   : > { %5155 = vmatmul.msk.bf16.vlgmr.msra.gmra.mxu1 %vm692_vm3, %v7341_v53  ;;  %v6197_v59 = vld [vmem:[%s8316_s10 + $0x54] sm:$0xf] }
 0x196   : > { %2657 = vmatpush.bf16.msrb.mxu2 %v5192_v55  ;;  %v6168_v55 = vld [vmem:[%s8315_s9 + $0xe4] sm:$0xf0] }
 0x197   : > { %2462 = vmatpush.bf16.msra.mxu3 %v5074_v52  ;;  %2679 = vmatpush.bf16.msra.mxu1 %v5244_v63  ;;  %v5409_v52 = vld [vmem:[%s8315_s9 + $0xe0] sm:$0xf]  ;;  %v5193_v63 = vld [vmem:[%s8314_s8 + $0x198] sm:$0xf0] }
 0x198   : > { %v5410_v58 = vor.u32 %v6168_v55, %v5409_v52  ;;  %v6161_v55 = vld [vmem:[%s8315_s9 + $0xb4] sm:$0xf] }
 0x19a   : > { %2658 = vmatpush.bf16.msrb.mxu2 %v5184_v4  ;;  %v5393_v4 = vld [vmem:[%s8315_s9 + $0xc0] sm:$0xf] }
 0x19b   : > { %2463 = vmatpush.bf16.msra.mxu3 %v5066_v54  ;;  %2680 = vmatpush.bf16.msra.mxu1 %v5236_v17  ;;  %v6115_v54 = vld [vmem:[%s8314_s8 + $0x184] sm:$0xf]  ;;  %v5394_v12 = vor.u32 %v6164_v6, %v5393_v4  ;;  %v5451_v4 = vld [vmem:[%s8315_s9 + $0x118] sm:$0xf0]  ;;  %v5374_v6 = vor.u32 %v6157_v2, %v5371_v3  ;;  %v6188_v2 = vld [vmem:[%s8316_s10 + $0x4] sm:$0xf0] }
 0x19c   : > { %v5188_v17 = vor.u32 %v6115_v54, %v5185_v8  ;;  %v6173_v54 = vld [vmem:[%s8315_s9 + $0x114] sm:$0xf]  ;;  %v6155_v8 = vld [vmem:[%s8315_s9 + $0x84] sm:$0xf]  ;;  %v5597_v3 = vld [vmem:[%s8316_s10 + $0x90] sm:$0xf] }
 0x19d   : > { %2659 = vmatmul.bf16.vlgmr.msrb.gmra.mxu2 %v7394_v19 }
 0x19e   : > { %2824 = vmatpush.bf16.msra.mxu2 %v5342_v10  ;;  %2464 = vmatmul.bf16.vlgmr.msra.gmra.mxu3 %v6586_v15  ;;  %v5249_v15 = vld [vmem:[%s8314_s8 + $0x208] sm:$0xf0]  ;;  %v5419_v10 = vld [vmem:[%s8315_s9 + $0xf8] sm:$0xf0] }
 0x19f   : > { %2697 = vmatpush.bf16.msrb.mxu3 %v5276_v9  ;;  %2681 = vmatpush.bf16.msra.mxu1 %v5228_v32  ;;  %v5252_v37 = vor.u32 %v6131_v31, %v5249_v15  ;;  %v6169_v9 = vld [vmem:[%s8315_s9 + $0xf4] sm:$0xf]  ;;  %v5414_v31 = vor.u32 %v6167_v25, %v5411_v28  ;;  %v7647_v28 = vpop.f32.mrf.mxu0 }
 0x1a0   : > { %v6165_v15 = vld [vmem:[%s8315_s9 + $0xd4] sm:$0xf] }
 0x1a1   : > { %v5406_v43 = vor.u32 %v6165_v15, %v5403_v39  ;;  %v6187_v39 = vld [vmem:[%s8316_s10 + $0x4] sm:$0xf] }
 0x1a2   : > { %2825 = vmatpush.bf16.msra.mxu2 %v5334_v23  ;;  %v5422_v23 = vor.u32 %v6169_v9, %v5419_v10  ;;  %v5363_v9 = vld [vmem:[%s8315_s9 + $0x88] sm:$0xf0]  ;;  %v5454_v10 = vor.u32 %v6173_v54, %v5451_v4  ;;  %v6206_v54 = vld [vmem:[%s8316_s10 + $0x94] sm:$0xf0]  ;;  %v6195_v4 = vld [vmem:[%s8316_s10 + $0x44] sm:$0xf] }
 0x1a3   : > { %2698 = vmatpush.bf16.msrb.mxu3 %v5268_v21  ;;  %2682 = vmatpush.bf16.msra.mxu1 %v5220_v22  ;;  %v5499_v21 = vld [vmem:[%s8315_s9 + $0x178] sm:$0xf0] }
 0x1a4   : > { %v5502_v32 = vor.u32 %v6185_v34, %v5499_v21  ;;  %v6191_v34 = vld [vmem:[%s8316_s10 + $0x24] sm:$0xf] }
 0x1a5   : > { %5156 = vmatmul.msk.bf16.vlgmr.msrb.gmra.mxu1 %vm692_vm3, %v7341_v53  ;;  %v6117_v53 = vld [vmem:[%s8314_s8 + $0x194] sm:$0xf] }
 0x1a6   : > { %2826 = vmatpush.bf16.msra.mxu2 %v5326_v13  ;;  %v5196_v5 = vor.u32 %v6117_v53, %v5193_v63  ;;  %v5491_v13 = vld [vmem:[%s8315_s9 + $0x168] sm:$0xf0]  ;;  %v6159_v53 = vld [vmem:[%s8315_s9 + $0xa4] sm:$0xf] }
 0x1a7   : > { %2699 = vmatpush.bf16.msrb.mxu3 %v5260_v38  ;;  %2683 = vmatpush.bf16.msra.mxu1 %v5212_v48  ;;  %v6183_v38 = vld [vmem:[%s8315_s9 + $0x164] sm:$0xf] }
 0x1a8   : > { %v5494_v22 = vor.u32 %v6183_v38, %v5491_v13  ;;  %v6179_v48 = vld [vmem:[%s8315_s9 + $0x144] sm:$0xf]  ;;  %v6209_v38 = vld [vmem:[%s8316_s10 + $0xb4] sm:$0xf]  ;;  %v5615_v13 = vld [vmem:[%s8316_s10 + $0xb8] sm:$0xf0] }
 0x1a9   : > { %v6175_v63 = vld [vmem:[%s8315_s9 + $0x124] sm:$0xf]  ;;  %v5618_v15 = vor.u32 %v6209_v38, %v5615_v13  ;;  %v5555_v13 = vld [vmem:[%s8316_s10 + $0x50] sm:$0xf] }
 0x1aa   : > { %2827 = vmatpush.bf16.msra.mxu2 %v5318_v27  ;;  %v5395_v27 = vld [vmem:[%s8315_s9 + $0xc8] sm:$0xf0] }
 0x1ab   : > { %2700 = vmatpush.bf16.msrb.mxu3 %v5252_v37  ;;  %2684 = vmatpush.bf16.msra.mxu1 %v5204_v61  ;;  %v6163_v37 = vld [vmem:[%s8315_s9 + $0xc4] sm:$0xf]  ;;  %v5390_v61 = vor.u32 %v6161_v55, %v5387_v56  ;;  %v6190_v55 = vld [vmem:[%s8316_s10 + $0x14] sm:$0xf0]  ;;  %v5605_v56 = vld [vmem:[%s8316_s10 + $0xa0] sm:$0xf] }
 0x1ac   : > { %v5398_v52 = vor.u32 %v6163_v37, %v5395_v27  ;;  %v6199_v27 = vld [vmem:[%s8316_s10 + $0x64] sm:$0xf] }
 0x1ae   : > { %2828 = vmatpush.bf16.msra.mxu2 %v5310_v57  ;;  %5278 = vmatmul.msk.bf16.vlgmr.msrb.gmra.mxu3 %vm692_vm3, %v7046_v45  ;;  %v6139_v45 = vld [vmem:[%s8315_s9 + $0x4] sm:$0xf] }
 0x1af   : > { %2942 = vmatpush.bf16.msra.mxu3 %v5418_v44  ;;  %2685 = vmatpush.bf16.msra.mxu1 %v5196_v5  ;;  %v5286_v29 = vor.u32 %v6139_v45, %v5283_v14  ;;  %v5370_v44 = vor.u32 %v6158_v35, %v5369_v41  ;;  %v5366_v45 = vor.u32 %v6155_v8, %v5363_v9  ;;  %v5613_v41 = vld [vmem:[%s8316_s10 + $0xb0] sm:$0xf]  ;;  %v6210_v35 = vld [vmem:[%s8316_s10 + $0xb4] sm:$0xf0] }
 0x1b0   : > { %v5614_v37 = vor.u32 %v6210_v35, %v5613_v41  ;;  %v5598_v9 = vor.u32 %v6206_v54, %v5597_v3  ;;  %v3384_v54 = vadd.f32 %v7187_v20, %v7172_v7  ;;  %v6213_v7 = vld [vmem:[%s8318_s12 + $0x10] sm:$0xff] }
 0x1b2   : > { %2829 = vmatpush.bf16.msra.mxu2 %v5302_v0  ;;  %v5459_v0 = vld [vmem:[%s8315_s9 + $0x128] sm:$0xf0] }
 0x1b3   : > { %2943 = vmatpush.bf16.msra.mxu3 %v5410_v58  ;;  %2686 = vmatpush.bf16.msra.mxu1 %v5188_v17  ;;  %v5478_v58 = vor.u32 %v6179_v48, %v5475_v51  ;;  %v5462_v5 = vor.u32 %v6175_v63, %v5459_v0  ;;  %v5531_v17 = vld [vmem:[%s8316_s10 + $0x38] sm:$0xf0]  ;;  %v2260_v0 = vpop.f32.mrf.mxu0 }
 0x1b4   : > { %v5534_v18 = vor.u32 %v6193_v16, %v5531_v17  ;;  %v6202_v16 = vld [vmem:[%s8316_s10 + $0x74] sm:$0xf0]  ;;  %v5589_v17 = vld [vmem:[%s8316_s10 + $0x80] sm:$0xf] }
 0x1b6   : > { %2830 = vmatpush.bf16.msra.mxu2 %v5294_v11  ;;  %2687 = vmatmul.bf16.vlgmr.msra.gmra.mxu1 %v7394_v19  ;;  %v5483_v19 = vld [vmem:[%s8315_s9 + $0x158] sm:$0xf0]  ;;  %v6171_v11 = vld [vmem:[%s8315_s9 + $0x104] sm:$0xf] }
 0x1b7   : > { %2944 = vmatpush.bf16.msra.mxu3 %v5402_v1  ;;  %2956 = vmatpush.bf16.msrb.mxu1 %v5422_v23  ;;  %v5486_v46 = vor.u32 %v6181_v42, %v5483_v19  ;;  %v5382_v1 = vor.u32 %v6159_v53, %v5379_v24  ;;  %v5515_v23 = vld [vmem:[%s8316_s10 + $0x18] sm:$0xf0]  ;;  %v5521_v19 = vld [vmem:[%s8316_s10 + $0x20] sm:$0xf]  ;;  %v5560_v53 = vor.u32 %v6197_v59, %v5557_v60  ;;  %v6205_v24 = vld [vmem:[%s8316_s10 + $0x94] sm:$0xf] }
 0x1ba   : > { %2831 = vmatpush.bf16.msra.mxu2 %v5286_v29  ;;  %v5529_v29 = vld [vmem:[%s8316_s10 + $0x30] sm:$0xf] }
 0x1bb   : > { %2945 = vmatpush.bf16.msra.mxu3 %v5394_v12  ;;  %2957 = vmatpush.bf16.msrb.mxu1 %v5414_v31  ;;  %v5443_v12 = vld [vmem:[%s8315_s9 + $0x108] sm:$0xf0] }
 0x1bc   : > { %v5446_v14 = vor.u32 %v6171_v11, %v5443_v12  ;;  %v6203_v11 = vld [vmem:[%s8316_s10 + $0x84] sm:$0xf]  ;;  %v5591_v12 = vld [vmem:[%s8316_s10 + $0x88] sm:$0xf0] }
 0x1bd   : > { %2832 = vmatmul.bf16.vlgmr.msra.gmra.mxu2 %v7223_v49  ;;  %v6156_v49 = vld [vmem:[%s8315_s9 + $0x84] sm:$0xf0] }
 0x1be   : > { %3088 = vmatpush.bf16.msrb.mxu2 %v5502_v32  ;;  %v5362_v57 = vor.u32 %v6156_v49, %v5361_v47  ;;  %v6201_v32 = vld [vmem:[%s8316_s10 + $0x74] sm:$0xf]  ;;  %v6207_v47 = vld [vmem:[%s8316_s10 + $0xa4] sm:$0xf]  ;;  %v5607_v49 = vld [vmem:[%s8316_s10 + $0xa8] sm:$0xf0] }
 0x1bf   : > { %2946 = vmatpush.bf16.msra.mxu3 %v5386_v30  ;;  %2958 = vmatpush.bf16.msrb.mxu1 %v5406_v43  ;;  %v6194_v30 = vld [vmem:[%s8316_s10 + $0x34] sm:$0xf0]  ;;  %v5576_v31 = vor.u32 %v6201_v32, %v5573_v36  ;;  %v6192_v43 = vld [vmem:[%s8316_s10 + $0x24] sm:$0xf0]  ;;  %v5610_v51 = vor.u32 %v6207_v47, %v5607_v49  ;;  %v5563_v32 = vld [vmem:[%s8316_s10 + $0x60] sm:$0xf] }
 0x1c0   : > { %v5530_v33 = vor.u32 %v6194_v30, %v5529_v29  ;;  %v2437_v29 = vpop.f32.mrf.mxu0 }
 0x1c1   : > { %3265 = vmatpush.bf16.msrb.mxu0 %v5576_v31  ;;  %v6198_v31 = vld [vmem:[%s8316_s10 + $0x54] sm:$0xf0] }
 0x1c2   : > { %3089 = vmatpush.bf16.msrb.mxu2 %v5494_v22 }
 0x1c3   : > { %2947 = vmatpush.bf16.msra.mxu3 %v5378_v40  ;;  %2959 = vmatpush.bf16.msrb.mxu1 %v5398_v52  ;;  %v5507_v40 = vld [vmem:[%s8316_s10 + $0x8] sm:$0xf0]  ;;  %v5513_v52 = vld [vmem:[%s8316_s10 + $0x10] sm:$0xf] }
 0x1c4   : > { %v5510_v22 = vor.u32 %v6187_v39, %v5507_v40  ;;  %v5556_v39 = vor.u32 %v6198_v31, %v5555_v13 }
 0x1c6   : > { %3090 = vmatpush.bf16.msrb.mxu2 %v5486_v46  ;;  %v5565_v46 = vld [vmem:[%s8316_s10 + $0x68] sm:$0xf0] }
 0x1c7   : > { %2948 = vmatpush.bf16.msra.mxu3 %v5370_v44  ;;  %2960 = vmatpush.bf16.msrb.mxu1 %v5390_v61  ;;  %v5522_v44 = vor.u32 %v6192_v43, %v5521_v19  ;;  %v5568_v48 = vor.u32 %v6199_v27, %v5565_v46  ;;  %v5547_v43 = vld [vmem:[%s8316_s10 + $0x40] sm:$0xf] }
 0x1c8   : > { %v2439_v49 = vpop.f32.mrf.mxu0 }
 0x1c9   : > { %3266 = vmatpush.bf16.msrb.mxu0 %v5568_v48 }
 0x1ca   : > { %3091 = vmatpush.bf16.msrb.mxu2 %v5478_v58  ;;  %v6208_v58 = vld [vmem:[%s8316_s10 + $0xa4] sm:$0xf0] }
 0x1cb   : > { %2949 = vmatpush.bf16.msra.mxu3 %v5362_v57  ;;  %2961 = vmatpush.bf16.msrb.mxu1 %v5382_v1  ;;  %v5514_v57 = vor.u32 %v6190_v55, %v5513_v52  ;;  %v5606_v61 = vor.u32 %v6208_v58, %v5605_v56  ;;  %v5505_v1 = vld [vmem:[%s8316_s10] sm:$0xf] }
 0x1cd   : > { %3267 = vmatpush.bf16.msrb.mxu0 %v5560_v53 }
 0x1ce   : > { %2950 = vmatmul.bf16.vlgmr.msra.gmra.mxu3 %v7196_v26  ;;  %3092 = vmatpush.bf16.msrb.mxu2 %v5470_v62  ;;  %v5599_v62 = vld [vmem:[%s8316_s10 + $0x98] sm:$0xf0] }
 0x1cf   : > { %2962 = vmatpush.bf16.msrb.mxu1 %v5374_v6  ;;  %3164 = vmatpush.bf16.msrb.mxu3 %v5530_v33  ;;  %v5602_v63 = vor.u32 %v6205_v24, %v5599_v62  ;;  %v5549_v6 = vld [vmem:[%s8316_s10 + $0x48] sm:$0xf0]  ;;  %v6200_v33 = vld [vmem:[%s8316_s10 + $0x64] sm:$0xf0] }
 0x1d0   : > { %v5564_v38 = vor.u32 %v6200_v33, %v5563_v32 }
 0x1d2   : > { %3093 = vmatpush.bf16.msrb.mxu2 %v5462_v5  ;;  %v5506_v5 = vor.u32 %v6188_v2, %v5505_v1  ;;  %v6218_v1 = vld [vmem:[%s8318_s12 + $0x38] sm:$0xff] }
 0x1d3   : > { %2963 = vmatpush.bf16.msrb.mxu1 %v5366_v45  ;;  %3165 = vmatpush.bf16.msrb.mxu3 %v5522_v44  ;;  %v5594_v45 = vor.u32 %v6203_v11, %v5591_v12  ;;  %v6212_v12 = vld [vmem:[%s8318_s12 + $0x8] sm:$0xff] }
 0x1d6   : > { %3094 = vmatpush.bf16.msrb.mxu2 %v5454_v10  ;;  %2964 = vmatmul.bf16.vlgmr.msrb.gmra.mxu1 %v7196_v26  ;;  %v5523_v26 = vld [vmem:[%s8316_s10 + $0x28] sm:$0xf0]  ;;  %v5552_v10 = vor.u32 %v6195_v4, %v5549_v6  ;;  %v3385_v6 = vrot.slane %v3384_v54, 4 }
 0x1d7   : > { %3178 = vmatpush.bf16.msra.mxu1 %v5534_v18  ;;  %v5526_v21 = vor.u32 %v6191_v34, %v5523_v26  ;;  %3166 = vmatpush.bf16.msrb.mxu3 %v5514_v57  ;;  %v6204_v34 = vld [vmem:[%s8316_s10 + $0x84] sm:$0xf0] }
 0x1d8   : > { %3268 = vmatpush.bf16.msrb.mxu0 %v5552_v10  ;;  %v5590_v26 = vor.u32 %v6204_v34, %v5589_v17  ;;  %v6216_v4 = vld [vmem:[%s8318_s12 + $0x28] sm:$0xff]  ;;  %v6214_v10 = vld [vmem:[%s8318_s12 + $0x18] sm:$0xff] }
 0x1da   : > { %3095 = vmatpush.bf16.msrb.mxu2 %v5446_v14  ;;  %v5571_v14 = vld [vmem:[%s8316_s10 + $0x70] sm:$0xf] }
 0x1db   : > { %3179 = vmatpush.bf16.msra.mxu1 %v5526_v21  ;;  %3167 = vmatpush.bf16.msrb.mxu3 %v5506_v5  ;;  %v5572_v18 = vor.u32 %v6202_v16, %v5571_v14  ;;  %v6217_v5 = vld [vmem:[%s8318_s12 + $0x30] sm:$0xff]  ;;  %v6211_v14 = vld [vmem:[%s8318_s12] sm:$0xff] }
 0x1dd   : > { %3096 = vmatmul.bf16.vlgmr.msrb.gmra.mxu2 %v7225_v50  ;;  %v6189_v50 = vld [vmem:[%s8316_s10 + $0x14] sm:$0xf] }
 0x1de   : > { %v5518_v25 = vor.u32 %v6189_v50, %v5515_v23  ;;  %3352 = vmatpush.bf16.msra.mxu2 %v5618_v15 }
 0x1df   : > { %3251 = vmatpush.bf16.msra.mxu3 %v5572_v18 }
 0x1e0   : > { %3180 = vmatpush.bf16.msra.mxu1 %v5518_v25  ;;  %v6306_v25 = vld [vmem:[%s8313_s7] ss:$0 sm:$0xff] }
 0x1e2   : > { %3353 = vmatpush.bf16.msra.mxu2 %v5610_v51 }
 0x1e3   : > { %3252 = vmatpush.bf16.msra.mxu3 %v5564_v38 }
 0x1e4   : > { %3181 = vmatpush.bf16.msra.mxu1 %v5510_v22 }
 0x1e6   : > { %3354 = vmatpush.bf16.msra.mxu2 %v5602_v63 }
 0x1e7   : > { %3253 = vmatpush.bf16.msra.mxu3 %v5556_v39 }
 0x1e8   : > { %3338 = vmatpush.bf16.msrb.mxu1 %v5614_v37  ;;  %v6196_v37 = vld [vmem:[%s8316_s10 + $0x44] sm:$0xf0] }
 0x1e9   : > { %v5548_v47 = vor.u32 %v6196_v37, %v5547_v43 }
 0x1ea   : > { %3355 = vmatpush.bf16.msra.mxu2 %v5594_v45 }
 0x1eb   : > { %3254 = vmatpush.bf16.msra.mxu3 %v5548_v47 }
 0x1ec   : > { %3339 = vmatpush.bf16.msrb.mxu1 %v5606_v61 }
 0x1f0   : > { %3340 = vmatpush.bf16.msrb.mxu1 %v5598_v9  ;;  %v3386_v9 = vadd.f32 %v3385_v6, %v3384_v54 }
 0x1f2   : > { %v1873_v42 = vpop.f32.mrf.mxu1  ;;  %v3387_v11 = vrot.slane %v3386_v9, 2 }
 0x1f4   : > { %3341 = vmatpush.bf16.msrb.mxu1 %v5590_v26  ;;  %v3388_v20 = vadd.f32 %v3387_v11, %v3386_v9  ;;  %v7850_v9 = vld [vmem:[%s8317_s11] sm:$0x3] }
 0x1f6   : > { %v3389_v45 = vrot.slane %v3388_v20, 1 }
 0x1f8   : > { %v3390_v16 = vadd.f32 %v3389_v45, %v3388_v20  ;;  %v6227_v20 = vld [vmem:[%s8321_s15 + $0x40] sm:$0xff] }
 0x1f9   : > { %v6223_v45 = vld [vmem:[%s8321_s15 + $0x20] sm:$0xff] }
 0x1fa   : > { %v1875_v8 = vpop.f32.mrf.mxu1  ;;  %v3391_v17 = vpack.c.bf16 %v3390_v16, %v3390_v16 }
 0x200   : > { %v1935_v21 = vpop.f32.mrf.mxu2 }
 0x201   : > { %v2017_v50 = vpop.f32.mrf.mxu3  ;;  %v1936_v23 = vadd.f32 %v1935_v21, %v1873_v42 }
 0x202   : > { %v2272_v30 = vpop.f32.mrf.mxu1 }
 0x203   : > { %v2022_v36 = vadd.f32 %v2017_v50, %v1936_v23  ;;  %v2273_v44 = vadd.f32 %v2272_v30, %v7647_v28  ;;  %v2674_v23 = vpop.f32.mrf.mxu0 }
 0x205   : > { %v2028_v15 = vadd.f32 %v6306_v25, %v2022_v36  ;;  %v2438_v55 = vadd.f32 %v2437_v29, %v2273_v44 }
 0x207   : > { %v2030_v40 = vmax.f32 %v2028_v15, 0.0 }
 0x208   : > { %v1937_v22 = vpop.f32.mrf.mxu2 }
 0x209   : > { %v2032_v41 = vmin.f32 %v2030_v40, 6.0  ;;  %v1938_v35 = vadd.f32 %v1937_v22, %v1875_v8  ;;  %v2019_v42 = vpop.f32.mrf.mxu3  ;;  %v6215_v8 = vld [vmem:[%s8318_s12 + $0x20] sm:$0xff] }
 0x20a   : > { %v2274_v19 = vpop.f32.mrf.mxu1 }
 0x20b   : > { %2036 = vst.msk [vmem:[#allocation5 + $0x1] sm:$0xff] %vm692_vm3, %v2032_v41  ;;  %v2023_v27 = vadd.f32 %v2019_v42, %v1938_v35  ;;  %v2275_v46 = vadd.f32 %v2274_v19, %v2260_v0  ;;  %v7817_v32 = vpop.f32.mrf.mxu0 }
 0x20d   : > { %v2029_v48 = vadd.f32 %v6306_v25, %v2023_v27  ;;  %v2440_v51 = vadd.f32 %v2439_v49, %v2275_v46 }
 0x20f   : > { %v2031_v52 = vmax.f32 %v2029_v48, 0.0 }
 0x210   : > { %v2286_v34 = vpop.f32.mrf.mxu2 }
 0x211   : > { %v2033_v56 = vmin.f32 %v2031_v52, 6.0  ;;  %v2300_v18 = vpop.f32.mrf.mxu3  ;;  %v6230_v52 = vld [vmem:[%s8321_s15 + $0x58] sm:$0xff] }
 0x212   : > { %v2451_v57 = vpop.f32.mrf.mxu1  ;;  %v3106_v59 = vld [vmem:[#allocation5] sm:$0xff]  ;;  %v2301_v41 = vadd.f32 %v2300_v18, %v2286_v34  ;;  %3542 = vmatpush.bf16.msra.mxu0 %v6230_v52 }
 0x213   : > { %2037 = vst.msk [vmem:[#allocation5 + $0x9] sm:$0xff] %vm692_vm3, %v2033_v56  ;;  %v7781_v58 = vadd.f32 %v2451_v57, %v2438_v55  ;;  %v3192_v60 = vld [vmem:[#allocation5 + $0x1] sm:$0xff]  ;;  %v7821_v13 = vpop.f32.mrf.mxu0  ;;  %v6226_v56 = vld [vmem:[%s8321_s15 + $0x38] sm:$0xff] }
 0x218   : > { %v2288_v21 = vpop.f32.mrf.mxu2 }
 0x219   : > { %v2302_v26 = vpop.f32.mrf.mxu3 }
 0x21a   : > { %v3107_v61 = vld [vmem:[#allocation5 + $0x8] sm:$0xff]  ;;  %v2453_v28 = vpop.f32.mrf.mxu1  ;;  %v2303_v37 = vadd.f32 %v2302_v26, %v2288_v21  ;;  %v6222_v21 = vld [vmem:[%s8321_s15 + $0x18] sm:$0xff] }
 0x21b   : > { %v3193_v53 = vld [vmem:[#allocation5 + $0x9] sm:$0xff]  ;;  %v3108_v62 = vpack.c.bf16 %v3107_v61, %v3106_v59  ;;  %v7786_v2 = vadd.f32 %v2453_v28, %v2440_v51  ;;  %v7823_v40 = vpop.f32.mrf.mxu0 }
 0x21c   : > { %v3279_v24 = vld [vmem:[#allocation5 + $0x2] sm:$0xff]  ;;  %v3194_v63 = vpack.c.bf16 %v3193_v53, %v3192_v60  ;;  %v3280_v0 = vld [vmem:[#allocation5 + $0xa] sm:$0xff] }
 0x21d   : > { %v3281_v3 = vpack.c.bf16 %v3280_v0, %v3279_v24  ;;  %5535 = vmatmul.msk.bf16.vlgmr.msrb.gmra.mxu3 %vm692_vm3, %v3108_v62  ;;  %5536 = vmatmul.msk.bf16.vlgmr.msra.gmra.mxu1 %vm692_vm3, %v3108_v62  ;;  %v6229_v24 = vld [vmem:[%s8321_s15 + $0x50] sm:$0xff] }
 0x21e   : > { %5578 = vmatmul.msk.bf16.vlgmr.msrb.gmra.mxu0 %vm692_vm3, %v3194_v63  ;;  %3599 = vmatpush.bf16.msra.mxu1 %v6218_v1  ;;  %v6225_v62 = vld [vmem:[%s8321_s15 + $0x30] sm:$0xff] }
 0x21f   : > { %5620 = vmatmul.msk.bf16.vlgmr.msra.gmra.mxu2 %vm692_vm3, %v3281_v3  ;;  %3525 = vmatpush.bf16.msrb.mxu3 %v6226_v56 }
 0x220   : > { %v2660_v29 = vpop.f32.mrf.mxu2  ;;  %3543 = vmatpush.bf16.msra.mxu0 %v6229_v24 }
 0x221   : > { %v2465_v25 = vpop.f32.mrf.mxu3 }
 0x222   : > { %3600 = vmatpush.bf16.msra.mxu1 %v6217_v5  ;;  %v2479_v50 = vpop.f32.mrf.mxu1  ;;  %v2466_v19 = vadd.f32 %v2465_v25, %v2301_v41  ;;  %v6228_v5 = vld [vmem:[%s8321_s15 + $0x48] sm:$0xff] }
 0x223   : > { %v7825_v43 = vpop.f32.mrf.mxu0  ;;  %3526 = vmatpush.bf16.msrb.mxu3 %v6225_v62 }
 0x224   : > { %v2480_v27 = vadd.f32 %v2479_v50, %v2466_v19  ;;  %3544 = vmatpush.bf16.msra.mxu0 %v6228_v5 }
 0x226   : > { %3601 = vmatpush.bf16.msra.mxu1 %v6216_v4  ;;  %v6224_v4 = vld [vmem:[%s8321_s15 + $0x28] sm:$0xff] }
 0x227   : > { %3527 = vmatpush.bf16.msrb.mxu3 %v6224_v4 }
 0x228   : > { %v7819_v36 = vpop.f32.mrf.mxu2  ;;  %3545 = vmatpush.bf16.msra.mxu0 %v6227_v20 }
 0x229   : > { %v2467_v33 = vpop.f32.mrf.mxu3 }
 0x22a   : > { %3602 = vmatpush.bf16.msra.mxu1 %v6215_v8  ;;  %v2481_v30 = vpop.f32.mrf.mxu1  ;;  %v2468_v49 = vadd.f32 %v2467_v33, %v2303_v37  ;;  %v2675_v8 = vadd.f32 %v2674_v23, %v2660_v29  ;;  %v2677_v23 = vadd.f32 %v7817_v32, %v7819_v36  ;;  %v6220_v32 = vld [vmem:[%s8321_s15 + $0x8] sm:$0xff] }
 0x22b   : > { %v7830_v55 = vpop.f32.mrf.mxu0  ;;  %3528 = vmatpush.bf16.msrb.mxu3 %v6223_v45 }
 0x22c   : > { %v2482_v57 = vadd.f32 %v2481_v30, %v2468_v49  ;;  %v2707_v34 = vadd.f32 %v2675_v8, %v7781_v58  ;;  %v6221_v58 = vld [vmem:[%s8321_s15 + $0x10] sm:$0xff]  ;;  %v2709_v41 = vadd.f32 %v2677_v23, %v7786_v2 }
 0x22d   : > { %5577 = vmatmul.msk.bf16.vlgmr.msra.gmra.mxu3 %vm692_vm3, %v3194_v63  ;;  %5619 = vmatmul.msk.bf16.vlgmr.msrb.gmra.mxu1 %vm692_vm3, %v3281_v3 }
 0x22e   : > { %3603 = vmatpush.bf16.msra.mxu1 %v6214_v10  ;;  %v2838_v25 = vadd.f32 %v7821_v13, %v2707_v34  ;;  %v2840_v19 = vadd.f32 %v7823_v40, %v2709_v41  ;;  %v3612_v34 = vld [vmem:[%s8324_s18] sm:$0x1] }
 0x22f   : > { %3529 = vmatpush.bf16.msrb.mxu3 %v6222_v21 }
 0x231   : > { %v2702_v31 = vpop.f32.mrf.mxu3 }
 0x232   : > { %3604 = vmatpush.bf16.msra.mxu1 %v6213_v7 }
 0x233   : > { %v2688_v38 = vpop.f32.mrf.mxu1  ;;  %3530 = vmatpush.bf16.msrb.mxu3 %v6221_v58 }
 0x234   : > { %v2703_v44 = vadd.f32 %v2702_v31, %v2688_v38 }
 0x236   : > { %3605 = vmatpush.bf16.msra.mxu1 %v6212_v12  ;;  %v2708_v48 = vadd.f32 %v2703_v44, %v2480_v27  ;;  %v6219_v27 = vld [vmem:[%s8321_s15] sm:$0xff] }
 0x237   : > { %3531 = vmatpush.bf16.msrb.mxu3 %v6220_v32  ;;  %v6255_v32 = vld [vmem:[%s8322_s16 + $0x4] sm:$0xf] }
 0x239   : > { %v2704_v22 = vpop.f32.mrf.mxu3 }
 0x23a   : > { %3606 = vmatpush.bf16.msra.mxu1 %v6211_v14 }
 0x23b   : > { %v2690_v39 = vpop.f32.mrf.mxu1  ;;  %3532 = vmatpush.bf16.msrb.mxu3 %v6219_v27 }
 0x23c   : > { %v2705_v60 = vadd.f32 %v2704_v22, %v2690_v39 }
 0x23d   : > { %3607 = vmatmul.bf16.vlgmr.msra.gmra.mxu1 %v3391_v17  ;;  %v3369_v17 = vperm.slane %v7850_v9, 1 }
 0x23e   : > { %v2710_v63 = vadd.f32 %v2705_v60, %v2482_v57  ;;  %v3368_v57 = vperm.slane %v7850_v9, 0 }
 0x240   : > { %v2833_v15 = vpop.f32.mrf.mxu2 }
 0x241   : > { %v2839_v59 = vadd.f32 %v2833_v15, %v2708_v48 }
 0x248   : > { %v2835_v35 = vpop.f32.mrf.mxu2 }
 0x249   : > { %v2841_v6 = vadd.f32 %v2835_v35, %v2710_v63 }
 0x251   : > { %v2951_v46 = vpop.f32.mrf.mxu3 }
 0x252   : > { %v2970_v38 = vadd.f32 %v2951_v46, %v2838_v25 }
 0x253   : > { %v2965_v42 = vpop.f32.mrf.mxu1 }
 0x254   : > { %v2971_v53 = vadd.f32 %v2965_v42, %v2839_v59  ;;  %v3102_v13 = vadd.f32 %v7825_v43, %v2970_v38 }
 0x259   : > { %v2953_v61 = vpop.f32.mrf.mxu3 }
 0x25a   : > { %v2972_v46 = vadd.f32 %v2953_v61, %v2840_v19  ;;  %v6256_v19 = vld [vmem:[%s8322_s16 + $0x4] sm:$0x30] }
 0x25b   : > { %v2967_v51 = vpop.f32.mrf.mxu1 }
 0x25c   : > { %v2973_v10 = vadd.f32 %v2967_v51, %v2841_v6  ;;  %v3104_v40 = vadd.f32 %v7830_v55, %v2972_v46 }
 0x260   : > { %v3097_v47 = vpop.f32.mrf.mxu2 }
 0x261   : > { %v3103_v0 = vadd.f32 %v3097_v47, %v2971_v53 }
 0x268   : > { %v3099_v28 = vpop.f32.mrf.mxu2 }
 0x269   : > { %v3105_v14 = vadd.f32 %v3099_v28, %v2973_v10 }
 0x29a   : > { %v3183_v1 = vpop.f32.mrf.mxu1 }
 0x29b   : > { %v3189_v3 = vadd.f32 %v3183_v1, %v3103_v0  ;;  %v3270_v54 = vpop.f32.mrf.mxu0 }
 0x29d   : > { %v3276_v11 = vadd.f32 %v3270_v54, %v3189_v3 }
 0x2a0   : > { %v3169_v7 = vpop.f32.mrf.mxu3 }
 0x2a1   : > { %v3188_v37 = vadd.f32 %v3169_v7, %v3102_v13 }
 0x2a2   : > { %v3357_v12 = vpop.f32.mrf.mxu2  ;;  %v3185_v18 = vpop.f32.mrf.mxu1 }
 0x2a3   : > { %v3363_v16 = vadd.f32 %v3357_v12, %v3276_v11  ;;  %v3191_v26 = vadd.f32 %v3185_v18, %v3105_v14  ;;  %v3272_v29 = vpop.f32.mrf.mxu0 }
 0x2a5   : > { %v3373_v50 = vadd.f32 %v3369_v17, %v3363_v16  ;;  %v3278_v30 = vadd.f32 %v3272_v29, %v3191_v26 }
 0x2a7   : > { %v3377_v15 = vmax.f32 %v3373_v50, 0.0  ;;  %v3613_v50 = vunpack.c.l.bf16 %v3612_v34 }
 0x2a8   : > { %v3171_v33 = vpop.f32.mrf.mxu3 }
 0x2a9   : > { %v7874_v35 = vmin.f32 %v3377_v15, 6.0  ;;  %v3190_v59 = vadd.f32 %v3171_v33, %v3104_v40  ;;  %v3644_v33 = vld [vmem:[%s8319_s13] sm:$0xf] }
 0x2aa   : > { %v3359_v31 = vpop.f32.mrf.mxu2  ;;  %v3343_v22 = vpop.f32.mrf.mxu1  ;;  %v3651_v38 = vsel %vm3649_vm8, %v3644_v33, 0 }
 0x2ab   : > { %v3365_v39 = vadd.f32 %v3359_v31, %v3278_v30  ;;  %v3415_v49 = vsel %vm692_vm3, %v7874_v35, 0.0  ;;  %3660 = vmatpush.bf16.msrb.mxu2 %v3651_v38  ;;  %v3614_v31 = vld [vmem:[%s8325_s19] sm:$0x1]  ;;  %v6288_v38 = vld [vmem:[%s8323_s17 + $0xf8] sm:$0xf0] }
 0x2ac   : > { %v3615_v58 = vunpack.c.l.bf16 %v3614_v31  ;;  %v5751_v31 = vld [vmem:[%s8323_s17 + $0x48] sm:$0xf] }
 0x2ad   : > { %v3375_v36 = vadd.f32 %v3369_v17, %v3365_v39 }
 0x2af   : > { %v3379_v42 = vmax.f32 %v3375_v36, 0.0  ;;  %v5707_v36 = vld [vmem:[%s8322_s16 + $0x8] sm:$0x30] }
 0x2b0   : > { %v3256_v44 = vpop.f32.mrf.mxu3  ;;  %v5710_v13 = vor.u32 %v6255_v32, %v5707_v36  ;;  %v6266_v32 = vld [vmem:[%s8323_s17 + $0x4c] sm:$0xf]  ;;  %v5753_v36 = vld [vmem:[%s8323_s17 + $0x54] sm:$0xf0] }
 0x2b1   : > { %v7880_v2 = vmin.f32 %v3379_v42, 6.0  ;;  %v3275_v47 = vadd.f32 %v3256_v44, %v3188_v37  ;;  %v5705_v42 = vld [vmem:[%s8322_s16] sm:$0xf] }
 0x2b2   : > { %v3345_v48 = vpop.f32.mrf.mxu1  ;;  %v5706_v27 = vor.u32 %v6256_v19, %v5705_v42  ;;  %v3724_v44 = vsel %vm3719_vm9, %v5710_v13, 0  ;;  %v5823_v42 = vld [vmem:[%s8323_s17 + $0xd8] sm:$0xf] }
 0x2b3   : > { %v3416_v43 = vsel %vm692_vm3, %v7880_v2, 0.0  ;;  %v3362_v56 = vadd.f32 %v3343_v22, %v3275_v47  ;;  %3746 = vmatpush.bf16.msra.mxu2 %v3724_v44  ;;  %v5825_v44 = vld [vmem:[%s8323_s17 + $0xe4] sm:$0xf0] }
 0x2b4   : > { %v3417_v51 = vadd.f32 %v3416_v43, %v3415_v49  ;;  %v3721_v46 = vsel %vm3719_vm9, %v5706_v27, 0  ;;  %v6284_v27 = vld [vmem:[%s8323_s17 + $0xdc] sm:$0xf] }
 0x2b5   : > { %v3372_v24 = vadd.f32 %v3368_v57, %v3362_v56  ;;  %3733 = vmatpush.bf16.msrb.mxu0 %v3721_v46  ;;  %v5739_v46 = vld [vmem:[%s8323_s17 + $0x30] sm:$0xf] }
 0x2b6   : > { %v3418_v52 = vrot.slane %v3417_v51, 4 }
 0x2b7   : > { %v3376_v3 = vmax.f32 %v3372_v24, 0.0  ;;  %v5799_v24 = vld [vmem:[%s8323_s17 + $0xa8] sm:$0xf] }
 0x2b8   : > { %v3419_v60 = vadd.f32 %v3418_v52, %v3417_v51  ;;  %v3258_v53 = vpop.f32.mrf.mxu3 }
 0x2b9   : > { %v3277_v28 = vadd.f32 %v3258_v53, %v3190_v59  ;;  %v7888_v6 = vmin.f32 %v3376_v3, 6.0  ;;  %v6276_v3 = vld [vmem:[%s8323_s17 + $0x98] sm:$0xf0] }
 0x2ba   : > { %v3420_v61 = vrot.slane %v3419_v60, 2  ;;  %v3608_v0 = vpop.f32.mrf.mxu1 }
 0x2bb   : > { %v3364_v63 = vadd.f32 %v3345_v48, %v3277_v28  ;;  %v6279_v28 = vld [vmem:[%s8323_s17 + $0xb0] sm:$0xf0] }
 0x2bc   : > { %v3421_v62 = vadd.f32 %v3420_v61, %v3419_v60 }
 0x2bd   : > { %v3374_v5 = vadd.f32 %v3368_v57, %v3364_v63  ;;  %v5800_v63 = vor.u32 %v6279_v28, %v5799_v24  ;;  %v6261_v24 = vld [vmem:[%s8323_s17 + $0x20] sm:$0xf0] }
 0x2be   : > { %v3422_v1 = vrot.slane %v3421_v62, 1 }
 0x2bf   : > { %v3378_v54 = vmax.f32 %v3374_v5, 0.0  ;;  %4003 = vmatpush.bf16.msra.mxu3 %v5800_v63  ;;  %v6260_v63 = vld [vmem:[%s8323_s17 + $0x1c] sm:$0xf] }
 0x2c0   : > { %v3423_v4 = vadd.f32 %v3422_v1, %v3421_v62  ;;  %v6278_v62 = vld [vmem:[%s8323_s17 + $0xac] sm:$0xf]  ;;  %v5787_v1 = vld [vmem:[%s8323_s17 + $0x90] sm:$0xf] }
 0x2c1   : > { %v7890_v55 = vmin.f32 %v3378_v54, 6.0  ;;  %v6275_v54 = vld [vmem:[%s8323_s17 + $0x94] sm:$0xf] }
 0x2c2   : > { %v3425_v8 = vpack.c.bf16 %v3423_v4, %v3423_v4  ;;  %v3610_v10 = vpop.f32.mrf.mxu1  ;;  %v5789_v4 = vld [vmem:[%s8323_s17 + $0x9c] sm:$0xf0] }
 0x2c3   : > { %v3408_v9 = vadd.f32 %v7890_v55, %v7888_v6  ;;  %v6273_v10 = vld [vmem:[%s8323_s17 + $0x80] sm:$0xf0] }
 0x2c4   : > { %5669 = vmatmul.msk.bf16.vlgmr.msra.gmra.mxu0 %vm692_vm3, %v3425_v8  ;;  %v5788_v8 = vor.u32 %v6276_v3, %v5787_v1 }
 0x2c5   : > { %v3409_v11 = vrot.slane %v3408_v9, 4 }
 0x2c6   : > { %4004 = vmatpush.bf16.msra.mxu3 %v5788_v8  ;;  %v5946_v8 = vld [vmem:[%s8320_s14 + $0xa8] sm:$0xf] }
 0x2c7   : > { %v3410_v7 = vadd.f32 %v3409_v11, %v3408_v9  ;;  %v5775_v9 = vld [vmem:[%s8323_s17 + $0x78] sm:$0xf]  ;;  %v5792_v11 = vor.u32 %v6275_v54, %v5789_v4  ;;  %v6258_v54 = vld [vmem:[%s8323_s17 + $0x8] sm:$0xf0] }
 0x2c9   : > { %v3411_v20 = vrot.slane %v3410_v7, 2 }
 0x2cb   : > { %v3412_v12 = vadd.f32 %v3411_v20, %v3410_v7  ;;  %v6272_v7 = vld [vmem:[%s8323_s17 + $0x7c] sm:$0xf]  ;;  %v5777_v20 = vld [vmem:[%s8323_s17 + $0x84] sm:$0xf0] }
 0x2cc   : > { %v5780_v34 = vor.u32 %v6272_v7, %v5777_v20  ;;  %v6252_v20 = vld [vmem:[%s8320_s14 + $0xac] sm:$0xf] }
 0x2cd   : > { %v3413_v45 = vrot.slane %v3412_v12, 1 }
 0x2cf   : > { %v3414_v14 = vadd.f32 %v3413_v45, %v3412_v12  ;;  %v5776_v45 = vor.u32 %v6273_v10, %v5775_v9  ;;  %v6253_v9 = vld [vmem:[%s8320_s14 + $0xb0] sm:$0xf0]  ;;  %v6257_v10 = vld [vmem:[%s8323_s17 + $0x4] sm:$0xf] }
 0x2d1   : > { %v3424_v16 = vpack.c.bf16 %v3414_v14, %v3414_v14  ;;  %v5763_v14 = vld [vmem:[%s8323_s17 + $0x60] sm:$0xf]  ;;  %4005 = vmatpush.bf16.msra.mxu3 %v5776_v45  ;;  %v5947_v45 = vor.u32 %v6253_v9, %v5946_v8 }
 0x2d2   : > { %v5888_v9 = vld [vmem:[%s8320_s14 + $0x3c] sm:$0xf0] }
 0x2d3   : > { %3533 = vmatmul.bf16.vlgmr.msrb.gmra.mxu3 %v3424_v16  ;;  %v6270_v16 = vld [vmem:[%s8323_s17 + $0x68] sm:$0xf0] }
 0x341   : > { %v3547_v17 = vpop.f32.mrf.mxu0 }
 0x349   : > { %v3549_v18 = vpop.f32.mrf.mxu0 }
 0x34a   : > { %v6291_v18 = vld [vmem:[%s8323_s17 + $0x110] sm:$0xf0] }
 0x356   : > { %v3534_v26 = vpop.f32.mrf.mxu3 }
 0x357   : > { %v3548_v21 = vadd.f32 %v3547_v17, %v3534_v26  ;;  %v5847_v17 = vld [vmem:[%s8323_s17 + $0x108] sm:$0xf]  ;;  %v6269_v26 = vld [vmem:[%s8323_s17 + $0x64] sm:$0xf] }
 0x359   : > { %v3609_v23 = vadd.f32 %v3608_v0, %v3548_v21  ;;  %v5801_v0 = vld [vmem:[%s8323_s17 + $0xb4] sm:$0xf0]  ;;  %v5765_v21 = vld [vmem:[%s8323_s17 + $0x6c] sm:$0xf0] }
 0x35a   : > { %v5804_v5 = vor.u32 %v6278_v62, %v5801_v0  ;;  %v5729_v0 = vld [vmem:[%s8323_s17 + $0x24] sm:$0xf0] }
 0x35b   : > { %v3616_v25 = vmul.f32 %v3613_v50, %v3609_v23  ;;  %v5848_v50 = vor.u32 %v6291_v18, %v5847_v17  ;;  %v6290_v23 = vld [vmem:[%s8323_s17 + $0x10c] sm:$0xf]  ;;  %v5732_v4 = vor.u32 %v6260_v63, %v5729_v0  ;;  %v6250_v17 = vld [vmem:[%s8320_s14 + $0x98] sm:$0xf0]  ;;  %v5771_v63 = vld [vmem:[%s8323_s17 + $0x68] sm:$0xf] }
 0x35c   : > { %4031 = vmatpush.bf16.msrb.mxu1 %v5804_v5  ;;  %v5715_v5 = vld [vmem:[%s8323_s17] sm:$0xf]  ;;  %v6271_v0 = vld [vmem:[%s8323_s17 + $0x70] sm:$0xf0] }
 0x35d   : > { %v3618_v29 = vsel %vm3617_vm7, %v3616_v25, 0.0  ;;  %v5849_v25 = vld [vmem:[%s8323_s17 + $0x114] sm:$0xf0]  ;;  %4021 = vmatpush.bf16.msra.mxu0 %v5848_v50  ;;  %v5716_v7 = vor.u32 %v6258_v54, %v5715_v5  ;;  %v5886_v5 = vld [vmem:[%s8320_s14 + $0x30] sm:$0xf] }
 0x35e   : > { %3619 = vadd.xlane.f32.xlu0 %v3618_v29  ;;  %v3536_v30 = vpop.f32.mrf.mxu3  ;;  %v5835_v29 = vld [vmem:[%s8323_s17 + $0xf0] sm:$0xf]  ;;  %v5852_v33 = vor.u32 %v6290_v23, %v5849_v25  ;;  %v6281_v25 = vld [vmem:[%s8323_s17 + $0xc4] sm:$0xf]  ;;  %v6238_v54 = vld [vmem:[%s8320_s14 + $0x38] sm:$0xf0] }
 0x35f   : > { %v5764_v30 = vor.u32 %v6270_v16, %v5763_v14  ;;  %v5934_v16 = vld [vmem:[%s8320_s14 + $0x90] sm:$0xf]  ;;  %v5887_v8 = vor.u32 %v6238_v54, %v5886_v5  ;;  %v6242_v5 = vld [vmem:[%s8320_s14 + $0x58] sm:$0xf0] }
 0x360   : > { %4032 = vmatpush.bf16.msrb.mxu1 %v5792_v11  ;;  %v5717_v11 = vld [vmem:[%s8323_s17 + $0xc] sm:$0xf0]  ;;  %v5935_v50 = vor.u32 %v6250_v17, %v5934_v16  ;;  %v5874_v16 = vld [vmem:[%s8320_s14 + $0x18] sm:$0xf]  ;;  %v6235_v17 = vld [vmem:[%s8320_s14 + $0x20] sm:$0xf0] }
 0x361   : > { %4006 = vmatpush.bf16.msra.mxu3 %v5764_v30  ;;  %v5720_v14 = vor.u32 %v6257_v10, %v5717_v11  ;;  %v5922_v30 = vld [vmem:[%s8320_s14 + $0x78] sm:$0xf]  ;;  %v5819_v11 = vld [vmem:[%s8323_s17 + $0xc8] sm:$0xf] }
 0x364   : > { %4033 = vmatpush.bf16.msrb.mxu1 %v5780_v34  ;;  %v6249_v34 = vld [vmem:[%s8320_s14 + $0x94] sm:$0xf] }
 0x3d1   : > { %v3620_v15 = vpop.xlane.xlu0 %3619 }
 0x3d2   : > { %v3621_v39 = vmax.f32 %v3620_v15, 0.0  ;;  %v5836_v15 = vor.u32 %v6288_v38, %v5835_v29  ;;  %v5813_v29 = vld [vmem:[%s8323_s17 + $0xcc] sm:$0xf0]  ;;  %v6247_v38 = vld [vmem:[%s8320_s14 + $0x80] sm:$0xf0] }
 0x3d4   : > { %v3622_v22 = vmul.f32 %v3621_v39, %v3615_v58  ;;  %v6267_v58 = vld [vmem:[%s8323_s17 + $0x50] sm:$0xf0]  ;;  %4022 = vmatpush.bf16.msra.mxu0 %v5836_v15  ;;  %v5923_v15 = vor.u32 %v6247_v38, %v5922_v30  ;;  %v6232_v30 = vld [vmem:[%s8320_s14 + $0x8] sm:$0xf0]  ;;  %v5864_v38 = vld [vmem:[%s8320_s14 + $0xc] sm:$0xf0] }
 0x3d5   : > { %v6287_v39 = vld [vmem:[%s8323_s17 + $0xf4] sm:$0xf]  ;;  %v5752_v19 = vor.u32 %v6267_v58, %v5751_v31  ;;  %v6246_v31 = vld [vmem:[%s8320_s14 + $0x7c] sm:$0xf]  ;;  %v5924_v58 = vld [vmem:[%s8320_s14 + $0x84] sm:$0xf0] }
 0x3d6   : > { %v3624_v41 = vsub.f32 0.0, %v3622_v22  ;;  %v5768_v22 = vor.u32 %v6269_v26, %v5765_v21  ;;  %v5936_v26 = vld [vmem:[%s8320_s14 + $0x9c] sm:$0xf0] }
 0x3d7   : > { %4007 = vmatpush.bf16.msra.mxu3 %v5752_v19  ;;  %v5939_v23 = vor.u32 %v6249_v34, %v5936_v26  ;;  %v5910_v19 = vld [vmem:[%s8320_s14 + $0x60] sm:$0xf]  ;;  %v6234_v34 = vld [vmem:[%s8320_s14 + $0x1c] sm:$0xf]  ;;  %v5876_v26 = vld [vmem:[%s8320_s14 + $0x24] sm:$0xf0] }
 0x3d8   : > { %v3625_v37 = vmul.f32 1.442695, %v3624_v41  ;;  %v5837_v41 = vld [vmem:[%s8323_s17 + $0xfc] sm:$0xf0]  ;;  %4034 = vmatpush.bf16.msrb.mxu1 %v5768_v22  ;;  %v5855_v22 = vld [vmem:[%s8323_s17 + $0x110] sm:$0xf] }
 0x3d9   : > { %v5840_v13 = vor.u32 %v6287_v39, %v5837_v41  ;;  %v5927_v39 = vor.u32 %v6246_v31, %v5924_v58  ;;  %v6292_v41 = vld [vmem:[%s8323_s17 + $0x118] sm:$0xf0]  ;;  %v5735_v31 = vld [vmem:[%s8323_s17 + $0x20] sm:$0xf]  ;;  %v6262_v58 = vld [vmem:[%s8323_s17 + $0x28] sm:$0xf0] }
 0x3da   : > { %6307 = vpow2.f32 %v3625_v37  ;;  %v6285_v37 = vld [vmem:[%s8323_s17 + $0xe0] sm:$0xf0] }
 0x3e0   : > { %v6308_v47 = vpop.eup %6307 }
 0x3e1   : > { %v3627_v49 = vadd.f32 1.0, %v6308_v47  ;;  %v6264_v47 = vld [vmem:[%s8323_s17 + $0x38] sm:$0xf0] }
 0x3e3   : > { %6309 = vrcp.f32 %v3627_v49  ;;  %v3639_v40 = vand.u32 2147483648, %v3627_v49  ;;  %v3637_v56 = vand.u32 2147483647, %v3627_v49  ;;  %vm3633_vm11 = vweird.f32 %v3627_v49 }
 0x3e5   : > { %v3640_v59 = vor.u32 1.1754944e-38, %v3639_v40  ;;  %vm3638_vm13 = vcmp.eq.f32.partialorder %v3637_v56, 8.507059e+37  ;;  %v5811_v40 = vld [vmem:[%s8323_s17 + $0xc0] sm:$0xf] }
 0x3e6   : > { %v5741_v56 = vld [vmem:[%s8323_s17 + $0x3c] sm:$0xf0] }
 0x3e9   : > { %v6310_v43 = vpop.eup %6309 }
 0x3ea   : > { %v3629_v48 = vmul.f32 %v6310_v43, %v3627_v49  ;;  %vm3634_vm10 = vweird.f32 %v6310_v43  ;;  %v5824_v49 = vor.u32 %v6285_v37, %v5823_v42  ;;  %v6244_v37 = vld [vmem:[%s8320_s14 + $0x68] sm:$0xf0] }
 0x3eb   : > { %vm3635_vm12 = vmor %vm3633_vm11, %vm3634_vm10 }
 0x3ec   : > { %v3630_v51 = vsub.f32 1.0, %v3629_v48  ;;  %v6263_v48 = vld [vmem:[%s8323_s17 + $0x34] sm:$0xf]  ;;  %4023 = vmatpush.bf16.msra.mxu0 %v5824_v49  ;;  %v6289_v49 = vld [vmem:[%s8323_s17 + $0x100] sm:$0xf0] }
 0x3ed   : > { %v5744_v62 = vor.u32 %v6263_v48, %v5741_v56  ;;  %v5898_v56 = vld [vmem:[%s8320_s14 + $0x48] sm:$0xf] }
 0x3ee   : > { %v3631_v52 = vmul.f32 %v6310_v43, %v3630_v51  ;;  %v5828_v51 = vor.u32 %v6284_v27, %v5825_v44  ;;  %v6243_v27 = vld [vmem:[%s8320_s14 + $0x64] sm:$0xf]  ;;  %v5911_v44 = vor.u32 %v6244_v37, %v5910_v19 }
 0x3f0   : > { %v3632_v57 = vadd.f32 %v6310_v43, %v3631_v52  ;;  %v6282_v52 = vld [vmem:[%s8323_s17 + $0xc8] sm:$0xf0] }
 0x3f2   : > { %v3636_v60 = vsel %vm3635_vm12, %v6310_v43, %v3632_v57  ;;  %v5756_v43 = vor.u32 %v6266_v32, %v5753_v36  ;;  %v5807_v57 = vld [vmem:[%s8323_s17 + $0xb0] sm:$0xf]  ;;  %v5795_v32 = vld [vmem:[%s8323_s17 + $0x98] sm:$0xf]  ;;  %v5856_v36 = vor.u32 %v6292_v41, %v5855_v22  ;;  %v5736_v22 = vor.u32 %v6262_v58, %v5735_v31  ;;  %v5723_v41 = vld [vmem:[%s8323_s17 + $0x8] sm:$0xf] }
 0x3f3   : > { %v3641_v53 = vsel %vm3638_vm13, %v3640_v59, %v3636_v60  ;;  %v6280_v59 = vld [vmem:[%s8323_s17 + $0xb8] sm:$0xf0]  ;;  %v5740_v60 = vor.u32 %v6264_v47, %v5739_v46  ;;  %v5912_v46 = vld [vmem:[%s8320_s14 + $0x6c] sm:$0xf0]  ;;  %v5843_v47 = vld [vmem:[%s8323_s17 + $0xf8] sm:$0xf] }
 0x3f4   : > { %v3643_v61 = vpack.c.bf16 %v3641_v53, %v3641_v53  ;;  %v5812_v53 = vor.u32 %v6282_v52, %v5811_v40  ;;  %v5808_v28 = vor.u32 %v6280_v59, %v5807_v57  ;;  %4035 = vmatpush.bf16.msrb.mxu1 %v5756_v43  ;;  %v5915_v43 = vor.u32 %v6243_v27, %v5912_v46  ;;  %v6274_v40 = vld [vmem:[%s8323_s17 + $0x88] sm:$0xf0]  ;;  %v6241_v57 = vld [vmem:[%s8320_s14 + $0x50] sm:$0xf0] }
 0x3f5   : > { %4008 = vmatpush.bf16.msra.mxu3 %v5740_v60  ;;  %v5844_v48 = vor.u32 %v6289_v49, %v5843_v47  ;;  %v6240_v59 = vld [vmem:[%s8320_s14 + $0x4c] sm:$0xf]  ;;  %v5899_v60 = vor.u32 %v6241_v57, %v5898_v56  ;;  %v5954_v47 = vld [vmem:[%s8320_s14 + $0xb0] sm:$0xf]  ;;  %v6254_v49 = vld [vmem:[%s8320_s14 + $0xb8] sm:$0xf0] }
 0x3f6   : > { %3705 = vrot.lane.b32.xlu0 %v3643_v61, %s6323_s30  ;;  %5702 = vmatmul.msk.bf16.vlgmr.msrb.gmra.mxu2 %vm3645_vm14, %v3643_v61  ;;  %v5727_v61 = vld [vmem:[%s8323_s17 + $0x18] sm:$0xf] }
 0x3f7   : > { %4049 = vmatpush.bf16.msrb.mxu2 %v5852_v33  ;;  %v5728_v1 = vor.u32 %v6261_v24, %v5727_v61  ;;  %4024 = vmatpush.bf16.msra.mxu0 %v5812_v53  ;;  %v5816_v33 = vor.u32 %v6281_v25, %v5813_v29  ;;  %v5900_v53 = vld [vmem:[%s8320_s14 + $0x54] sm:$0xf0]  ;;  %v5831_v61 = vld [vmem:[%s8323_s17 + $0xe0] sm:$0xf]  ;;  %v6286_v24 = vld [vmem:[%s8323_s17 + $0xe8] sm:$0xf0] }
 0x3f8   : > { %4036 = vmatpush.bf16.msrb.mxu1 %v5744_v62  ;;  %v5832_v62 = vor.u32 %v6286_v24, %v5831_v61  ;;  %v5862_v29 = vld [vmem:[%s8320_s14] sm:$0xf]  ;;  %v6313_v61 = vld [vmem:[#allocation4 + $0x9] sm:$0xff] }
 0x3f9   : > { %4009 = vmatpush.bf16.msra.mxu3 %v5728_v1  ;;  %v5772_v1 = vor.u32 %v6271_v0, %v5771_v63 }
 0x3fb   : > { %4050 = vmatpush.bf16.msrb.mxu2 %v5840_v13  ;;  %v6277_v13 = vld [vmem:[%s8323_s17 + $0xa0] sm:$0xf0] }
 0x3fc   : > { %4037 = vmatpush.bf16.msrb.mxu1 %v5732_v4  ;;  %v5796_v42 = vor.u32 %v6277_v13, %v5795_v32  ;;  %v6237_v4 = vld [vmem:[%s8320_s14 + $0x34] sm:$0xf] }
 0x3fd   : > { %4010 = vmatpush.bf16.msra.mxu3 %v5716_v7  ;;  %v5891_v10 = vor.u32 %v6237_v4, %v5888_v9  ;;  %v6283_v7 = vld [vmem:[%s8323_s17 + $0xd0] sm:$0xf0]  ;;  %v5894_v4 = vld [vmem:[%s8320_s14 + $0x38] sm:$0xf] }
 0x3fe   : > { %v6259_v32 = vld [vmem:[%s8323_s17 + $0x10] sm:$0xf0] }
 0x3ff   : > { %4051 = vmatpush.bf16.msrb.mxu2 %v5828_v51  ;;  %v5783_v51 = vld [vmem:[%s8323_s17 + $0x80] sm:$0xf] }
 0x400   : > { %4038 = vmatpush.bf16.msrb.mxu1 %v5720_v14  ;;  %v5784_v52 = vor.u32 %v6274_v40, %v5783_v51  ;;  %v5955_v51 = vor.u32 %v6254_v49, %v5954_v47  ;;  %v5942_v40 = vld [vmem:[%s8320_s14 + $0x98] sm:$0xf] }
 0x401   : > { %4215 = vmatpush.bf16.msrb.mxu3 %v5947_v45  ;;  %v6268_v45 = vld [vmem:[%s8323_s17 + $0x58] sm:$0xf0] }
 0x403   : > { %4052 = vmatpush.bf16.msrb.mxu2 %v5816_v33  ;;  %v6231_v33 = vld [vmem:[%s8320_s14 + $0x4] sm:$0xf] }
 0x405   : > { %4216 = vmatpush.bf16.msrb.mxu3 %v5935_v50  ;;  %v5879_v50 = vor.u32 %v6234_v34, %v5876_v26  ;;  %v4257_v34 = vld [vmem:[%s8326_s20] sm:$0x7] }
 0x406   : > { %v4259_v58 = vperm.slane %v4257_v34, 0 }
 0x409   : > { %4217 = vmatpush.bf16.msrb.mxu3 %v5923_v15  ;;  %v5863_v15 = vor.u32 %v6232_v30, %v5862_v29 }
 0x40d   : > { %4218 = vmatpush.bf16.msrb.mxu3 %v5911_v44 }
 0x411   : > { %4219 = vmatpush.bf16.msrb.mxu3 %v5899_v60  ;;  %v6312_v60 = vld [vmem:[#allocation4 + $0x1] sm:$0xff] }
 0x415   : > { %4220 = vmatpush.bf16.msrb.mxu3 %v5887_v8  ;;  %v6239_v8 = vld [vmem:[%s8320_s14 + $0x40] sm:$0xf0] }
 0x416   : > { %v5895_v9 = vor.u32 %v6239_v8, %v5894_v4 }
 0x468   : > { %v3706_v12 = vpop.permute.xlu0 %3705 }
 0x469   : > { %5711 = vmatmul.msk.bf16.vlgmr.msrb.gmra.mxu0 %vm3715_vm15, %v3706_v12  ;;  %5712 = vmatmul.msk.bf16.vlgmr.msra.gmra.mxu2 %vm3715_vm15, %v3706_v12  ;;  %v5948_v12 = vld [vmem:[%s8320_s14 + $0xb4] sm:$0xf0] }
 0x46a   : > { %4059 = vmatpush.bf16.msrb.mxu0 %v5808_v28  ;;  %v5951_v18 = vor.u32 %v6252_v20, %v5948_v12  ;;  %4077 = vmatpush.bf16.msra.mxu2 %v5856_v36  ;;  %v5903_v28 = vor.u32 %v6240_v59, %v5900_v53  ;;  %v5820_v20 = vor.u32 %v6283_v7, %v5819_v11  ;;  %v5759_v12 = vld [vmem:[%s8323_s17 + $0x50] sm:$0xf]  ;;  %v6248_v59 = vld [vmem:[%s8320_s14 + $0x88] sm:$0xf0] }
 0x46b   : > { %v5760_v14 = vor.u32 %v6268_v45, %v5759_v12  ;;  %v5724_v36 = vor.u32 %v6259_v32, %v5723_v41  ;;  %v6236_v11 = vld [vmem:[%s8320_s14 + $0x28] sm:$0xf0]  ;;  %v6233_v12 = vld [vmem:[%s8320_s14 + $0x10] sm:$0xf0] }
 0x46c   : > { %4229 = vmatpush.bf16.msra.mxu1 %v5951_v18  ;;  %v5875_v18 = vor.u32 %v6235_v17, %v5874_v16 }
 0x46e   : > { %4060 = vmatpush.bf16.msrb.mxu0 %v5796_v42  ;;  %4078 = vmatpush.bf16.msra.mxu2 %v5844_v48 }
 0x46f   : > { %4221 = vmatpush.bf16.msrb.mxu3 %v5875_v18 }
 0x470   : > { %4230 = vmatpush.bf16.msra.mxu1 %v5939_v23  ;;  %v6265_v23 = vld [vmem:[%s8323_s17 + $0x40] sm:$0xf0] }
 0x472   : > { %4061 = vmatpush.bf16.msrb.mxu0 %v5784_v52  ;;  %4079 = vmatpush.bf16.msra.mxu2 %v5832_v62  ;;  %v6251_v52 = vld [vmem:[%s8320_s14 + $0xa0] sm:$0xf0]  ;;  %v6245_v62 = vld [vmem:[%s8320_s14 + $0x70] sm:$0xf0] }
 0x473   : > { %4222 = vmatpush.bf16.msrb.mxu3 %v5863_v15 }
 0x474   : > { %4231 = vmatpush.bf16.msra.mxu1 %v5927_v39  ;;  %v5867_v39 = vor.u32 %v6231_v33, %v5864_v38 }
 0x476   : > { %4062 = vmatpush.bf16.msrb.mxu0 %v5772_v1  ;;  %4080 = vmatpush.bf16.msra.mxu2 %v5820_v20  ;;  %v5906_v1 = vld [vmem:[%s8320_s14 + $0x50] sm:$0xf]  ;;  %v5870_v20 = vld [vmem:[%s8320_s14 + $0x8] sm:$0xf] }
 0x477   : > { %v5907_v54 = vor.u32 %v6242_v5, %v5906_v1  ;;  %v5871_v45 = vor.u32 %v6233_v12, %v5870_v20 }
 0x478   : > { %4232 = vmatpush.bf16.msra.mxu1 %v5915_v43 }
 0x479   : > { %v8048_v3 = vpop.f32.mrf.mxu2 }
 0x47a   : > { %4063 = vmatpush.bf16.msrb.mxu0 %v5760_v14  ;;  %v3666_v56 = vperm.slane %v8048_v3, 0 }
 0x47c   : > { %4233 = vmatpush.bf16.msra.mxu1 %v5903_v28  ;;  %v3667_v53 = vmul.f32 %v6312_v60, %v3666_v56  ;;  %v3668_v24 = vmul.f32 %v6313_v61, %v3666_v56  ;;  %v5918_v28 = vld [vmem:[%s8320_s14 + $0x68] sm:$0xf] }
 0x47d   : > { %v5919_v0 = vor.u32 %v6245_v62, %v5918_v28 }
 0x47e   : > { %v3669_v63 = vpack.c.bf16 %v3668_v24, %v3667_v53 }
 0x480   : > { %4234 = vmatpush.bf16.msra.mxu1 %v5891_v10  ;;  %v5882_v10 = vld [vmem:[%s8320_s14 + $0x20] sm:$0xf] }
 0x481   : > { %v3664_v21 = vpop.f32.mrf.mxu2  ;;  %v5883_v7 = vor.u32 %v6236_v11, %v5882_v10 }
 0x482   : > { %v5747_v21 = vld [vmem:[%s8323_s17 + $0x38] sm:$0xf] }
 0x483   : > { %v5748_v25 = vor.u32 %v6265_v23, %v5747_v21 }
 0x484   : > { %4235 = vmatpush.bf16.msra.mxu1 %v5879_v50  ;;  %v4260_v50 = vperm.slane %v4257_v34, 1 }
 0x485   : > { %4064 = vmatpush.bf16.msrb.mxu0 %v5748_v25 }
 0x488   : > { %4236 = vmatpush.bf16.msra.mxu1 %v5867_v39 }
 0x489   : > { %4065 = vmatpush.bf16.msrb.mxu0 %v5736_v22 }
 0x48d   : > { %4066 = vmatpush.bf16.msrb.mxu0 %v5724_v36 }
 0x4e6   : > { %v3735_v13 = vpop.f32.mrf.mxu0 }
 0x4e7   : > { %v3752_v42 = vperm.slane %v3735_v13, 0 }
 0x4e9   : > { %v3754_v19 = vmul.f32 %v3752_v42, %v7888_v6  ;;  %v3756_v37 = vmul.f32 %v3752_v42, %v7890_v55 }
 0x4eb   : > { %v3758_v27 = vpack.c.bf16 %v3756_v37, %v3754_v19 }
 0x4ec   : > { %v3748_v44 = vpop.f32.mrf.mxu2 }
 0x4ed   : > { %v3753_v46 = vperm.slane %v3748_v44, 0  ;;  %4011 = vmatmul.bf16.vlgmr.msra.gmra.mxu3 %v3758_v27  ;;  %4039 = vmatmul.bf16.vlgmr.msrb.gmra.mxu1 %v3758_v27 }
 0x4ee   : > { %v3737_v43 = vpop.f32.mrf.mxu0 }
 0x4ef   : > { %v3755_v48 = vmul.f32 %v3753_v46, %v7874_v35  ;;  %v3757_v6 = vmul.f32 %v3753_v46, %v7880_v2  ;;  %v5943_v35 = vor.u32 %v6251_v52, %v5942_v40  ;;  %v5930_v2 = vld [vmem:[%s8320_s14 + $0x80] sm:$0xf] }
 0x4f0   : > { %v5931_v3 = vor.u32 %v6248_v59, %v5930_v2 }
 0x4f1   : > { %v3759_v55 = vpack.c.bf16 %v3757_v6, %v3755_v48 }
 0x4f3   : > { %5857 = vmatmul.msk.bf16.vlgmr.msra.gmra.mxu0 %vm692_vm3, %v3759_v55  ;;  %5858 = vmatmul.msk.bf16.vlgmr.msrb.gmra.mxu2 %vm692_vm3, %v3759_v55 }
 0x4f4   : > { %v3750_v57 = vpop.f32.mrf.mxu2  ;;  %4243 = vmatpush.bf16.msrb.mxu2 %v5955_v51 }
 0x4f5   : > { %v4261_v57 = vperm.slane %v4257_v34, 2 }
 0x4f8   : > { %4244 = vmatpush.bf16.msrb.mxu2 %v5943_v35 }
 0x4fc   : > { %4245 = vmatpush.bf16.msrb.mxu2 %v5931_v3 }
 0x4fd   : > { %4223 = vmatmul.bf16.vlgmr.msrb.gmra.mxu3 %v3669_v63  ;;  %4237 = vmatmul.bf16.vlgmr.msra.gmra.mxu1 %v3669_v63 }
 0x500   : > { %4246 = vmatpush.bf16.msrb.mxu2 %v5919_v0 }
 0x503   : > { %4067 = vmatmul.bf16.vlgmr.msrb.gmra.mxu0 %v3758_v27  ;;  %5859 = vmatmul.msk.bf16.vlgmr.msra.gmra.mxu2 %vm692_vm3, %v3759_v55 }
 0x504   : > { %4247 = vmatpush.bf16.msrb.mxu2 %v5907_v54 }
 0x508   : > { %4248 = vmatpush.bf16.msrb.mxu2 %v5895_v9 }
 0x50c   : > { %4249 = vmatpush.bf16.msrb.mxu2 %v5883_v7 }
 0x510   : > { %4250 = vmatpush.bf16.msrb.mxu2 %v5871_v45 }
 0x513   : > { %4251 = vmatmul.bf16.vlgmr.msrb.gmra.mxu2 %v3669_v63 }
 0x56a   : > { %v4040_v14 = vpop.f32.mrf.mxu1 }
 0x570   : > { %v4012_v16 = vpop.f32.mrf.mxu3  ;;  %v4026_v23 = vpop.f32.mrf.mxu0 }
 0x571   : > { %v4027_v38 = vadd.f32 %v4026_v23, %v4012_v16 }
 0x572   : > { %v4042_v17 = vpop.f32.mrf.mxu1 }
 0x576   : > { %v4054_v18 = vpop.f32.mrf.mxu2 }
 0x577   : > { %v4055_v21 = vadd.f32 %v4054_v18, %v4040_v14 }
 0x578   : > { %v4014_v26 = vpop.f32.mrf.mxu3  ;;  %v4028_v42 = vpop.f32.mrf.mxu0 }
 0x579   : > { %v4029_v44 = vadd.f32 %v4028_v42, %v4014_v26 }
 0x57a   : > { %v4238_v25 = vpop.f32.mrf.mxu1 }
 0x57b   : > { %v4239_v29 = vadd.f32 %v4238_v25, %v4055_v21 }
 0x57d   : > { %v4266_v30 = vadd.f32 %v4260_v50, %v4239_v29 }
 0x57e   : > { %v4056_v33 = vpop.f32.mrf.mxu2 }
 0x57f   : > { %v4272_v31 = vmax.f32 %v4266_v30, 0.0  ;;  %v4057_v22 = vadd.f32 %v4056_v33, %v4042_v17 }
 0x580   : > { %v4224_v15 = vpop.f32.mrf.mxu3  ;;  %v4068_v52 = vpop.f32.mrf.mxu0 }
 0x581   : > { %v4278_v39 = vmin.f32 %v4272_v31, 6.0  ;;  %v4225_v41 = vadd.f32 %v4224_v15, %v4027_v38 }
 0x582   : > { %v4240_v32 = vpop.f32.mrf.mxu1 }
 0x583   : > { %4284 = vst [vmem:[%s8293_s0 + $0x8] sm:$0xff] %v4278_v39  ;;  %v4265_v36 = vadd.f32 %v4259_v58, %v4225_v41  ;;  %v4241_v13 = vadd.f32 %v4240_v32, %v4057_v22 }
 0x585   : > { %v4271_v19 = vmax.f32 %v4265_v36, 0.0  ;;  %v4269_v37 = vadd.f32 %v4260_v50, %v4241_v13 }
 0x586   : > { %v4082_v27 = vpop.f32.mrf.mxu2 }
 0x587   : > { %v4277_v46 = vmin.f32 %v4271_v19, 6.0  ;;  %v4275_v47 = vmax.f32 %v4269_v37, 0.0  ;;  %v4083_v56 = vadd.f32 %v4082_v27, %v4068_v52 }
 0x588   : > { %v4226_v49 = vpop.f32.mrf.mxu3  ;;  %v4070_v53 = vpop.f32.mrf.mxu0 }
 0x589   : > { %4283 = vst [vmem:[%s8293_s0] sm:$0xff] %v4277_v46  ;;  %v4281_v43 = vmin.f32 %v4275_v47, 6.0  ;;  %v4227_v48 = vadd.f32 %v4226_v49, %v4029_v44 }
 0x58b   : > { %4287 = vst [vmem:[%s8293_s0 + $0x20] sm:$0xff] %v4281_v43  ;;  %v4268_v6 = vadd.f32 %v4259_v58, %v4227_v48 }
 0x58d   : > { %v4274_v51 = vmax.f32 %v4268_v6, 0.0 }
 0x58e   : > { %v4084_v55 = vpop.f32.mrf.mxu2 }
 0x58f   : > { %v4280_v40 = vmin.f32 %v4274_v51, 6.0  ;;  %v4085_v61 = vadd.f32 %v4084_v55, %v4070_v53 }
 0x591   : > { %4286 = vst [vmem:[%s8293_s0 + $0x18] sm:$0xff] %v4280_v40 }
 0x596   : > { %v4252_v35 = vpop.f32.mrf.mxu2 }
 0x597   : > { %v4253_v2 = vadd.f32 %v4252_v35, %v4083_v56 }
 0x599   : > { %v4267_v59 = vadd.f32 %v4261_v57, %v4253_v2 }
 0x59b   : > { %v4273_v60 = vmax.f32 %v4267_v59, 0.0 }
 0x59d   : > { %v4279_v24 = vmin.f32 %v4273_v60, 6.0 }
 0x59e   : > { %v4254_v3 = vpop.f32.mrf.mxu2 }
 0x59f   : > { %4285 = vst.msk [vmem:[%s8293_s0 + $0x10] sm:$0xff] %vm692_vm3, %v4279_v24  ;;  %v4255_v28 = vadd.f32 %v4254_v3, %v4085_v61 }
 0x5a1   : > { %v4270_v62 = vadd.f32 %v4261_v57, %v4255_v28 }
 0x5a3   : > { %v4276_v63 = vmax.f32 %v4270_v62, 0.0 }
 0x5a5   : > { %v4282_v0 = vmin.f32 %v4276_v63, 6.0 }
 0x5a7   : > { %4288 = vst.msk [vmem:[%s8293_s0 + $0x28] sm:$0xff] %vm692_vm3, %v4282_v0 }
 0x5a8 PF: > { %s31_s2 = sadd.s32 1, %s6320_s2  }
 0x5a9   : > { %p28_p4 = scmp.ge.s32.totalorder %s31_s2, 4  }
 0x5ab   :  { %30 = sbr.rel (!%p28_p4) target bundleno = 7 (0x7), region = 149 }

</bundles_post_ra>
